<compile_context>
chip_gen: v6e
topology: v6e:2x2x1
jax: 0.10.0
libtpu: 0.0.40
codegen_flags: <defaults>
</compile_context>

<pallas_src>
import jax
import jax.numpy as jnp
from jax import lax
from jax.experimental import pallas as pl
from jax.experimental.pallas import tpu as pltpu

# ---- scaled-down CLIP vision config (original HF values in comments) ----
HIDDEN = 128           # hidden_size (768)
HEADS = 4              # num_attention_heads (12)
HEAD_DIM = HIDDEN // HEADS
INTERMEDIATE = 512     # intermediate_size (3072)
IMAGE = 32             # image_size (224)
CHANNELS = 3           # num_channels (3)
PATCH = 8              # patch_size (32)
LAYERS = 2             # num_hidden_layers (12)
EPS = 1e-5             # layer_norm_eps
PROJ = 128             # projection_dim (512)
N_PATCH = (IMAGE // PATCH) ** 2
SEQ = N_PATCH + 1
SEQ_PAD = ((SEQ + 15) // 16) * 16       # bf16 (16,128)-tile aligned (17 -> 32)
PATCH_DIM = CHANNELS * PATCH * PATCH
SCALE = HEAD_DIM ** (-0.5)
NEG_INF = -1e30


# ------------------------------------------------------------------ helpers
def _ln(x, w, b):
    """LayerNorm over last axis (biased variance, like torch.nn.LayerNorm)."""
    mu = jnp.mean(x, axis=-1, keepdims=True)
    xc = x - mu
    var = jnp.mean(xc * xc, axis=-1, keepdims=True)
    return xc * lax.rsqrt(var + EPS) * w + b


# ------------------------------------------------------------------ kernel
def _clip_kernel(patches_ref, pw_ref, pos_ref, prew_ref, preb_ref,
                 ln1w, ln1b, qkvw, qkvb, ow, ob,
                 ln2w, ln2b, f1w, f1b, f2w, f2b,
                 postw, postb, projw,
                 h_ref, emb_ref):
    l = pl.program_id(1)

    # ---- fused embedding + pre_layrnorm on the first layer step ----
    @pl.when(l == 0)
    def _():
        emb = jnp.dot(patches_ref[0], pw_ref[...],
                      preferred_element_type=jnp.float32) + pos_ref[...]
        h0 = _ln(emb, prew_ref[...], preb_ref[...])
        valid = lax.broadcasted_iota(jnp.int32, (SEQ_PAD, 1), 0) < SEQ
        h_ref[0] = jnp.where(valid, h0, 0.0)     # keep pad rows zero / bounded

    x = h_ref[0]                                           # (SEQ_PAD, HIDDEN)

    # additive key-padding bias (once per step, not per head)
    key_bias = jnp.where(
        lax.broadcasted_iota(jnp.int32, (1, SEQ_PAD), 1) < SEQ, 0.0, NEG_INF)

    # ---- LayerNorm 1 + fused QKV projection (one MXU pass, N=3*HIDDEN) ----
    h1 = _ln(x, ln1w[l], ln1b[l]).astype(jnp.bfloat16)
    qkv = jnp.dot(h1, qkvw[l], preferred_element_type=jnp.float32) + qkvb[l]
    q = (qkv[:, :HIDDEN] * SCALE).astype(jnp.bfloat16)
    k = qkv[:, HIDDEN:2 * HIDDEN].astype(jnp.bfloat16)
    v = qkv[:, 2 * HIDDEN:].astype(jnp.bfloat16)

    # ---- multi-head attention; per-head contexts stay in registers ----
    ctx_heads = []
    for hh in range(HEADS):                                # static head loop
        s0 = hh * HEAD_DIM
        qh = q[:, s0:s0 + HEAD_DIM]
        kh = k[:, s0:s0 + HEAD_DIM]
        vh = v[:, s0:s0 + HEAD_DIM]
        scores = lax.dot_general(qh, kh, (((1,), (1,)), ((), ())),
                                 preferred_element_type=jnp.float32)  # (S,S)
        scores = scores + key_bias
        scores = scores - jnp.max(scores, axis=-1, keepdims=True)
        p = jnp.exp(scores)
        p = p * pl.reciprocal(jnp.sum(p, axis=-1, keepdims=True), approx=True)
        ctx_heads.append(jnp.dot(p.astype(jnp.bfloat16), vh,
                                 preferred_element_type=jnp.float32))
    ctx = jnp.concatenate(ctx_heads, axis=-1).astype(jnp.bfloat16)

    # single K=HIDDEN out-projection over the concatenated heads
    attn = jnp.dot(ctx, ow[l], preferred_element_type=jnp.float32) + ob[l]
    x = x + attn

    # ---- LayerNorm 2 + QuickGELU MLP ----
    # (at real INTERMEDIATE=3072, tile this loop over 512-1024-wide chunks)
    h2 = _ln(x, ln2w[l], ln2b[l]).astype(jnp.bfloat16)
    f = jnp.dot(h2, f1w[l], preferred_element_type=jnp.float32) + f1b[l]
    f = f * jax.nn.sigmoid(1.702 * f)                      # QuickGELU (f32)
    f = jnp.dot(f.astype(jnp.bfloat16), f2w[l],
                preferred_element_type=jnp.float32) + f2b[l]
    x = x + f
    h_ref[0] = x

    # fused head: post_layernorm(pooled) @ visual_projection on last layer
    @pl.when(l == pl.num_programs(1) - 1)
    def _():
        pooled = _ln(x[0:1, :], postw[...], postb[...]).astype(jnp.bfloat16)
        emb_ref[0] = jnp.dot(pooled, projw[...],
                             preferred_element_type=jnp.float32)


# ------------------------------------------------------------------ glue
def extract_patches(pixel):
    """NCHW -> (B, num_patches, C*P*P), patch vector ordered (c, ph, pw)."""
    B = pixel.shape[0]
    hp = IMAGE // PATCH
    x = pixel.reshape(B, CHANNELS, hp, PATCH, hp, PATCH)
    x = x.transpose(0, 2, 4, 1, 3, 5)          # (B, hp, wp, C, P, P)
    return x.reshape(B, N_PATCH, PATCH_DIM)


def clip_vision_with_projection(pixel, params):
    B = pixel.shape[0]

    # Conv2d(stride==kernel, no bias) == patch matmul.  Row 0 (class token
    # slot) and pad rows hold zero patch vectors; the class embedding is
    # folded into the position-embedding table at row 0.
    flat = extract_patches(pixel)                          # (B, N_PATCH, PDIM)
    patches = jnp.pad(flat, ((0, 0), (1, SEQ_PAD - SEQ), (0, 0))) \
        .astype(jnp.bfloat16)
    pos_full = (jnp.zeros((SEQ_PAD, HIDDEN), jnp.float32)
                .at[:SEQ].set(params['pos_emb'])
                .at[0].add(params['class_emb']))

    L = params['layers']
    # fused QKV weight/bias (matches kernel slicing order: q | k | v)
    qkv_w = jnp.concatenate([L['q_w'], L['k_w'], L['v_w']],
                            axis=-1).astype(jnp.bfloat16)
    qkv_b = jnp.concatenate([L['q_b'], L['k_b'], L['v_b']], axis=-1)

    inputs = [
        patches,
        params['patch_w'].astype(jnp.bfloat16),
        pos_full,
        params['pre_ln_w'], params['pre_ln_b'],
        L['ln1_w'], L['ln1_b'],
        qkv_w, qkv_b,
        L['o_w'].astype(jnp.bfloat16), L['o_b'],
        L['ln2_w'], L['ln2_b'],
        L['fc1_w'].astype(jnp.bfloat16), L['fc1_b'],
        L['fc2_w'].astype(jnp.bfloat16), L['fc2_b'],
        params['post_ln_w'], params['post_ln_b'],
        params['proj_w'].astype(jnp.bfloat16),
    ]

    def const_spec(arr):
        # full-array block, constant index map -> DMA'd once, VMEM-resident
        nd = arr.ndim
        return pl.BlockSpec(arr.shape, lambda b, l, _nd=nd: (0,) * _nd)

    in_specs = ([pl.BlockSpec((1, SEQ_PAD, PATCH_DIM), lambda b, l: (b, 0, 0))]
                + [const_spec(a) for a in inputs[1:]])

    hidden_pad, emb_out = pl.pallas_call(
        _clip_kernel,
        grid=(B, LAYERS),
        in_specs=in_specs,
        out_specs=[pl.BlockSpec((1, SEQ_PAD, HIDDEN), lambda b, l: (b, 0, 0)),
                   pl.BlockSpec((1, 1, PROJ), lambda b, l: (b, 0, 0))],
        out_shape=(jax.ShapeDtypeStruct((B, SEQ_PAD, HIDDEN), jnp.float32),
                   jax.ShapeDtypeStruct((B, 1, PROJ), jnp.float32)),
        compiler_params=pltpu.CompilerParams(
            dimension_semantics=("parallel", "arbitrary"),
            # modest scoped limit: leaves headroom on v7x's 64 MiB VMEM
            vmem_limit_bytes=48 * 1024 * 1024),
    )(*inputs)

    image_embeds = emb_out[:, 0, :]
    last_hidden_state = hidden_pad[:, :SEQ, :]
    return image_embeds, last_hidden_state


# ------------------------------------------------------------------ params
def init_params(key):
    ks = iter(jax.random.split(key, 16))

    def nrm(shape, std):
        return (std * jax.random.normal(next(ks), shape)).astype(jnp.float32)

    def zeros(shape):
        return jnp.zeros(shape, jnp.float32)

    def ones(shape):
        return jnp.ones(shape, jnp.float32)

    factor, irange = 1.0, 0.02
    in_std = HIDDEN ** -0.5 * (2 * LAYERS) ** -0.5 * factor
    out_std = HIDDEN ** -0.5 * factor
    fc_std = (2 * HIDDEN) ** -0.5 * factor

    return {
        'class_emb': nrm((HIDDEN,), HIDDEN ** -0.5 * factor),
        'patch_w': nrm((PATCH_DIM, HIDDEN), irange * factor),
        'pos_emb': nrm((SEQ, HIDDEN), irange * factor),
        'pre_ln_w': ones((1, HIDDEN)), 'pre_ln_b': zeros((1, HIDDEN)),
        'post_ln_w': ones((1, HIDDEN)), 'post_ln_b': zeros((1, HIDDEN)),
        'proj_w': nrm((HIDDEN, PROJ), irange * factor),
        'layers': {   # stacked along a leading LAYERS axis
            'ln1_w': ones((LAYERS, 1, HIDDEN)), 'ln1_b': zeros((LAYERS, 1, HIDDEN)),
            'q_w': nrm((LAYERS, HIDDEN, HIDDEN), in_std), 'q_b': zeros((LAYERS, 1, HIDDEN)),
            'k_w': nrm((LAYERS, HIDDEN, HIDDEN), in_std), 'k_b': zeros((LAYERS, 1, HIDDEN)),
            'v_w': nrm((LAYERS, HIDDEN, HIDDEN), in_std), 'v_b': zeros((LAYERS, 1, HIDDEN)),
            'o_w': nrm((LAYERS, HIDDEN, HIDDEN), out_std), 'o_b': zeros((LAYERS, 1, HIDDEN)),
            'ln2_w': ones((LAYERS, 1, HIDDEN)), 'ln2_b': zeros((LAYERS, 1, HIDDEN)),
            'fc1_w': nrm((LAYERS, HIDDEN, INTERMEDIATE), fc_std),
            'fc1_b': zeros((LAYERS, 1, INTERMEDIATE)),
            'fc2_w': nrm((LAYERS, INTERMEDIATE, HIDDEN), in_std),
            'fc2_b': zeros((LAYERS, 1, HIDDEN)),
        },
    }


# ------------------------------------------------------------------ reference
def reference(pixel, params):
    B = pixel.shape[0]
    patch_emb = extract_patches(pixel) @ params['patch_w']   # (B, N_PATCH, H)
    cls = jnp.broadcast_to(params['class_emb'].reshape(1, 1, HIDDEN), (B, 1, HIDDEN))
    h = jnp.concatenate([cls, patch_emb], axis=1) + params['pos_emb'][None]

    def ln(x, w, b):
        mu = x.mean(-1, keepdims=True)
        xc = x - mu
        return xc / jnp.sqrt((xc * xc).mean(-1, keepdims=True) + EPS) \
            * w.reshape(-1) + b.reshape(-1)

    h = ln(h, params['pre_ln_w'], params['pre_ln_b'])
    L = params['layers']
    for l in range(LAYERS):
        r = h
        x = ln(h, L['ln1_w'][l], L['ln1_b'][l])
        q = (x @ L['q_w'][l] + L['q_b'][l].reshape(-1)) * SCALE
        k = x @ L['k_w'][l] + L['k_b'][l].reshape(-1)
        v = x @ L['v_w'][l] + L['v_b'][l].reshape(-1)
        q = q.reshape(B, SEQ, HEADS, HEAD_DIM).transpose(0, 2, 1, 3)
        k = k.reshape(B, SEQ, HEADS, HEAD_DIM).transpose(0, 2, 1, 3)
        v = v.reshape(B, SEQ, HEADS, HEAD_DIM).transpose(0, 2, 1, 3)
        s = jnp.einsum('bhqd,bhkd->bhqk', q, k)
        p = jax.nn.softmax(s, axis=-1)
        o = jnp.einsum('bhqk,bhkd->bhqd', p, v)
        o = o.transpose(0, 2, 1, 3).reshape(B, SEQ, HIDDEN)
        h = r + (o @ L['o_w'][l] + L['o_b'][l].reshape(-1))
        r = h
        x = ln(h, L['ln2_w'][l], L['ln2_b'][l])
        f = x @ L['fc1_w'][l] + L['fc1_b'][l].reshape(-1)
        f = f * jax.nn.sigmoid(1.702 * f)
        h = r + (f @ L['fc2_w'][l] + L['fc2_b'][l].reshape(-1))
    pooled = ln(h[:, 0, :], params['post_ln_w'], params['post_ln_b'])
    return pooled @ params['proj_w'], h


# ------------------------------------------------------------------ main
if __name__ == "__main__":
    key = jax.random.PRNGKey(0)
    pixel_values = jax.random.normal(key, (2, CHANNELS, IMAGE, IMAGE),
                                     jnp.float32)          # NCHW, like PyTorch
    params = init_params(jax.random.PRNGKey(1))

    image_embeds, last_hidden = clip_vision_with_projection(pixel_values, params)
    jax.block_until_ready((image_embeds, last_hidden))

    ref_embeds, ref_hidden = reference(pixel_values, params)
    assert image_embeds.shape == (2, PROJ)
    assert last_hidden.shape == (2, SEQ, HIDDEN)
    # bf16 matmul operands (f32 accumulation) + approx-reciprocal softmax
    # introduce ~1e-2-level relative error vs the pure-f32 reference.
    assert jnp.allclose(image_embeds, ref_embeds, atol=3e-2, rtol=3e-2)
    assert jnp.allclose(last_hidden, ref_hidden, atol=3e-2, rtol=3e-2)

    print("KERNEL_OK")
</pallas_src>

<mosaic_0001>
module attributes {stable_mosaic.version = 11 : i64} {
  func.func @_clip_kernel(%arg0: i32, %arg1: i32, %arg2: memref<1x32x192xbf16, #tpu.memory_space<vmem>>, %arg3: memref<192x128xbf16, #tpu.memory_space<vmem>>, %arg4: memref<32x128xf32, #tpu.memory_space<vmem>>, %arg5: memref<1x128xf32, #tpu.memory_space<vmem>>, %arg6: memref<1x128xf32, #tpu.memory_space<vmem>>, %arg7: memref<2x1x128xf32, #tpu.memory_space<vmem>>, %arg8: memref<2x1x128xf32, #tpu.memory_space<vmem>>, %arg9: memref<2x128x384xbf16, #tpu.memory_space<vmem>>, %arg10: memref<2x1x384xf32, #tpu.memory_space<vmem>>, %arg11: memref<2x128x128xbf16, #tpu.memory_space<vmem>>, %arg12: memref<2x1x128xf32, #tpu.memory_space<vmem>>, %arg13: memref<2x1x128xf32, #tpu.memory_space<vmem>>, %arg14: memref<2x1x128xf32, #tpu.memory_space<vmem>>, %arg15: memref<2x128x512xbf16, #tpu.memory_space<vmem>>, %arg16: memref<2x1x512xf32, #tpu.memory_space<vmem>>, %arg17: memref<2x512x128xbf16, #tpu.memory_space<vmem>>, %arg18: memref<2x1x128xf32, #tpu.memory_space<vmem>>, %arg19: memref<1x128xf32, #tpu.memory_space<vmem>>, %arg20: memref<1x128xf32, #tpu.memory_space<vmem>>, %arg21: memref<128x128xbf16, #tpu.memory_space<vmem>>, %arg22: memref<1x32x128xf32, #tpu.memory_space<vmem>>, %arg23: memref<1x1x128xf32, #tpu.memory_space<vmem>>) attributes {dimension_semantics = [#tpu.dimension_semantics<parallel>, #tpu.dimension_semantics<arbitrary>], iteration_bounds = array<i64: 2, 2>, scalar_prefetch = 0 : i64, scratch_operands = 0 : i64, tpu.core_type = #tpu.core_type<tc>, window_params = [{transform_indices = @transform_0, window_bounds = array<i64: 1, 32, 192>}, {pipeline_mode = #tpu.pipeline_mode<synchronous>, transform_indices = @transform_1, window_bounds = array<i64: 192, 128>}, {pipeline_mode = #tpu.pipeline_mode<synchronous>, transform_indices = @transform_2, window_bounds = array<i64: 32, 128>}, {pipeline_mode = #tpu.pipeline_mode<synchronous>, transform_indices = @transform_3, window_bounds = array<i64: 1, 128>}, {pipeline_mode = #tpu.pipeline_mode<synchronous>, transform_indices = @transform_4, window_bounds = array<i64: 1, 128>}, {pipeline_mode = #tpu.pipeline_mode<synchronous>, transform_indices = @transform_5, window_bounds = array<i64: 2, 1, 128>}, {pipeline_mode = #tpu.pipeline_mode<synchronous>, transform_indices = @transform_6, window_bounds = array<i64: 2, 1, 128>}, {pipeline_mode = #tpu.pipeline_mode<synchronous>, transform_indices = @transform_7, window_bounds = array<i64: 2, 128, 384>}, {pipeline_mode = #tpu.pipeline_mode<synchronous>, transform_indices = @transform_8, window_bounds = array<i64: 2, 1, 384>}, {pipeline_mode = #tpu.pipeline_mode<synchronous>, transform_indices = @transform_9, window_bounds = array<i64: 2, 128, 128>}, {pipeline_mode = #tpu.pipeline_mode<synchronous>, transform_indices = @transform_10, window_bounds = array<i64: 2, 1, 128>}, {pipeline_mode = #tpu.pipeline_mode<synchronous>, transform_indices = @transform_11, window_bounds = array<i64: 2, 1, 128>}, {pipeline_mode = #tpu.pipeline_mode<synchronous>, transform_indices = @transform_12, window_bounds = array<i64: 2, 1, 128>}, {pipeline_mode = #tpu.pipeline_mode<synchronous>, transform_indices = @transform_13, window_bounds = array<i64: 2, 128, 512>}, {pipeline_mode = #tpu.pipeline_mode<synchronous>, transform_indices = @transform_14, window_bounds = array<i64: 2, 1, 512>}, {pipeline_mode = #tpu.pipeline_mode<synchronous>, transform_indices = @transform_15, window_bounds = array<i64: 2, 512, 128>}, {pipeline_mode = #tpu.pipeline_mode<synchronous>, transform_indices = @transform_16, window_bounds = array<i64: 2, 1, 128>}, {pipeline_mode = #tpu.pipeline_mode<synchronous>, transform_indices = @transform_17, window_bounds = array<i64: 1, 128>}, {pipeline_mode = #tpu.pipeline_mode<synchronous>, transform_indices = @transform_18, window_bounds = array<i64: 1, 128>}, {pipeline_mode = #tpu.pipeline_mode<synchronous>, transform_indices = @transform_19, window_bounds = array<i64: 128, 128>}, {transform_indices = @transform_20, window_bounds = array<i64: 1, 32, 128>}, {transform_indices = @transform_21, window_bounds = array<i64: 1, 1, 128>}]} {
    %c0_i32 = arith.constant 0 : i32
    %0 = arith.cmpi eq, %arg1, %c0_i32 : i32
    %1 = arith.extui %0 : i1 to i32
    %c0_i32_0 = arith.constant 0 : i32
    %2 = arith.cmpi ne, %1, %c0_i32_0 : i32
    scf.if %2 {
      %c0_65 = arith.constant 0 : index
      %c0_66 = arith.constant 0 : index
      %c0_67 = arith.constant 0 : index
      %200 = vector.load %arg2[%c0_65, %c0_66, %c0_67] : memref<1x32x192xbf16, #tpu.memory_space<vmem>>, vector<1x32x192xbf16>
      %201 = vector.shape_cast %200 : vector<1x32x192xbf16> to vector<32x192xbf16>
      %c0_68 = arith.constant 0 : index
      %c0_69 = arith.constant 0 : index
      %202 = vector.load %arg3[%c0_68, %c0_69] : memref<192x128xbf16, #tpu.memory_space<vmem>>, vector<192x128xbf16>
      %cst_70 = arith.constant dense<0.000000e+00> : vector<32x128xf32>
      %203 = tpu.matmul %201, %202, %cst_70 {dimension_numbers = #tpu.dot_dimension_numbers<[1], [0], [0], [1], [0, 0, 1, 1], [], []>} : vector<32x192xbf16>, vector<192x128xbf16>, vector<32x128xf32> -> vector<32x128xf32>
      %c0_71 = arith.constant 0 : index
      %c0_72 = arith.constant 0 : index
      %204 = vector.load %arg4[%c0_71, %c0_72] : memref<32x128xf32, #tpu.memory_space<vmem>>, vector<32x128xf32>
      %205 = arith.addf %203, %204 : vector<32x128xf32>
      %c0_73 = arith.constant 0 : index
      %c0_74 = arith.constant 0 : index
      %206 = vector.load %arg5[%c0_73, %c0_74] : memref<1x128xf32, #tpu.memory_space<vmem>>, vector<1x128xf32>
      %c0_75 = arith.constant 0 : index
      %c0_76 = arith.constant 0 : index
      %207 = vector.load %arg6[%c0_75, %c0_76] : memref<1x128xf32, #tpu.memory_space<vmem>>, vector<1x128xf32>
      %cst_77 = arith.constant dense<0.000000e+00> : vector<32xf32>
      %208 = vector.multi_reduction <add>, %205, %cst_77 [1] : vector<32x128xf32> to vector<32xf32>
      %209 = vector.shape_cast %208 : vector<32xf32> to vector<32x1xf32>
      %cst_78 = arith.constant 1.280000e+02 : f32
      %210 = vector.broadcast %cst_78 : f32 to vector<32x1xf32>
      %211 = arith.divf %209, %210 : vector<32x1xf32>
      %212 = vector.broadcast %211 : vector<32x1xf32> to vector<32x128xf32>
      %213 = arith.subf %205, %212 : vector<32x128xf32>
      %214 = arith.mulf %213, %213 : vector<32x128xf32>
      %cst_79 = arith.constant dense<0.000000e+00> : vector<32xf32>
      %215 = vector.multi_reduction <add>, %214, %cst_79 [1] : vector<32x128xf32> to vector<32xf32>
      %216 = vector.shape_cast %215 : vector<32xf32> to vector<32x1xf32>
      %cst_80 = arith.constant 1.280000e+02 : f32
      %217 = vector.broadcast %cst_80 : f32 to vector<32x1xf32>
      %218 = arith.divf %216, %217 : vector<32x1xf32>
      %cst_81 = arith.constant 9.99999974E-6 : f32
      %219 = vector.broadcast %cst_81 : f32 to vector<32x1xf32>
      %220 = arith.addf %218, %219 : vector<32x1xf32>
      %221 = math.rsqrt %220 : vector<32x1xf32>
      %222 = vector.broadcast %221 : vector<32x1xf32> to vector<32x128xf32>
      %223 = arith.mulf %213, %222 : vector<32x128xf32>
      %224 = vector.broadcast %206 : vector<1x128xf32> to vector<32x128xf32>
      %225 = arith.mulf %223, %224 : vector<32x128xf32>
      %226 = vector.broadcast %207 : vector<1x128xf32> to vector<32x128xf32>
      %227 = arith.addf %225, %226 : vector<32x128xf32>
      %228 = tpu.iota {dimensions = array<i32: 0>} : vector<32x1xi32>
      %c17_i32_82 = arith.constant 17 : i32
      %229 = vector.broadcast %c17_i32_82 : i32 to vector<32x1xi32>
      %230 = arith.cmpi slt, %228, %229 : vector<32x1xi32>
      %cst_83 = arith.constant 0.000000e+00 : f32
      %231 = vector.shape_cast %230 : vector<32x1xi1> to vector<32x1xi1>
      %232 = vector.broadcast %231 : vector<32x1xi1> to vector<32x128xi1>
      %233 = vector.broadcast %cst_83 : f32 to vector<32x128xf32>
      %234 = arith.select %232, %227, %233 : vector<32x128xi1>, vector<32x128xf32>
      %c0_84 = arith.constant 0 : index
      %c0_85 = arith.constant 0 : index
      %c0_86 = arith.constant 0 : index
      %235 = vector.load %arg22[%c0_84, %c0_85, %c0_86] : memref<1x32x128xf32, #tpu.memory_space<vmem>>, vector<1x32x128xf32>
      %236 = vector.shape_cast %235 : vector<1x32x128xf32> to vector<32x128xf32>
      %237 = vector.shape_cast %234 : vector<32x128xf32> to vector<1x32x128xf32>
      tpu.vector_store %arg22[%c0_84, %c0_85, %c0_86], %237 {strides = array<i32>} : memref<1x32x128xf32, #tpu.memory_space<vmem>>, vector<1x32x128xf32>,
    } else {
    }
    %c0 = arith.constant 0 : index
    %c0_1 = arith.constant 0 : index
    %c0_2 = arith.constant 0 : index
    %3 = vector.load %arg22[%c0, %c0_1, %c0_2] : memref<1x32x128xf32, #tpu.memory_space<vmem>>, vector<1x32x128xf32>
    %4 = vector.shape_cast %3 : vector<1x32x128xf32> to vector<32x128xf32>
    %5 = tpu.iota {dimensions = array<i32: 1>} : vector<1x32xi32>
    %c17_i32 = arith.constant 17 : i32
    %6 = vector.broadcast %c17_i32 : i32 to vector<1x32xi32>
    %7 = arith.cmpi slt, %5, %6 : vector<1x32xi32>
    %cst = arith.constant 0.000000e+00 : f32
    %cst_3 = arith.constant -1.000000e+30 : f32
    %8 = vector.broadcast %cst : f32 to vector<1x32xf32>
    %9 = vector.broadcast %cst_3 : f32 to vector<1x32xf32>
    %10 = arith.select %7, %8, %9 : vector<1x32xi1>, vector<1x32xf32>
    %11 = arith.index_cast %arg1 : i32 to index
    %c0_4 = arith.constant 0 : index
    %c0_5 = arith.constant 0 : index
    %12 = vector.load %arg7[%11, %c0_4, %c0_5] : memref<2x1x128xf32, #tpu.memory_space<vmem>>, vector<1x1x128xf32>
    %13 = vector.shape_cast %12 : vector<1x1x128xf32> to vector<1x128xf32>
    %14 = arith.index_cast %arg1 : i32 to index
    %c0_6 = arith.constant 0 : index
    %c0_7 = arith.constant 0 : index
    %15 = vector.load %arg8[%14, %c0_6, %c0_7] : memref<2x1x128xf32, #tpu.memory_space<vmem>>, vector<1x1x128xf32>
    %16 = vector.shape_cast %15 : vector<1x1x128xf32> to vector<1x128xf32>
    %cst_8 = arith.constant dense<0.000000e+00> : vector<32xf32>
    %17 = vector.multi_reduction <add>, %4, %cst_8 [1] : vector<32x128xf32> to vector<32xf32>
    %18 = vector.shape_cast %17 : vector<32xf32> to vector<32x1xf32>
    %cst_9 = arith.constant 1.280000e+02 : f32
    %19 = vector.broadcast %cst_9 : f32 to vector<32x1xf32>
    %20 = arith.divf %18, %19 : vector<32x1xf32>
    %21 = vector.broadcast %20 : vector<32x1xf32> to vector<32x128xf32>
    %22 = arith.subf %4, %21 : vector<32x128xf32>
    %23 = arith.mulf %22, %22 : vector<32x128xf32>
    %cst_10 = arith.constant dense<0.000000e+00> : vector<32xf32>
    %24 = vector.multi_reduction <add>, %23, %cst_10 [1] : vector<32x128xf32> to vector<32xf32>
    %25 = vector.shape_cast %24 : vector<32xf32> to vector<32x1xf32>
    %cst_11 = arith.constant 1.280000e+02 : f32
    %26 = vector.broadcast %cst_11 : f32 to vector<32x1xf32>
    %27 = arith.divf %25, %26 : vector<32x1xf32>
    %cst_12 = arith.constant 9.99999974E-6 : f32
    %28 = vector.broadcast %cst_12 : f32 to vector<32x1xf32>
    %29 = arith.addf %27, %28 : vector<32x1xf32>
    %30 = math.rsqrt %29 : vector<32x1xf32>
    %31 = vector.broadcast %30 : vector<32x1xf32> to vector<32x128xf32>
    %32 = arith.mulf %22, %31 : vector<32x128xf32>
    %33 = vector.broadcast %13 : vector<1x128xf32> to vector<32x128xf32>
    %34 = arith.mulf %32, %33 : vector<32x128xf32>
    %35 = vector.broadcast %16 : vector<1x128xf32> to vector<32x128xf32>
    %36 = arith.addf %34, %35 : vector<32x128xf32>
    %37 = arith.truncf %36 : vector<32x128xf32> to vector<32x128xbf16>
    %38 = arith.index_cast %arg1 : i32 to index
    %c0_13 = arith.constant 0 : index
    %c0_14 = arith.constant 0 : index
    %39 = vector.load %arg9[%38, %c0_13, %c0_14] : memref<2x128x384xbf16, #tpu.memory_space<vmem>>, vector<1x128x384xbf16>
    %40 = vector.shape_cast %39 : vector<1x128x384xbf16> to vector<128x384xbf16>
    %cst_15 = arith.constant dense<0.000000e+00> : vector<32x384xf32>
    %41 = tpu.matmul %37, %40, %cst_15 {dimension_numbers = #tpu.dot_dimension_numbers<[1], [0], [0], [1], [0, 0, 1, 1], [], []>} : vector<32x128xbf16>, vector<128x384xbf16>, vector<32x384xf32> -> vector<32x384xf32>
    %42 = arith.index_cast %arg1 : i32 to index
    %c0_16 = arith.constant 0 : index
    %c0_17 = arith.constant 0 : index
    %43 = vector.load %arg10[%42, %c0_16, %c0_17] : memref<2x1x384xf32, #tpu.memory_space<vmem>>, vector<1x1x384xf32>
    %44 = vector.shape_cast %43 : vector<1x1x384xf32> to vector<1x384xf32>
    %45 = vector.broadcast %44 : vector<1x384xf32> to vector<32x384xf32>
    %46 = arith.addf %41, %45 : vector<32x384xf32>
    %47 = vector.extract_strided_slice %46 {offsets = [0, 0], sizes = [32, 128], strides = [1, 1]} : vector<32x384xf32> to vector<32x128xf32>
    %cst_18 = arith.constant 0.176776692 : f32
    %48 = vector.broadcast %cst_18 : f32 to vector<32x128xf32>
    %49 = arith.mulf %47, %48 : vector<32x128xf32>
    %50 = arith.truncf %49 : vector<32x128xf32> to vector<32x128xbf16>
    %51 = vector.extract_strided_slice %46 {offsets = [0, 128], sizes = [32, 128], strides = [1, 1]} : vector<32x384xf32> to vector<32x128xf32>
    %52 = arith.truncf %51 : vector<32x128xf32> to vector<32x128xbf16>
    %53 = vector.extract_strided_slice %46 {offsets = [0, 256], sizes = [32, 128], strides = [1, 1]} : vector<32x384xf32> to vector<32x128xf32>
    %54 = arith.truncf %53 : vector<32x128xf32> to vector<32x128xbf16>
    %55 = vector.extract_strided_slice %50 {offsets = [0, 0], sizes = [32, 32], strides = [1, 1]} : vector<32x128xbf16> to vector<32x32xbf16>
    %56 = vector.extract_strided_slice %52 {offsets = [0, 0], sizes = [32, 32], strides = [1, 1]} : vector<32x128xbf16> to vector<32x32xbf16>
    %57 = vector.extract_strided_slice %54 {offsets = [0, 0], sizes = [32, 32], strides = [1, 1]} : vector<32x128xbf16> to vector<32x32xbf16>
    %cst_19 = arith.constant dense<0.000000e+00> : vector<32x32xf32>
    %58 = tpu.matmul %55, %56, %cst_19 {dimension_numbers = #tpu.dot_dimension_numbers<[1], [1], [0], [0], [0, 0, 1, 0], [], []>} : vector<32x32xbf16>, vector<32x32xbf16>, vector<32x32xf32> -> vector<32x32xf32>
    %59 = vector.broadcast %10 : vector<1x32xf32> to vector<32x32xf32>
    %60 = arith.addf %58, %59 : vector<32x32xf32>
    %cst_20 = arith.constant dense<0xFF800000> : vector<32xf32>
    %61 = vector.multi_reduction <maximumf>, %60, %cst_20 [1] : vector<32x32xf32> to vector<32xf32>
    %62 = vector.shape_cast %61 : vector<32xf32> to vector<32x1xf32>
    %63 = vector.broadcast %62 : vector<32x1xf32> to vector<32x32xf32>
    %64 = arith.subf %60, %63 : vector<32x32xf32>
    %65 = math.exp %64 : vector<32x32xf32>
    %cst_21 = arith.constant dense<0.000000e+00> : vector<32xf32>
    %66 = vector.multi_reduction <add>, %65, %cst_21 [1] : vector<32x32xf32> to vector<32xf32>
    %67 = vector.shape_cast %66 : vector<32xf32> to vector<32x1xf32>
    %68 = tpu.reciprocal %67 {approx = true} : vector<32x1xf32> -> vector<32x1xf32>
    %69 = vector.broadcast %68 : vector<32x1xf32> to vector<32x32xf32>
    %70 = arith.mulf %65, %69 : vector<32x32xf32>
    %71 = arith.truncf %70 : vector<32x32xf32> to vector<32x32xbf16>
    %cst_22 = arith.constant dense<0.000000e+00> : vector<32x32xf32>
    %72 = tpu.matmul %71, %57, %cst_22 {dimension_numbers = #tpu.dot_dimension_numbers<[1], [0], [0], [1], [0, 0, 1, 1], [], []>} : vector<32x32xbf16>, vector<32x32xbf16>, vector<32x32xf32> -> vector<32x32xf32>
    %73 = vector.extract_strided_slice %50 {offsets = [0, 32], sizes = [32, 32], strides = [1, 1]} : vector<32x128xbf16> to vector<32x32xbf16>
    %74 = vector.extract_strided_slice %52 {offsets = [0, 32], sizes = [32, 32], strides = [1, 1]} : vector<32x128xbf16> to vector<32x32xbf16>
    %75 = vector.extract_strided_slice %54 {offsets = [0, 32], sizes = [32, 32], strides = [1, 1]} : vector<32x128xbf16> to vector<32x32xbf16>
    %cst_23 = arith.constant dense<0.000000e+00> : vector<32x32xf32>
    %76 = tpu.matmul %73, %74, %cst_23 {dimension_numbers = #tpu.dot_dimension_numbers<[1], [1], [0], [0], [0, 0, 1, 0], [], []>} : vector<32x32xbf16>, vector<32x32xbf16>, vector<32x32xf32> -> vector<32x32xf32>
    %77 = vector.broadcast %10 : vector<1x32xf32> to vector<32x32xf32>
    %78 = arith.addf %76, %77 : vector<32x32xf32>
    %cst_24 = arith.constant dense<0xFF800000> : vector<32xf32>
    %79 = vector.multi_reduction <maximumf>, %78, %cst_24 [1] : vector<32x32xf32> to vector<32xf32>
    %80 = vector.shape_cast %79 : vector<32xf32> to vector<32x1xf32>
    %81 = vector.broadcast %80 : vector<32x1xf32> to vector<32x32xf32>
    %82 = arith.subf %78, %81 : vector<32x32xf32>
    %83 = math.exp %82 : vector<32x32xf32>
    %cst_25 = arith.constant dense<0.000000e+00> : vector<32xf32>
    %84 = vector.multi_reduction <add>, %83, %cst_25 [1] : vector<32x32xf32> to vector<32xf32>
    %85 = vector.shape_cast %84 : vector<32xf32> to vector<32x1xf32>
    %86 = tpu.reciprocal %85 {approx = true} : vector<32x1xf32> -> vector<32x1xf32>
    %87 = vector.broadcast %86 : vector<32x1xf32> to vector<32x32xf32>
    %88 = arith.mulf %83, %87 : vector<32x32xf32>
    %89 = arith.truncf %88 : vector<32x32xf32> to vector<32x32xbf16>
    %cst_26 = arith.constant dense<0.000000e+00> : vector<32x32xf32>
    %90 = tpu.matmul %89, %75, %cst_26 {dimension_numbers = #tpu.dot_dimension_numbers<[1], [0], [0], [1], [0, 0, 1, 1], [], []>} : vector<32x32xbf16>, vector<32x32xbf16>, vector<32x32xf32> -> vector<32x32xf32>
    %91 = vector.extract_strided_slice %50 {offsets = [0, 64], sizes = [32, 32], strides = [1, 1]} : vector<32x128xbf16> to vector<32x32xbf16>
    %92 = vector.extract_strided_slice %52 {offsets = [0, 64], sizes = [32, 32], strides = [1, 1]} : vector<32x128xbf16> to vector<32x32xbf16>
    %93 = vector.extract_strided_slice %54 {offsets = [0, 64], sizes = [32, 32], strides = [1, 1]} : vector<32x128xbf16> to vector<32x32xbf16>
    %cst_27 = arith.constant dense<0.000000e+00> : vector<32x32xf32>
    %94 = tpu.matmul %91, %92, %cst_27 {dimension_numbers = #tpu.dot_dimension_numbers<[1], [1], [0], [0], [0, 0, 1, 0], [], []>} : vector<32x32xbf16>, vector<32x32xbf16>, vector<32x32xf32> -> vector<32x32xf32>
    %95 = vector.broadcast %10 : vector<1x32xf32> to vector<32x32xf32>
    %96 = arith.addf %94, %95 : vector<32x32xf32>
    %cst_28 = arith.constant dense<0xFF800000> : vector<32xf32>
    %97 = vector.multi_reduction <maximumf>, %96, %cst_28 [1] : vector<32x32xf32> to vector<32xf32>
    %98 = vector.shape_cast %97 : vector<32xf32> to vector<32x1xf32>
    %99 = vector.broadcast %98 : vector<32x1xf32> to vector<32x32xf32>
    %100 = arith.subf %96, %99 : vector<32x32xf32>
    %101 = math.exp %100 : vector<32x32xf32>
    %cst_29 = arith.constant dense<0.000000e+00> : vector<32xf32>
    %102 = vector.multi_reduction <add>, %101, %cst_29 [1] : vector<32x32xf32> to vector<32xf32>
    %103 = vector.shape_cast %102 : vector<32xf32> to vector<32x1xf32>
    %104 = tpu.reciprocal %103 {approx = true} : vector<32x1xf32> -> vector<32x1xf32>
    %105 = vector.broadcast %104 : vector<32x1xf32> to vector<32x32xf32>
    %106 = arith.mulf %101, %105 : vector<32x32xf32>
    %107 = arith.truncf %106 : vector<32x32xf32> to vector<32x32xbf16>
    %cst_30 = arith.constant dense<0.000000e+00> : vector<32x32xf32>
    %108 = tpu.matmul %107, %93, %cst_30 {dimension_numbers = #tpu.dot_dimension_numbers<[1], [0], [0], [1], [0, 0, 1, 1], [], []>} : vector<32x32xbf16>, vector<32x32xbf16>, vector<32x32xf32> -> vector<32x32xf32>
    %109 = vector.extract_strided_slice %50 {offsets = [0, 96], sizes = [32, 32], strides = [1, 1]} : vector<32x128xbf16> to vector<32x32xbf16>
    %110 = vector.extract_strided_slice %52 {offsets = [0, 96], sizes = [32, 32], strides = [1, 1]} : vector<32x128xbf16> to vector<32x32xbf16>
    %111 = vector.extract_strided_slice %54 {offsets = [0, 96], sizes = [32, 32], strides = [1, 1]} : vector<32x128xbf16> to vector<32x32xbf16>
    %cst_31 = arith.constant dense<0.000000e+00> : vector<32x32xf32>
    %112 = tpu.matmul %109, %110, %cst_31 {dimension_numbers = #tpu.dot_dimension_numbers<[1], [1], [0], [0], [0, 0, 1, 0], [], []>} : vector<32x32xbf16>, vector<32x32xbf16>, vector<32x32xf32> -> vector<32x32xf32>
    %113 = vector.broadcast %10 : vector<1x32xf32> to vector<32x32xf32>
    %114 = arith.addf %112, %113 : vector<32x32xf32>
    %cst_32 = arith.constant dense<0xFF800000> : vector<32xf32>
    %115 = vector.multi_reduction <maximumf>, %114, %cst_32 [1] : vector<32x32xf32> to vector<32xf32>
    %116 = vector.shape_cast %115 : vector<32xf32> to vector<32x1xf32>
    %117 = vector.broadcast %116 : vector<32x1xf32> to vector<32x32xf32>
    %118 = arith.subf %114, %117 : vector<32x32xf32>
    %119 = math.exp %118 : vector<32x32xf32>
    %cst_33 = arith.constant dense<0.000000e+00> : vector<32xf32>
    %120 = vector.multi_reduction <add>, %119, %cst_33 [1] : vector<32x32xf32> to vector<32xf32>
    %121 = vector.shape_cast %120 : vector<32xf32> to vector<32x1xf32>
    %122 = tpu.reciprocal %121 {approx = true} : vector<32x1xf32> -> vector<32x1xf32>
    %123 = vector.broadcast %122 : vector<32x1xf32> to vector<32x32xf32>
    %124 = arith.mulf %119, %123 : vector<32x32xf32>
    %125 = arith.truncf %124 : vector<32x32xf32> to vector<32x32xbf16>
    %cst_34 = arith.constant dense<0.000000e+00> : vector<32x32xf32>
    %126 = tpu.matmul %125, %111, %cst_34 {dimension_numbers = #tpu.dot_dimension_numbers<[1], [0], [0], [1], [0, 0, 1, 1], [], []>} : vector<32x32xbf16>, vector<32x32xbf16>, vector<32x32xf32> -> vector<32x32xf32>
    %127 = tpu.concatenate %72, %90, %108, %126 in 1 : vector<32x32xf32>, vector<32x32xf32>, vector<32x32xf32>, vector<32x32xf32> -> vector<32x128xf32>
    %128 = arith.truncf %127 : vector<32x128xf32> to vector<32x128xbf16>
    %129 = arith.index_cast %arg1 : i32 to index
    %c0_35 = arith.constant 0 : index
    %c0_36 = arith.constant 0 : index
    %130 = vector.load %arg11[%129, %c0_35, %c0_36] : memref<2x128x128xbf16, #tpu.memory_space<vmem>>, vector<1x128x128xbf16>
    %131 = vector.shape_cast %130 : vector<1x128x128xbf16> to vector<128x128xbf16>
    %cst_37 = arith.constant dense<0.000000e+00> : vector<32x128xf32>
    %132 = tpu.matmul %128, %131, %cst_37 {dimension_numbers = #tpu.dot_dimension_numbers<[1], [0], [0], [1], [0, 0, 1, 1], [], []>} : vector<32x128xbf16>, vector<128x128xbf16>, vector<32x128xf32> -> vector<32x128xf32>
    %133 = arith.index_cast %arg1 : i32 to index
    %c0_38 = arith.constant 0 : index
    %c0_39 = arith.constant 0 : index
    %134 = vector.load %arg12[%133, %c0_38, %c0_39] : memref<2x1x128xf32, #tpu.memory_space<vmem>>, vector<1x1x128xf32>
    %135 = vector.shape_cast %134 : vector<1x1x128xf32> to vector<1x128xf32>
    %136 = vector.broadcast %135 : vector<1x128xf32> to vector<32x128xf32>
    %137 = arith.addf %132, %136 : vector<32x128xf32>
    %138 = arith.addf %4, %137 : vector<32x128xf32>
    %139 = arith.index_cast %arg1 : i32 to index
    %c0_40 = arith.constant 0 : index
    %c0_41 = arith.constant 0 : index
    %140 = vector.load %arg13[%139, %c0_40, %c0_41] : memref<2x1x128xf32, #tpu.memory_space<vmem>>, vector<1x1x128xf32>
    %141 = vector.shape_cast %140 : vector<1x1x128xf32> to vector<1x128xf32>
    %142 = arith.index_cast %arg1 : i32 to index
    %c0_42 = arith.constant 0 : index
    %c0_43 = arith.constant 0 : index
    %143 = vector.load %arg14[%142, %c0_42, %c0_43] : memref<2x1x128xf32, #tpu.memory_space<vmem>>, vector<1x1x128xf32>
    %144 = vector.shape_cast %143 : vector<1x1x128xf32> to vector<1x128xf32>
    %cst_44 = arith.constant dense<0.000000e+00> : vector<32xf32>
    %145 = vector.multi_reduction <add>, %138, %cst_44 [1] : vector<32x128xf32> to vector<32xf32>
    %146 = vector.shape_cast %145 : vector<32xf32> to vector<32x1xf32>
    %cst_45 = arith.constant 1.280000e+02 : f32
    %147 = vector.broadcast %cst_45 : f32 to vector<32x1xf32>
    %148 = arith.divf %146, %147 : vector<32x1xf32>
    %149 = vector.broadcast %148 : vector<32x1xf32> to vector<32x128xf32>
    %150 = arith.subf %138, %149 : vector<32x128xf32>
    %151 = arith.mulf %150, %150 : vector<32x128xf32>
    %cst_46 = arith.constant dense<0.000000e+00> : vector<32xf32>
    %152 = vector.multi_reduction <add>, %151, %cst_46 [1] : vector<32x128xf32> to vector<32xf32>
    %153 = vector.shape_cast %152 : vector<32xf32> to vector<32x1xf32>
    %cst_47 = arith.constant 1.280000e+02 : f32
    %154 = vector.broadcast %cst_47 : f32 to vector<32x1xf32>
    %155 = arith.divf %153, %154 : vector<32x1xf32>
    %cst_48 = arith.constant 9.99999974E-6 : f32
    %156 = vector.broadcast %cst_48 : f32 to vector<32x1xf32>
    %157 = arith.addf %155, %156 : vector<32x1xf32>
    %158 = math.rsqrt %157 : vector<32x1xf32>
    %159 = vector.broadcast %158 : vector<32x1xf32> to vector<32x128xf32>
    %160 = arith.mulf %150, %159 : vector<32x128xf32>
    %161 = vector.broadcast %141 : vector<1x128xf32> to vector<32x128xf32>
    %162 = arith.mulf %160, %161 : vector<32x128xf32>
    %163 = vector.broadcast %144 : vector<1x128xf32> to vector<32x128xf32>
    %164 = arith.addf %162, %163 : vector<32x128xf32>
    %165 = arith.truncf %164 : vector<32x128xf32> to vector<32x128xbf16>
    %166 = arith.index_cast %arg1 : i32 to index
    %c0_49 = arith.constant 0 : index
    %c0_50 = arith.constant 0 : index
    %167 = vector.load %arg15[%166, %c0_49, %c0_50] : memref<2x128x512xbf16, #tpu.memory_space<vmem>>, vector<1x128x512xbf16>
    %168 = vector.shape_cast %167 : vector<1x128x512xbf16> to vector<128x512xbf16>
    %cst_51 = arith.constant dense<0.000000e+00> : vector<32x512xf32>
    %169 = tpu.matmul %165, %168, %cst_51 {dimension_numbers = #tpu.dot_dimension_numbers<[1], [0], [0], [1], [0, 0, 1, 1], [], []>} : vector<32x128xbf16>, vector<128x512xbf16>, vector<32x512xf32> -> vector<32x512xf32>
    %170 = arith.index_cast %arg1 : i32 to index
    %c0_52 = arith.constant 0 : index
    %c0_53 = arith.constant 0 : index
    %171 = vector.load %arg16[%170, %c0_52, %c0_53] : memref<2x1x512xf32, #tpu.memory_space<vmem>>, vector<1x1x512xf32>
    %172 = vector.shape_cast %171 : vector<1x1x512xf32> to vector<1x512xf32>
    %173 = vector.broadcast %172 : vector<1x512xf32> to vector<32x512xf32>
    %174 = arith.addf %169, %173 : vector<32x512xf32>
    %cst_54 = arith.constant 1.702000e+00 : f32
    %175 = vector.broadcast %cst_54 : f32 to vector<32x512xf32>
    %176 = arith.mulf %175, %174 : vector<32x512xf32>
    %177 = arith.negf %176 : vector<32x512xf32>
    %178 = math.exp %177 : vector<32x512xf32>
    %cst_55 = arith.constant 1.000000e+00 : f32
    %179 = vector.broadcast %cst_55 : f32 to vector<32x512xf32>
    %180 = arith.addf %179, %178 : vector<32x512xf32>
    %181 = arith.divf %179, %180 : vector<32x512xf32>
    %182 = arith.mulf %174, %181 : vector<32x512xf32>
    %183 = arith.truncf %182 : vector<32x512xf32> to vector<32x512xbf16>
    %184 = arith.index_cast %arg1 : i32 to index
    %c0_56 = arith.constant 0 : index
    %c0_57 = arith.constant 0 : index
    %185 = vector.load %arg17[%184, %c0_56, %c0_57] : memref<2x512x128xbf16, #tpu.memory_space<vmem>>, vector<1x512x128xbf16>
    %186 = vector.shape_cast %185 : vector<1x512x128xbf16> to vector<512x128xbf16>
    %cst_58 = arith.constant dense<0.000000e+00> : vector<32x128xf32>
    %187 = tpu.matmul %183, %186, %cst_58 {dimension_numbers = #tpu.dot_dimension_numbers<[1], [0], [0], [1], [0, 0, 1, 1], [], []>} : vector<32x512xbf16>, vector<512x128xbf16>, vector<32x128xf32> -> vector<32x128xf32>
    %188 = arith.index_cast %arg1 : i32 to index
    %c0_59 = arith.constant 0 : index
    %c0_60 = arith.constant 0 : index
    %189 = vector.load %arg18[%188, %c0_59, %c0_60] : memref<2x1x128xf32, #tpu.memory_space<vmem>>, vector<1x1x128xf32>
    %190 = vector.shape_cast %189 : vector<1x1x128xf32> to vector<1x128xf32>
    %191 = vector.broadcast %190 : vector<1x128xf32> to vector<32x128xf32>
    %192 = arith.addf %187, %191 : vector<32x128xf32>
    %193 = arith.addf %138, %192 : vector<32x128xf32>
    %c0_61 = arith.constant 0 : index
    %c0_62 = arith.constant 0 : index
    %c0_63 = arith.constant 0 : index
    %194 = vector.load %arg22[%c0_61, %c0_62, %c0_63] : memref<1x32x128xf32, #tpu.memory_space<vmem>>, vector<1x32x128xf32>
    %195 = vector.shape_cast %194 : vector<1x32x128xf32> to vector<32x128xf32>
    %196 = vector.shape_cast %193 : vector<32x128xf32> to vector<1x32x128xf32>
    tpu.vector_store %arg22[%c0_61, %c0_62, %c0_63], %196 {strides = array<i32>} : memref<1x32x128xf32, #tpu.memory_space<vmem>>, vector<1x32x128xf32>,
    %c1_i32 = arith.constant 1 : i32
    %197 = arith.cmpi eq, %arg1, %c1_i32 : i32
    %198 = arith.extui %197 : i1 to i32
    %c0_i32_64 = arith.constant 0 : i32
    %199 = arith.cmpi ne, %198, %c0_i32_64 : i32
    scf.if %199 {
      %200 = vector.extract_strided_slice %193 {offsets = [0, 0], sizes = [1, 128], strides = [1, 1]} : vector<32x128xf32> to vector<1x128xf32>
      %c0_65 = arith.constant 0 : index
      %c0_66 = arith.constant 0 : index
      %201 = vector.load %arg19[%c0_65, %c0_66] : memref<1x128xf32, #tpu.memory_space<vmem>>, vector<1x128xf32>
      %c0_67 = arith.constant 0 : index
      %c0_68 = arith.constant 0 : index
      %202 = vector.load %arg20[%c0_67, %c0_68] : memref<1x128xf32, #tpu.memory_space<vmem>>, vector<1x128xf32>
      %cst_69 = arith.constant dense<0.000000e+00> : vector<1xf32>
      %203 = vector.multi_reduction <add>, %200, %cst_69 [1] : vector<1x128xf32> to vector<1xf32>
      %204 = vector.shape_cast %203 : vector<1xf32> to vector<1x1xf32>
      %cst_70 = arith.constant 1.280000e+02 : f32
      %205 = vector.broadcast %cst_70 : f32 to vector<1x1xf32>
      %206 = arith.divf %204, %205 : vector<1x1xf32>
      %207 = vector.broadcast %206 : vector<1x1xf32> to vector<1x128xf32>
      %208 = arith.subf %200, %207 : vector<1x128xf32>
      %209 = arith.mulf %208, %208 : vector<1x128xf32>
      %cst_71 = arith.constant dense<0.000000e+00> : vector<1xf32>
      %210 = vector.multi_reduction <add>, %209, %cst_71 [1] : vector<1x128xf32> to vector<1xf32>
      %211 = vector.shape_cast %210 : vector<1xf32> to vector<1x1xf32>
      %cst_72 = arith.constant 1.280000e+02 : f32
      %212 = vector.broadcast %cst_72 : f32 to vector<1x1xf32>
      %213 = arith.divf %211, %212 : vector<1x1xf32>
      %cst_73 = arith.constant 9.99999974E-6 : f32
      %214 = vector.broadcast %cst_73 : f32 to vector<1x1xf32>
      %215 = arith.addf %213, %214 : vector<1x1xf32>
      %216 = math.rsqrt %215 : vector<1x1xf32>
      %217 = vector.broadcast %216 : vector<1x1xf32> to vector<1x128xf32>
      %218 = arith.mulf %208, %217 : vector<1x128xf32>
      %219 = arith.mulf %218, %201 : vector<1x128xf32>
      %220 = arith.addf %219, %202 : vector<1x128xf32>
      %221 = arith.truncf %220 : vector<1x128xf32> to vector<1x128xbf16>
      %c0_74 = arith.constant 0 : index
      %c0_75 = arith.constant 0 : index
      %222 = vector.load %arg21[%c0_74, %c0_75] : memref<128x128xbf16, #tpu.memory_space<vmem>>, vector<128x128xbf16>
      %cst_76 = arith.constant dense<0.000000e+00> : vector<1x128xf32>
      %223 = tpu.matmul %221, %222, %cst_76 {dimension_numbers = #tpu.dot_dimension_numbers<[1], [0], [0], [1], [0, 0, 1, 1], [], []>} : vector<1x128xbf16>, vector<128x128xbf16>, vector<1x128xf32> -> vector<1x128xf32>
      %c0_77 = arith.constant 0 : index
      %c0_78 = arith.constant 0 : index
      %c0_79 = arith.constant 0 : index
      %224 = vector.load %arg23[%c0_77, %c0_78, %c0_79] : memref<1x1x128xf32, #tpu.memory_space<vmem>>, vector<1x1x128xf32>
      %225 = vector.shape_cast %224 : vector<1x1x128xf32> to vector<1x128xf32>
      %226 = vector.shape_cast %223 : vector<1x128xf32> to vector<1x1x128xf32>
      tpu.vector_store %arg23[%c0_77, %c0_78, %c0_79], %226 {strides = array<i32>} : memref<1x1x128xf32, #tpu.memory_space<vmem>>, vector<1x1x128xf32>,
    } else {
    }
    return
  }
  func.func @transform_0(%arg0: i32, %arg1: i32) -> (i32, i32, i32) {
    %c0_i32 = arith.constant 0 : i32
    %c0_i32_0 = arith.constant 0 : i32
    %c0_i32_1 = arith.constant 0 : i32
    return %arg0, %c0_i32, %c0_i32_0 : i32, i32, i32
  }
  func.func @transform_1(%arg0: i32, %arg1: i32) -> (i32, i32) {
    %c0_i32 = arith.constant 0 : i32
    %c0_i32_0 = arith.constant 0 : i32
    %c0_i32_1 = arith.constant 0 : i32
    return %c0_i32, %c0_i32_0 : i32, i32
  }
  func.func @transform_2(%arg0: i32, %arg1: i32) -> (i32, i32) {
    %c0_i32 = arith.constant 0 : i32
    %c0_i32_0 = arith.constant 0 : i32
    %c0_i32_1 = arith.constant 0 : i32
    return %c0_i32, %c0_i32_0 : i32, i32
  }
  func.func @transform_3(%arg0: i32, %arg1: i32) -> (i32, i32) {
    %c0_i32 = arith.constant 0 : i32
    %c0_i32_0 = arith.constant 0 : i32
    %c0_i32_1 = arith.constant 0 : i32
    return %c0_i32, %c0_i32_0 : i32, i32
  }
  func.func @transform_4(%arg0: i32, %arg1: i32) -> (i32, i32) {
    %c0_i32 = arith.constant 0 : i32
    %c0_i32_0 = arith.constant 0 : i32
    %c0_i32_1 = arith.constant 0 : i32
    return %c0_i32, %c0_i32_0 : i32, i32
  }
  func.func @transform_5(%arg0: i32, %arg1: i32) -> (i32, i32, i32) {
    %c0_i32 = arith.constant 0 : i32
    %c0_i32_0 = arith.constant 0 : i32
    %c0_i32_1 = arith.constant 0 : i32
    %c0_i32_2 = arith.constant 0 : i32
    return %c0_i32, %c0_i32_0, %c0_i32_1 : i32, i32, i32
  }
  func.func @transform_6(%arg0: i32, %arg1: i32) -> (i32, i32, i32) {
    %c0_i32 = arith.constant 0 : i32
    %c0_i32_0 = arith.constant 0 : i32
    %c0_i32_1 = arith.constant 0 : i32
    %c0_i32_2 = arith.constant 0 : i32
    return %c0_i32, %c0_i32_0, %c0_i32_1 : i32, i32, i32
  }
  func.func @transform_7(%arg0: i32, %arg1: i32) -> (i32, i32, i32) {
    %c0_i32 = arith.constant 0 : i32
    %c0_i32_0 = arith.constant 0 : i32
    %c0_i32_1 = arith.constant 0 : i32
    %c0_i32_2 = arith.constant 0 : i32
    return %c0_i32, %c0_i32_0, %c0_i32_1 : i32, i32, i32
  }
  func.func @transform_8(%arg0: i32, %arg1: i32) -> (i32, i32, i32) {
    %c0_i32 = arith.constant 0 : i32
    %c0_i32_0 = arith.constant 0 : i32
    %c0_i32_1 = arith.constant 0 : i32
    %c0_i32_2 = arith.constant 0 : i32
    return %c0_i32, %c0_i32_0, %c0_i32_1 : i32, i32, i32
  }
  func.func @transform_9(%arg0: i32, %arg1: i32) -> (i32, i32, i32) {
    %c0_i32 = arith.constant 0 : i32
    %c0_i32_0 = arith.constant 0 : i32
    %c0_i32_1 = arith.constant 0 : i32
    %c0_i32_2 = arith.constant 0 : i32
    return %c0_i32, %c0_i32_0, %c0_i32_1 : i32, i32, i32
  }
  func.func @transform_10(%arg0: i32, %arg1: i32) -> (i32, i32, i32) {
    %c0_i32 = arith.constant 0 : i32
    %c0_i32_0 = arith.constant 0 : i32
    %c0_i32_1 = arith.constant 0 : i32
    %c0_i32_2 = arith.constant 0 : i32
    return %c0_i32, %c0_i32_0, %c0_i32_1 : i32, i32, i32
  }
  func.func @transform_11(%arg0: i32, %arg1: i32) -> (i32, i32, i32) {
    %c0_i32 = arith.constant 0 : i32
    %c0_i32_0 = arith.constant 0 : i32
    %c0_i32_1 = arith.constant 0 : i32
    %c0_i32_2 = arith.constant 0 : i32
    return %c0_i32, %c0_i32_0, %c0_i32_1 : i32, i32, i32
  }
  func.func @transform_12(%arg0: i32, %arg1: i32) -> (i32, i32, i32) {
    %c0_i32 = arith.constant 0 : i32
    %c0_i32_0 = arith.constant 0 : i32
    %c0_i32_1 = arith.constant 0 : i32
    %c0_i32_2 = arith.constant 0 : i32
    return %c0_i32, %c0_i32_0, %c0_i32_1 : i32, i32, i32
  }
  func.func @transform_13(%arg0: i32, %arg1: i32) -> (i32, i32, i32) {
    %c0_i32 = arith.constant 0 : i32
    %c0_i32_0 = arith.constant 0 : i32
    %c0_i32_1 = arith.constant 0 : i32
    %c0_i32_2 = arith.constant 0 : i32
    return %c0_i32, %c0_i32_0, %c0_i32_1 : i32, i32, i32
  }
  func.func @transform_14(%arg0: i32, %arg1: i32) -> (i32, i32, i32) {
    %c0_i32 = arith.constant 0 : i32
    %c0_i32_0 = arith.constant 0 : i32
    %c0_i32_1 = arith.constant 0 : i32
    %c0_i32_2 = arith.constant 0 : i32
    return %c0_i32, %c0_i32_0, %c0_i32_1 : i32, i32, i32
  }
  func.func @transform_15(%arg0: i32, %arg1: i32) -> (i32, i32, i32) {
    %c0_i32 = arith.constant 0 : i32
    %c0_i32_0 = arith.constant 0 : i32
    %c0_i32_1 = arith.constant 0 : i32
    %c0_i32_2 = arith.constant 0 : i32
    return %c0_i32, %c0_i32_0, %c0_i32_1 : i32, i32, i32
  }
  func.func @transform_16(%arg0: i32, %arg1: i32) -> (i32, i32, i32) {
    %c0_i32 = arith.constant 0 : i32
    %c0_i32_0 = arith.constant 0 : i32
    %c0_i32_1 = arith.constant 0 : i32
    %c0_i32_2 = arith.constant 0 : i32
    return %c0_i32, %c0_i32_0, %c0_i32_1 : i32, i32, i32
  }
  func.func @transform_17(%arg0: i32, %arg1: i32) -> (i32, i32) {
    %c0_i32 = arith.constant 0 : i32
    %c0_i32_0 = arith.constant 0 : i32
    %c0_i32_1 = arith.constant 0 : i32
    return %c0_i32, %c0_i32_0 : i32, i32
  }
  func.func @transform_18(%arg0: i32, %arg1: i32) -> (i32, i32) {
    %c0_i32 = arith.constant 0 : i32
    %c0_i32_0 = arith.constant 0 : i32
    %c0_i32_1 = arith.constant 0 : i32
    return %c0_i32, %c0_i32_0 : i32, i32
  }
  func.func @transform_19(%arg0: i32, %arg1: i32) -> (i32, i32) {
    %c0_i32 = arith.constant 0 : i32
    %c0_i32_0 = arith.constant 0 : i32
    %c0_i32_1 = arith.constant 0 : i32
    return %c0_i32, %c0_i32_0 : i32, i32
  }
  func.func @transform_20(%arg0: i32, %arg1: i32) -> (i32, i32, i32) {
    %c0_i32 = arith.constant 0 : i32
    %c0_i32_0 = arith.constant 0 : i32
    %c0_i32_1 = arith.constant 0 : i32
    return %arg0, %c0_i32, %c0_i32_0 : i32, i32, i32
  }
  func.func @transform_21(%arg0: i32, %arg1: i32) -> (i32, i32, i32) {
    %c0_i32 = arith.constant 0 : i32
    %c0_i32_0 = arith.constant 0 : i32
    %c0_i32_1 = arith.constant 0 : i32
    return %arg0, %c0_i32, %c0_i32_0 : i32, i32, i32
  }
}

</mosaic_0001>

<bundles_post_ra>
// kernel: tpu_custom_call.1
= control target key start
LH: loop header
LB: loop body
LE: loop exit
PB: predicated region body
PF: predicated region fallthrough
CT: control target
= control target key end

     0   :  { %s6195_s0 = inlined_call_operand.hbm [shape: bf16[2,32,192], index: 0, kind: input, shape index: {}]   ;;  %s6196_s1 = inlined_call_operand.hbm [shape: bf16[192,128], index: 1, kind: input, shape index: {}]   ;;  %s6197_s2 = inlined_call_operand.hbm [shape: f32[32,128], index: 2, kind: input, shape index: {}]   ;;  %s6198_s3 = inlined_call_operand.hbm [shape: f32[1,128], index: 3, kind: input, shape index: {}]   ;;  %s6199_s4 = inlined_call_operand.hbm [shape: f32[1,128], index: 4, kind: input, shape index: {}]   ;;  %s6200_s5 = inlined_call_operand.vmem [shape: f32[2,1,128], index: 5, kind: input, shape index: {}]   ;;  %s6201_s6 = inlined_call_operand.hbm [shape: f32[2,1,128], index: 6, kind: input, shape index: {}]   ;;  %s6202_s7 = inlined_call_operand.hbm [shape: bf16[2,128,384], index: 7, kind: input, shape index: {}]   ;;  %s6203_s8 = inlined_call_operand.vmem [shape: f32[2,1,384], index: 8, kind: input, shape index: {}]   ;;  %s6204_s9 = inlined_call_operand.hbm [shape: bf16[2,128,128], index: 9, kind: input, shape index: {}]   ;;  %s6205_s10 = inlined_call_operand.vmem [shape: f32[2,1,128], index: 10, kind: input, shape index: {}]   ;;  %s6206_s11 = inlined_call_operand.vmem [shape: f32[2,1,128], index: 11, kind: input, shape index: {}]   ;;  %s6207_s12 = inlined_call_operand.hbm [shape: f32[2,1,128], index: 12, kind: input, shape index: {}]   ;;  %s6208_s13 = inlined_call_operand.hbm [shape: bf16[2,128,512], index: 13, kind: input, shape index: {}]   ;;  %s6209_s14 = inlined_call_operand.vmem [shape: f32[2,1,512], index: 14, kind: input, shape index: {}]   ;;  %s6210_s15 = inlined_call_operand.hbm [shape: bf16[2,512,128], index: 15, kind: input, shape index: {}]   ;;  %s6211_s16 = inlined_call_operand.vmem [shape: f32[2,1,128], index: 16, kind: input, shape index: {}]   ;;  %s6212_s17 = inlined_call_operand.vmem [shape: f32[1,128], index: 17, kind: input, shape index: {}]   ;;  %s6213_s18 = inlined_call_operand.vmem [shape: f32[1,128], index: 18, kind: input, shape index: {}]   ;;  %s6214_s19 = inlined_call_operand.hbm [shape: bf16[128,128], index: 19, kind: input, shape index: {}]   ;;  %s6215_s20 = inlined_call_operand.hbm [shape: f32[2,32,128], index: 20, kind: output, shape index: {0}]   ;;  %s6216_s21 = inlined_call_operand.hbm [shape: f32[2,1,128], index: 21, kind: output, shape index: {1}]  }
   0x1   :  { %6232 = sst [smem:[#allocation35_spill]] %s6195_s0 }
   0x2   :  { %6233 = sst [smem:[#allocation36_spill]] %s6196_s1 }
   0x3   :  { %6234 = sst [smem:[#allocation37_spill]] %s6197_s2 }
   0x4   :  { %6235 = sst [smem:[#allocation38_spill]] %s6198_s3 }
   0x5   :  { %6236 = sst [smem:[#allocation39_spill]] %s6199_s4 }
   0x6   :  { %6237 = sst [smem:[#allocation40_spill]] %s6200_s5 }
   0x7   :  { %6238 = sst [smem:[#allocation41_spill]] %s6201_s6 }
   0x8   :  { %6239 = sst [smem:[#allocation42_spill]] %s6202_s7 }
   0x9   :  { %6240 = sst [smem:[#allocation43_spill]] %s6203_s8 }
   0xa   :  { %6241 = sst [smem:[#allocation44_spill]] %s6204_s9 }
   0xb   :  { %6242 = sst [smem:[#allocation45_spill]] %s6205_s10 }
   0xc   :  { %6243 = sst [smem:[#allocation46_spill]] %s6206_s11 }
   0xd   :  { %6244 = sst [smem:[#allocation47_spill]] %s6207_s12 }
   0xe   :  { %6245 = sst [smem:[#allocation48_spill]] %s6208_s13 }
   0xf   :  { %6246 = sst [smem:[#allocation49_spill]] %s6209_s14 }
  0x10   :  { %6247 = sst [smem:[#allocation50_spill]] %s6210_s15 }
  0x11   :  { %6248 = sst [smem:[#allocation51_spill]] %s6211_s16 }
  0x12   :  { %6249 = sst [smem:[#allocation52_spill]] %s6212_s17 }
  0x13   :  { %6250 = sst [smem:[#allocation53_spill]] %s6213_s18 }
  0x14   :  { %6251 = sst [smem:[#allocation54_spill]] %s6215_s20 }
  0x15   :  { %6252 = sst [smem:[#allocation55_spill]] %s6216_s21 }
  0x16   :  { %27 = vsyncpa [#allocation3], 0 }
  0x17   :  { %29 = vsyncpa [#allocation3 + $0x1], 0 }
  0x18   :  { %30 = vsyncpa [#allocation6], 0 }
  0x19   :  { %31 = vsyncpa [#allocation9], 0 }
  0x1a   :  { %32 = vsyncpa [#allocation12], 0 }
  0x1b   :  { %33 = vsyncpa [#allocation15], 0 }
  0x1c   :  { %34 = vsyncpa [#allocation18], 0 }
  0x1d   :  { %35 = vsyncpa [#allocation21], 0 }
  0x1e   :  { %36 = vsyncpa [#allocation4], 0 }
  0x1f   :  { %38 = vsyncpa [#allocation4 + $0x1], 0 }
  0x20   :  { %39 = vsyncpa [#allocation24], 0 }
  0x21   :  { %41 = vsyncpa [#allocation24 + $0x1], 0  ;;  %s5331_s2 = smov 0   ;;  %s5333_s25 = smov 0  }
  0x22   :  { %s5335_s26 = smov 0   ;;  %s5337_s27 = smov 0  }
  0x23   :  { %s5339_s3 = smov 0   ;;  %s5341_s28 = smov 0  }
  0x24   :  { %s5343_s29 = smov 0   ;;  %s5345_s0 = smov 0  }
  0x25 LB: > { %6253 = sst [smem:[#allocation34_spill]] %s5173_s3  ;;  %s6217_s4 = sadd.s32 4294967295, %s5185_s0   ;;  %s5185_s0 = sphi %s5345_s0, %s47_s0   ;;  %s5181_s29 = sphi %s5343_s29, %s6300_s29   ;;  %s5177_s28 = sphi %s5341_s28, %s6299_s28   ;;  %s5173_s3 = sphi %s5339_s3, %s6298_s3   ;;  %s5169_s27 = sphi %s5337_s27, %s6297_s27   ;;  %s5165_s26 = sphi %s5335_s26, %s6296_s26   ;;  %s5161_s25 = sphi %s5333_s25, %s6295_s25   ;;  %s5157_s2 = sphi %s5331_s2, %s6294_s2  }
  0x26   : > { %p3689_p0 = scmp.ge.s32.totalorder %s5185_s0, 1  ;;  %p5375_p1 = scmp.eq.s32.totalorder %s6217_s4, 0 }
  0x27   : > { %p541_p2 = scmp.lt.s32.totalorder %s5185_s0, 5  ;;  %s5187_s22 = smov [#allocation5]  }
  0x28   : > { %s6254_s30 = scalar_select %p5375_p1, 1, 0 }
  0x29   : > { %p5380_p3 = pnand %p3689_p0, %p541_p2  ;;  %s553_s23 = sshll.u32 %s5187_s22, 4  ;;  %s554_s23 = int_to_ptr.vmem [resolvable:$true] %s553_s23 }
  0x2a   : > { %s5188_s24 = smov [#allocation8]   ;;  %s5189_s21 = smov [#allocation11]  }
  0x2b   : > { %s6255_s5 = scalar_select %p5380_p3, 1, 0 }
  0x2c   : > { %p4225_p4 = pneg %p5380_p3  ;;  %s580_s4 = sshll.u32 %s5188_s24, 4  ;;  %s581_s4 = int_to_ptr.vmem [resolvable:$true] %s580_s4 }
  0x2d   : > { %s604_s20 = sshll.u32 %s5189_s21, 4  ;;  %s4732_s22 = scalar_lea.vmem %s554_s23, 1536  ;;  %s605_s20 = int_to_ptr.vmem [resolvable:$true] %s604_s20 }
  0x2e   : > { %p5388_p5 = pnand %p4225_p4, %p5375_p1  ;;  %p4733_p7 = scmp.ne.s32.totalorder %s554_s23, %s4732_s22 }
  0x2f   : > { %p4740_p10 = scmp.lt.s32.totalorder %s554_s23, %s554_s23  ;;  %p4741_p11 = scmp.lt.s32.totalorder %s4732_s22, %s4732_s22 }
  0x30   : > { %p5394_p6 = pneg %p5388_p5 }
  0x31   : > { %p4742_p12 = por %p4741_p11, %p4740_p10 }
  0x32   : > { %p4735_p8 = pnand %p4733_p7, %p5394_p6 }
  0x34   : > { %p4736_p9 = pneg %p4735_p8 }
  0x36   : > { %p4743_p13 = pnand %p4742_p12, %p4736_p9 }
  0x38   : > { %4746 = shalt.err (!%p4743_p13)
}
  0x39   : > { %s6224_s24 = smov 64   ;;  %s6226_s21 = smov 4  }
  0x3a   : > { %s6258_s16 = sld [smem:[#allocation36_spill]]  ;;  %s4758_s14 = scalar_lea.vmem %s581_s4, 16 }
  0x3b   : > { %p4759_p0 = scmp.ne.s32.totalorder %s581_s4, %s4758_s14  ;;  %s4765_s22 = scalar_lea.vmem %s581_s4, 32 }
  0x3c   : > { %p4766_p7 = scmp.lt.s32.totalorder %s581_s4, %s581_s4  ;;  %p4767_p8 = scmp.lt.s32.totalorder %s4765_s22, %s4758_s14 }
  0x3d   : > { %p4761_p2 = pnand %p4759_p0, %p5394_p6 }
  0x3e   : > { %p4768_p9 = por %p4767_p8, %p4766_p7 }
  0x3f   : > { %p4762_p4 = pneg %p4761_p2 }
  0x40   : > { %4228 = dma.hbm_to_vmem [thread:$0]  (!%p5388_p5), %s6258_s16, 1536, %s554_s23, [#allocation6], %s6224_s24, %s6224_s24, %s6226_s21  }
  0x41   : > { %p4769_p10 = pnand %p4768_p9, %p4762_p4 }
  0x43   : > { %4772 = shalt.err (!%p4769_p10)
}
  0x44   : > { %s6259_s8 = sld [smem:[#allocation38_spill]]  ;;  %s4784_s16 = scalar_lea.vmem %s605_s20, 32 }
  0x45   : > { %p4785_p11 = scmp.ne.s32.totalorder %s605_s20, %s4784_s16  ;;  %p4792_p0 = scmp.lt.s32.totalorder %s605_s20, %s605_s20 }
  0x46   : > { %p4793_p2 = scmp.lt.s32.totalorder %s4784_s16, %s4784_s16 }
  0x47   : > { %p4787_p12 = pnand %p4785_p11, %p5394_p6 }
  0x48   : > { %p4794_p3 = por %p4793_p2, %p4792_p0 }
  0x49   : > { %p4788_p13 = pneg %p4787_p12 }
  0x4a   : > { %4234 = dma.hbm_to_vmem [thread:$0]  (!%p5388_p5), %s6259_s8, 16, %s581_s4, [#allocation9]  }
  0x4b   : > { %p4795_p1 = pnand %p4794_p3, %p4788_p13 }
  0x4d   : > { %4798 = shalt.err (!%p4795_p1)
}
  0x4e   : > { %s6228_s14 = smov 16   ;;  %s5193_s17 = smov 1  }
  0x4f   : > { %s6260_s6 = sld [smem:[#allocation41_spill]]  ;;  %s5194_s11 = smov [#allocation14]  }
  0x50   : > { %s633_s18 = sshll.u32 %s5194_s11, 4  ;;  %s5195_s4 = smov [#allocation17]   ;;  %s634_s18 = int_to_ptr.vmem [resolvable:$true] %s633_s18 }
  0x51   : > { %s665_s23 = sshll.u32 %s5195_s4, 4  ;;  %s4810_s22 = scalar_lea.vmem %s634_s18, 2048  ;;  %s666_s23 = int_to_ptr.vmem [resolvable:$true] %s665_s23 }
  0x52   : > { %p4811_p3 = scmp.ne.s32.totalorder %s634_s18, %s4810_s22  ;;  %p4818_p7 = scmp.lt.s32.totalorder %s634_s18, %s634_s18 }
  0x53   : > { %p4819_p8 = scmp.lt.s32.totalorder %s4810_s22, %s4810_s22 }
  0x54   : > { %p4813_p1 = pnand %p4811_p3, %p5394_p6 }
  0x55   : > { %4240 = dma.hbm_to_vmem [thread:$0]  (!%p5388_p5), %s6260_s6, 32, %s605_s20, [#allocation12], %s6228_s14, %s6228_s14, %s5193_s17  }
  0x56   : > { %p4814_p4 = pneg %p4813_p1  ;;  %p4820_p9 = por %p4819_p8, %p4818_p7 }
  0x58   : > { %p4821_p10 = pnand %p4820_p9, %p4814_p4 }
  0x5a   : > { %4824 = shalt.err (!%p4821_p10)
}
  0x5b   : > { %s6261_s9 = sld [smem:[#allocation44_spill]]  ;;  %s4836_s8 = scalar_lea.vmem %s666_s23, 8192 }
  0x5c   : > { %p4837_p11 = scmp.ne.s32.totalorder %s666_s23, %s4836_s8  ;;  %p4844_p0 = scmp.lt.s32.totalorder %s666_s23, %s666_s23 }
  0x5d   : > { %p4845_p2 = scmp.lt.s32.totalorder %s4836_s8, %s4836_s8 }
  0x5e   : > { %p4839_p12 = pnand %p4837_p11, %p5394_p6 }
  0x5f   : > { %p4846_p3 = por %p4845_p2, %p4844_p0 }
  0x60   : > { %p4840_p13 = pneg %p4839_p12 }
  0x61   : > { %4246 = dma.hbm_to_vmem [thread:$0]  (!%p5388_p5), %s6261_s9, 2048, %s634_s18, [#allocation15], %s6224_s24, %s6224_s24, %s6226_s21  }
  0x62   : > { %p4847_p1 = pnand %p4846_p3, %p4840_p13 }
  0x64   : > { %4850 = shalt.err (!%p4847_p1)
}
  0x65   : > { %s5196_s10 = smov 256   ;;  %s6262_s13 = sld [smem:[#allocation48_spill]] }
  0x66   : > { %s5197_s18 = smov [#allocation7]  }
  0x67   : > { %s566_s22 = sshll.u32 %s5197_s18, 4  ;;  %s567_s22 = int_to_ptr.vmem [resolvable:$true] %s566_s22 }
  0x68   : > { %s4862_s20 = scalar_lea.vmem %s567_s22, 512  ;;  %p4870_p9 = scmp.lt.s32.totalorder %s567_s22, %s567_s22 }
  0x69   : > { %p4863_p4 = scmp.ne.s32.totalorder %s567_s22, %s4862_s20  ;;  %p4871_p10 = scmp.lt.s32.totalorder %s4862_s20, %s4862_s20 }
  0x6b   : > { %4252 = dma.hbm_to_vmem [thread:$0]  (!%p5388_p5), %s6262_s13, 8192, %s666_s23, [#allocation18], %s5196_s10, %s5196_s10, %s6228_s14  }
  0x6c   : > { %p4865_p7 = pnand %p4863_p4, %p5394_p6  ;;  %p4872_p11 = por %p4871_p10, %p4870_p9 }
  0x6e   : > { %p4866_p8 = pneg %p4865_p7 }
  0x70   : > { %p4873_p12 = pnand %p4872_p11, %p4866_p8 }
  0x72   : > { %4876 = shalt.err (!%p4873_p12)
}
  0x73   : > { %s6229_s16 = smov 128   ;;  %s6230_s8 = smov 8  }
  0x74   : > { %s6263_s11 = sld [smem:[#allocation37_spill]]  ;;  %s5200_s4 = smov [#allocation10]  }
  0x75   : > { %s591_s18 = sshll.u32 %s5200_s4, 4  ;;  %s5201_s24 = smov [#allocation13]   ;;  %s592_s18 = int_to_ptr.vmem [resolvable:$true] %s591_s18 }
  0x76   : > { %s617_s20 = sshll.u32 %s5201_s24, 4  ;;  %s4888_s21 = scalar_lea.vmem %s592_s18, 16  ;;  %s618_s20 = int_to_ptr.vmem [resolvable:$true] %s617_s20 }
  0x77   : > { %p4889_p13 = scmp.ne.s32.totalorder %s592_s18, %s4888_s21  ;;  %s4895_s14 = scalar_lea.vmem %s592_s18, 32 }
  0x78   : > { %p4896_p3 = scmp.lt.s32.totalorder %s592_s18, %s592_s18  ;;  %p4897_p1 = scmp.lt.s32.totalorder %s4895_s14, %s4888_s21 }
  0x79   : > { %p4891_p0 = pnand %p4889_p13, %p5394_p6 }
  0x7a   : > { %4231 = dma.hbm_to_vmem [thread:$0]  (!%p5388_p5), %s6263_s11, 512, %s567_s22, [#allocation6], %s6229_s16, %s6229_s16, %s6230_s8  }
  0x7b   : > { %p4892_p2 = pneg %p4891_p0  ;;  %p4898_p4 = por %p4897_p1, %p4896_p3 }
  0x7d   : > { %p4899_p7 = pnand %p4898_p4, %p4892_p2 }
  0x7f   : > { %4902 = shalt.err (!%p4899_p7)
}
  0x80   : > { %s6264_s10 = sld [smem:[#allocation39_spill]]  ;;  %s4914_s24 = scalar_lea.vmem %s618_s20, 6144 }
  0x81   : > { %p4915_p8 = scmp.ne.s32.totalorder %s618_s20, %s4914_s24  ;;  %p4922_p11 = scmp.lt.s32.totalorder %s618_s20, %s618_s20 }
  0x82   : > { %p4923_p12 = scmp.lt.s32.totalorder %s4914_s24, %s4914_s24 }
  0x83   : > { %p4917_p9 = pnand %p4915_p8, %p5394_p6 }
  0x84   : > { %p4924_p13 = por %p4923_p12, %p4922_p11 }
  0x85   : > { %p4918_p10 = pneg %p4917_p9 }
  0x86   : > { %4237 = dma.hbm_to_vmem [thread:$0]  (!%p5388_p5), %s6264_s10, 16, %s592_s18, [#allocation9]  }
  0x87   : > { %p4925_p0 = pnand %p4924_p13, %p4918_p10 }
  0x89   : > { %4928 = shalt.err (!%p4925_p0)
}
  0x8a   : > { %s5202_s21 = smov 192   ;;  %s5203_s14 = smov 12  }
  0x8b   : > { %s6265_s7 = sld [smem:[#allocation42_spill]]  ;;  %s5204_s18 = smov [#allocation16]  }
  0x8c   : > { %s652_s23 = sshll.u32 %s5204_s18, 4  ;;  %s5205_s22 = smov [#allocation19]   ;;  %s653_s23 = int_to_ptr.vmem [resolvable:$true] %s652_s23 }
  0x8d   : > { %s681_s10 = sshll.u32 %s5205_s22, 4  ;;  %s4940_s16 = scalar_lea.vmem %s653_s23, 32  ;;  %s682_s10 = int_to_ptr.vmem [resolvable:$true] %s681_s10 }
  0x8e   : > { %p4941_p2 = scmp.ne.s32.totalorder %s653_s23, %s4940_s16  ;;  %p4948_p4 = scmp.lt.s32.totalorder %s653_s23, %s653_s23 }
  0x8f   : > { %p4949_p7 = scmp.lt.s32.totalorder %s4940_s16, %s4940_s16 }
  0x90   : > { %p4943_p3 = pnand %p4941_p2, %p5394_p6 }
  0x91   : > { %4243 = dma.hbm_to_vmem [thread:$0]  (!%p5388_p5), %s6265_s7, 6144, %s618_s20, [#allocation12], %s5202_s21, %s5202_s21, %s5203_s14  }
  0x92   : > { %p4944_p1 = pneg %p4943_p3  ;;  %p4950_p8 = por %p4949_p7, %p4948_p4 }
  0x94   : > { %p4951_p9 = pnand %p4950_p8, %p4944_p1 }
  0x96   : > { %4954 = shalt.err (!%p4951_p9)
}
  0x97   : > { %s6266_s24 = smov 16   ;;  %s6267_s12 = sld [smem:[#allocation47_spill]] }
  0x98   : > { %s4966_s14 = scalar_lea.vmem %s682_s10, 8192  ;;  %p4974_p13 = scmp.lt.s32.totalorder %s682_s10, %s682_s10 }
  0x99   : > { %p4967_p10 = scmp.ne.s32.totalorder %s682_s10, %s4966_s14  ;;  %p4975_p0 = scmp.lt.s32.totalorder %s4966_s14, %s4966_s14 }
  0x9b   : > { %p4969_p11 = pnand %p4967_p10, %p5394_p6  ;;  %p4976_p2 = por %p4975_p0, %p4974_p13 }
  0x9d   : > { %4249 = dma.hbm_to_vmem [thread:$0]  (!%p5388_p5), %s6267_s12, 32, %s653_s23, [#allocation15], %s6266_s24, %s6266_s24, %s5193_s17  }
  0x9e   : > { %p4970_p12 = pneg %p4969_p11 }
  0xa0   : > { %p4977_p3 = pnand %p4976_p2, %p4970_p12 }
  0xa2   : > { %4980 = shalt.err (!%p4977_p3)
}
  0xa3   : > { %s6268_s16 = smov 4   ;;  %s6269_s11 = smov 64  }
  0xa4   : > { %s6270_s15 = sld [smem:[#allocation50_spill]]  ;;  %s5206_s17 = smov [#allocation20]  }
  0xa5   : > { %s703_s23 = sshll.u32 %s5206_s17, 4  ;;  %s704_s23 = int_to_ptr.vmem [resolvable:$true] %s703_s23 }
  0xa6   : > { %s4992_s22 = scalar_lea.vmem %s704_s23, 1024  ;;  %p5000_p8 = scmp.lt.s32.totalorder %s704_s23, %s704_s23 }
  0xa7   : > { %p4993_p1 = scmp.ne.s32.totalorder %s704_s23, %s4992_s22  ;;  %p5001_p9 = scmp.lt.s32.totalorder %s4992_s22, %s4992_s22 }
  0xa9   : > { %p4995_p4 = pnand %p4993_p1, %p5394_p6  ;;  %p5002_p10 = por %p5001_p9, %p5000_p8 }
  0xaa   : > { %4255 = dma.hbm_to_vmem [thread:$0]  (!%p5388_p5), %s6270_s15, 8192, %s682_s10, [#allocation18], %s6269_s11, %s6269_s11, %s6268_s16  }
  0xab   : > { %p4996_p7 = pneg %p4995_p4 }
  0xad   : > { %p5003_p11 = pnand %p5002_p10, %p4996_p7 }
  0xaf   : > { %5006 = shalt.err (!%p5003_p11)
}
  0xb0   : > { %4258 = dma.hbm_to_vmem [thread:$0]  (!%p5388_p5), %s6214_s19, 1024, %s704_s23, [#allocation21], %s6269_s11, %s6269_s11, %s6268_s16  }
  0xb1   : > { %s3688_s3 = sadd.s32 4294967294, %s5185_s0   ;;  %s56_s1 = sadd.s32 1, %s5177_s28 }
  0xb2   : > { %p57_p6 = scmp.ge.s32.totalorder %s56_s1, 2  ;;  %s59_s20 = sadd.s32 1, %s5181_s29 }
  0xb3   : > { %s66_s21 = sadd.s32 1, %s5165_s26  ;;  %p73_p12 = scmp.ne.s32.totalorder %s5165_s26, %s5161_s25 }
  0xb4   : > { %s6302_s1 = smov (%p57_p6, %s56_s1), 0  ;;  %s6304_s20 = smov (!%p57_p6, %s59_s20), %s5181_s29 }
  0xb5   : > { %p74_p13 = scmp.eq.s32.totalorder %s5185_s0, 0  ;;  %p79_p0 = scmp.ne.s32.totalorder %s5161_s25, %s5157_s2 }
  0xb6   : > { %p61_p2 = scmp.ge.s32.totalorder %s6304_s20, 2  ;;  %s6271_s14 = sadd.s32 4294967295, %s5185_s0  }
  0xb7   : > { %p502_p3 = scmp.eq.s32.totalorder %s6271_s14, 3  ;;  %p5511_p5 = por %p74_p13, %p73_p12 }
  0xb8   : > { %p6273_p1 = scmp.ne.s32.totalorder %s6254_s30, 0  ;;  %s6306_s20 = smov (%p61_p2, %s6304_s20), 0 }
  0xb9   : > { %p5523_p7 = por %p502_p3, %p73_p12  ;;  %p508_p8 = scmp.eq.s32.totalorder %s3688_s3, 3 }
  0xba   : > { %p5517_p4 = por %p6273_p1, %p79_p0  ;;  %s63_s18 = ssub.s32 %s5181_s29, %s6306_s20 }
  0xbb   : > { %p4281_p9 = scmp.lt.s32.totalorder %s5185_s0, 4  ;;  %p64_p10 = scmp.eq.s32.totalorder %s63_s18, 0 }
  0xbc   : > { %p5530_p11 = por %p508_p8, %p79_p0  ;;  %s717_s23 = sand.u32 1, %s5165_s26  }
  0xbd   : > { %s3896_s22 = sshll.u32 %s5181_s29, 9  ;;  %s3702_s10 = sshll.u32 %s717_s23, 5 }
  0xbe   : > { %s5537_s24 = scalar_select %p64_p10, %s5165_s26, %s66_s21  }
  0xbf   : > { %s6277_s6 = sld [smem:[#allocation35_spill]]  ;;  %s721_s9 = scalar_lea.vmem [#allocation2], %s3702_s10 }
  0xc0   : > { %s728_s12 = sshll.u32 %s721_s9, 4  ;;  %p5544_p6 = pnand %p4281_p9, %p5511_p5  ;;  %s729_s12 = int_to_ptr.vmem [resolvable:$true] %s728_s12 }
  0xc1   : > { %s718_s18 = scalar_lea.sflag [#allocation3], %s717_s23  ;;  %s5020_s13 = scalar_lea.vmem %s729_s12, 512 }
  0xc2   : > { %p5009_p12 = pneg %p5544_p6  ;;  %p5021_p13 = scmp.ne.s32.totalorder %s729_s12, %s5020_s13 }
  0xc3   : > { %s5207_s21 = smov [#allocation2]  }
  0xc4   : > { %p5023_p0 = pnand %p5021_p13, %p5009_p12  ;;  %s5025_s15 = sshll.u32 %s5207_s21, 4  ;;  %s5026_s15 = int_to_ptr.vmem [resolvable:$false] %s5025_s15 }
  0xc5   : > { %s727_s7 = scalar_lea.hbm %s6277_s6, %s3896_s22  ;;  %s5027_s6 = scalar_lea.vmem %s5026_s15, 1024 }
  0xc6   : > { %p5024_p2 = pneg %p5023_p0  ;;  %p5028_p3 = scmp.lt.s32.totalorder %s729_s12, %s5026_s15 }
  0xc7   : > { %p5029_p1 = scmp.lt.s32.totalorder %s5027_s6, %s5020_s13 }
  0xc9   : > { %p5030_p8 = por %p5029_p1, %p5028_p3 }
  0xcb   : > { %p5031_p5 = pnand %p5030_p8, %p5024_p2 }
  0xcd   : > { %5034 = shalt.err (!%p5031_p5)
}
  0xce   : > { %s6279_s9 = smov 8   ;;  %s6280_s8 = smov 128  }
  0xcf   : > { %4262 = dma.hbm_to_vmem [thread:$0]  (!%p5544_p6), %s727_s7, 512, %s729_s12, %s718_s18, %s6280_s8, %s6280_s8, %s6279_s9  }
  0xd0   : > { %p6281_p9 = scmp.ne.s32.totalorder %s6255_s5, 0 }
  0xd1   : > { %s5558_s16 = sand.u32 (!%p6281_p9), 1, %s5161_s25  }
  0xd2   : > { %740 = sbr.rel (%p6281_p9) target bundleno = 4804 (0x12c4), region = 100  ;;  %s3706_s15 = sshll.u32 (!%p6281_p9), %s5558_s16, 5 }
  0xd3   : > { %s743_s13 = scalar_lea.sflag (!%p6281_p9), [#allocation3], %s5558_s16  ;;  %s5562_s23 = scalar_lea.vmem (!%p6281_p9), [#allocation2], %s3706_s15 }
  0xd7   : > { %5120 = dma.done.wait (%p5517_p4), %s743_s13, 512  }
  0xd8   : > { %5122 = vsyncadd (%p5517_p4), %s743_s13, 4294966784  ;;  %p6282_p10 = scmp.ne.s32.totalorder %s6254_s30, 0 }
  0xda   : > { %5124 = dma.done.wait (%p6282_p10), [#allocation6], 2048  }
  0xdb   : > { %5126 = vsyncadd (%p6282_p10), [#allocation6], 4294965248 }
  0xdc   : > { %5128 = dma.done.wait (%p6282_p10), [#allocation9], 32  }
  0xdd   : > { %5130 = vsyncadd (%p6282_p10), [#allocation9], 4294967264 }
  0xde   : > { %5132 = dma.done.wait (%p6282_p10), [#allocation12], 6176  }
  0xdf   : > { %5134 = vsyncadd (%p6282_p10), [#allocation12], 4294961120 }
  0xe0   : > { %5136 = dma.done.wait (%p6282_p10), [#allocation15], 2080  }
  0xe1   : > { %5138 = vsyncadd (%p6282_p10), [#allocation15], 4294965216 }
  0xe2   : > { %5140 = dma.done.wait (%p6282_p10), [#allocation18], 16384  }
  0xe3   : > { %5142 = vsyncadd (%p6282_p10), [#allocation18], 4294950912 }
  0xe4   : > { %5144 = dma.done.wait (%p6282_p10), [#allocation21], 1024  }
  0xe5   : > { %5146 = vsyncadd (%p6282_p10), [#allocation21], 4294966272  ;;  %s5592_s7 = scalar_lea.vmem [#allocation22], %s3706_s15  ;;  %s852_s12 = scalar_lea.vmem [#allocation23], %s5558_s16 }
  0xe6   : > { %p3719_p4 = scmp.ne.s32.totalorder %s5169_s27, 0 }
  0xe8   : > { %857 = sbr.rel (%p3719_p4) target bundleno = 793 (0x319), region = 152 }
  0xed   : > { %v4389_v0 = vld [vmem:[#allocation5 + $0x38] sm:$0xff]   ;;  %v5208_v1 = vmov 0   ;;  %v4390_v2 = vld [vmem:[#allocation5 + $0x30] sm:$0xff]   ;;  %v4391_v3 = vld [vmem:[#allocation5 + $0x28] sm:$0xff]   ;;  %vm980_vm0 = vcmask 523264   ;;  %v5209_v43 = vmov 0.0   ;;  %v1103_v53 = vlaneseq }
  0xee   : > { %987 = vmatprep.subr.bf16.mxu0 %v5208_v1  ;;  %4143 = vmatprep.subr.bf16.mxu1 %v5208_v1  ;;  %v4392_v4 = vld [vmem:[#allocation5 + $0x20] sm:$0xff]   ;;  %v4393_v6 = vld [vmem:[#allocation5 + $0x18] sm:$0xff]   ;;  %v4394_v8 = vld [vmem:[#allocation5 + $0x10] sm:$0xff]   ;;  %1127 = vst [vmem:[%s5592_s7 + $0x18] sm:$0xff] %v5209_v43 }
  0xef   : > { %988 = vmatpush1.bf16.msra.mxu0 %v4389_v0  ;;  %4155 = vmatpush1.bf16.msra.mxu1 %v4389_v0  ;;  %v4403_v5 = vld [vmem:[%s5562_s23 + $0x4] ss:$8 sps:$4 sm:$0xff]   ;;  %v4406_v7 = vld [vmem:[%s5562_s23 + $0x14] ss:$8 sps:$4 sm:$0xff]   ;;  %v4401_v15 = vld [vmem:[%s5562_s23] ss:$8 sps:$4 sm:$0xff]  }
  0xf0   : > { %989 = vmatprep.subr.bf16.mxu0 %v5208_v1  ;;  %4144 = vmatprep.subr.bf16.mxu1 %v5208_v1  ;;  %v4395_v9 = vld [vmem:[#allocation5 + $0x8] sm:$0xff]   ;;  %v4396_v10 = vld [vmem:[#allocation5] sm:$0xff]   ;;  %v4397_v11 = vld [vmem:[#allocation5 + $0x58] sm:$0xff]   ;;  %v1104_v54 = vshrl.u32 %v1103_v53, 7 }
  0xf1   : > { %3736 = vmatprep.mubr.msk.bf16.mxu0 %vm980_vm0, %v4403_v5  ;;  %3737 = vmatprep.mubr.msk.bf16.mxu1 %vm980_vm0, %v4406_v7  ;;  %v4398_v12 = vld [vmem:[#allocation5 + $0x50] sm:$0xff]   ;;  %v4399_v13 = vld [vmem:[#allocation5 + $0x48] sm:$0xff]   ;;  %v4400_v14 = vld [vmem:[#allocation5 + $0x40] sm:$0xff]  }
  0xf2   : > { %v4404_v16 = vld [vmem:[%s5562_s23 + $0x10] ss:$8 sps:$4 sm:$0xff]   ;;  %v886_v21 = vld [vmem:[#allocation7] sm:$0xff]  ;;  %v887_v24 = vld [vmem:[#allocation7 + $0x8] sm:$0xff]  ;;  %v1106_v57 = vadd.s32 16, %v1104_v54 }
  0xf3   : > { %990 = vmatpush1.bf16.msra.mxu0 %v4390_v2  ;;  %4156 = vmatpush1.bf16.msra.mxu1 %v4390_v2  ;;  %v888_v17 = vld [vmem:[#allocation7 + $0x10] sm:$0xff]  ;;  %v3738_v56 = vld [vmem:[#allocation8] ss:$0 sm:$0xff]  ;;  %v3739_v59 = vld [vmem:[#allocation10] ss:$0 sm:$0xff] }
  0xf4   : > { %991 = vmatprep.subr.bf16.mxu0 %v5208_v1  ;;  %4145 = vmatprep.subr.bf16.mxu1 %v5208_v1  ;;  %vm1110_vm1 = vcmp.lt.s32.totalorder %v1106_v57, 17 }
  0xf7   : > { %992 = vmatpush1.bf16.msra.mxu0 %v4391_v3  ;;  %4157 = vmatpush1.bf16.msra.mxu1 %v4391_v3 }
  0xf8   : > { %993 = vmatprep.subr.bf16.mxu0 %v5208_v1  ;;  %4146 = vmatprep.subr.bf16.mxu1 %v5208_v1 }
  0xfb   : > { %994 = vmatpush1.bf16.msra.mxu0 %v4392_v4  ;;  %4158 = vmatpush1.bf16.msra.mxu1 %v4392_v4 }
  0xfc   : > { %995 = vmatprep.subr.bf16.mxu0 %v5208_v1  ;;  %4147 = vmatprep.subr.bf16.mxu1 %v5208_v1 }
  0xff   : > { %996 = vmatpush1.bf16.msra.mxu0 %v4393_v6  ;;  %4159 = vmatpush1.bf16.msra.mxu1 %v4393_v6 }
 0x100   : > { %997 = vmatprep.subr.bf16.mxu0 %v5208_v1  ;;  %4148 = vmatprep.subr.bf16.mxu1 %v5208_v1 }
 0x103   : > { %998 = vmatpush1.bf16.msra.mxu0 %v4394_v8  ;;  %4160 = vmatpush1.bf16.msra.mxu1 %v4394_v8 }
 0x104   : > { %999 = vmatprep.subr.bf16.mxu0 %v5208_v1  ;;  %4149 = vmatprep.subr.bf16.mxu1 %v5208_v1 }
 0x107   : > { %1000 = vmatpush1.bf16.msra.mxu0 %v4395_v9  ;;  %4161 = vmatpush1.bf16.msra.mxu1 %v4395_v9 }
 0x108   : > { %1001 = vmatprep.subr.bf16.mxu0 %v5208_v1  ;;  %4150 = vmatprep.subr.bf16.mxu1 %v5208_v1 }
 0x10b   : > { %1002 = vmatpush1.bf16.msra.mxu0 %v4396_v10  ;;  %4162 = vmatpush1.bf16.msra.mxu1 %v4396_v10 }
 0x10c   : > { %1011 = vmatprep.subr.bf16.mxu0 %v5208_v1  ;;  %4151 = vmatprep.subr.bf16.mxu1 %v5208_v1 }
 0x10f   : > { %1012 = vmatpush2.bf16.msra.mxu0 %v4397_v11  ;;  %4163 = vmatpush2.bf16.msra.mxu1 %v4397_v11 }
 0x110   : > { %1013 = vmatprep.subr.bf16.mxu0 %v5208_v1  ;;  %4152 = vmatprep.subr.bf16.mxu1 %v5208_v1 }
 0x113   : > { %1014 = vmatpush2.bf16.msra.mxu0 %v4398_v12  ;;  %4164 = vmatpush2.bf16.msra.mxu1 %v4398_v12 }
 0x114   : > { %1015 = vmatprep.subr.bf16.mxu0 %v5208_v1  ;;  %4153 = vmatprep.subr.bf16.mxu1 %v5208_v1 }
 0x117   : > { %1016 = vmatpush2.bf16.msra.mxu0 %v4399_v13  ;;  %4165 = vmatpush2.bf16.msra.mxu1 %v4399_v13 }
 0x118   : > { %1017 = vmatprep.subr.bf16.mxu0 %v5208_v1  ;;  %4154 = vmatprep.subr.bf16.mxu1 %v5208_v1 }
 0x11b   : > { %1018 = vmatpush2.bf16.msra.mxu0 %v4400_v14  ;;  %4166 = vmatpush2.bf16.msra.mxu1 %v4400_v14 }
 0x11e   : > { %1020 = vmatmul.mubr.bf16.vlgmr.msra.gmra.mxu0 %v4401_v15  ;;  %1028 = vmatmul.mubr.bf16.vlgmr.msra.gmra.mxu1 %v4404_v16 }
 0x1de   : > { %v1021_v18 = vpop.f32.mrf.mxu0  ;;  %v1029_v19 = vpop.f32.mrf.mxu1 }
 0x1df   : > { %v1030_v20 = vadd.f32 %v1029_v19, %v888_v17  ;;  %v1022_v27 = vadd.f32 %v1021_v18, %v886_v21 }
 0x1e0   : > { %v1023_v22 = vpop.f32.mrf.mxu0  ;;  %v1031_v23 = vpop.f32.mrf.mxu1 }
 0x1e1   : > { %1042 = vadd.xlane.f32.xlu0 %v1030_v20 }
 0x1e2   : > { %v1024_v25 = vpop.f32.mrf.mxu0  ;;  %v1032_v26 = vpop.f32.mrf.mxu1 }
 0x1e3   : > { %v1025_v28 = vadd.f32 %v1024_v25, %v887_v24 }
 0x1e4   : > { %v1026_v29 = vpop.f32.mrf.mxu0  ;;  %v1034_v30 = vpop.f32.mrf.mxu1 }
 0x1e5   : > { %1040 = vadd.xlane.f32.xlu1 %v1025_v28  ;;  %1038 = vadd.xlane.f32.xlu0 %v1022_v27 }
 0x26a   : > { %v1043_v31 = vpop.xlane.xlu0 %1042 }
 0x26b   : > { %v1049_v32 = vmul.f32 0.0078125, %v1043_v31 }
 0x26d   : > { %v1053_v33 = vsub.f32 %v1030_v20, %v1049_v32 }
 0x26e   : > { %v1041_v34 = vpop.xlane.xlu1 %1040  ;;  %v1039_v35 = vpop.xlane.xlu0 %1038 }
 0x26f   : > { %v1048_v36 = vmul.f32 0.0078125, %v1041_v34  ;;  %v1047_v37 = vmul.f32 0.0078125, %v1039_v35  ;;  %v1057_v38 = vmul.f32 %v1053_v33, %v1053_v33 }
 0x271   : > { %v1052_v39 = vsub.f32 %v1025_v28, %v1048_v36  ;;  %v1051_v40 = vsub.f32 %v1022_v27, %v1047_v37  ;;  %1063 = vadd.xlane.f32.xlu1 %v1057_v38 }
 0x273   : > { %v1056_v41 = vmul.f32 %v1052_v39, %v1052_v39  ;;  %v1055_v42 = vmul.f32 %v1051_v40, %v1051_v40 }
 0x275   : > { %1061 = vadd.xlane.f32.xlu1 %v1056_v41  ;;  %1059 = vadd.xlane.f32.xlu0 %v1055_v42 }
 0x2fa   : > { %v1064_v44 = vpop.xlane.xlu1 %1063 }
 0x2fb   : > { %v1069_v45 = vmul.f32 0.0078125, %v1064_v44 }
 0x2fd   : > { %v1073_v46 = vadd.f32 1e-05, %v1069_v45 }
 0x2fe   : > { %v1062_v47 = vpop.xlane.xlu1 %1061  ;;  %v1060_v48 = vpop.xlane.xlu0 %1059 }
 0x2ff   : > { %4407 = vrsqrt.f32 %v1073_v46  ;;  %v1068_v49 = vmul.f32 0.0078125, %v1062_v47  ;;  %v1067_v50 = vmul.f32 0.0078125, %v1060_v48 }
 0x301   : > { %v1072_v51 = vadd.f32 1e-05, %v1068_v49  ;;  %v1071_v52 = vadd.f32 1e-05, %v1067_v50 }
 0x303   : > { %4409 = vrsqrt.f32 %v1072_v51 }
 0x304   : > { %4411 = vrsqrt.f32 %v1071_v52 }
 0x30c   : > { %v4408_v55 = vpop.eup %4407 }
 0x30d   : > { %v1081_v58 = vmul.f32 %v4408_v55, %v1053_v33 }
 0x30f   : > { %v1091_v60 = vmul.f32 %v3738_v56, %v1081_v58 }
 0x310   : > { %v4410_v61 = vpop.eup %4409 }
 0x311   : > { %v4412_v62 = vpop.eup %4411  ;;  %v1101_v63 = vadd.f32 %v3739_v59, %v1091_v60  ;;  %v1080_v0 = vmul.f32 %v4410_v61, %v1052_v39 }
 0x312   : > { %v1079_v1 = vmul.f32 %v4412_v62, %v1051_v40 }
 0x313   : > { %v1122_v2 = vsel %vm1110_vm1, %v1101_v63, 0.0  ;;  %v1090_v3 = vmul.f32 %v3738_v56, %v1080_v0 }
 0x314   : > { %1126 = vst [vmem:[%s5592_s7 + $0x10] sm:$0xff] %v1122_v2  ;;  %v1089_v4 = vmul.f32 %v3738_v56, %v1079_v1 }
 0x315   : > { %v1100_v5 = vadd.f32 %v3739_v59, %v1090_v3 }
 0x316   : > { %v1099_v6 = vadd.f32 %v3739_v59, %v1089_v4 }
 0x317   : > { %1125 = vst [vmem:[%s5592_s7 + $0x8] sm:$0xff] %v1100_v5 }
 0x318   : > { %1124 = vst [vmem:[%s5592_s7] sm:$0xff] %v1099_v6 }
 0x319 PF: > { %v1131_v10 = vld [vmem:[%s5592_s7 + $0x18] sm:$0xff]  ;;  %s3897_s30 = smul.u32 192, %s5169_s27  ;;  %v5210_v46 = vmov 0   ;;  %s6283_s10 = sld [smem:[#allocation40_spill]]  ;;  %vm1501_vm2 = vcmask 261120   ;;  %vm2250_vm4 = vcmask 523264  }
 0x31a   : > { %1421 = vmatprep.mubr.bf16.mxu0 %v5210_v46  ;;  %s1138_s3 = scalar_lea.vmem [#allocation11], %s5169_s27  ;;  %s1242_s18 = smul.u32 3, %s5169_s27  ;;  %vm2255_vm5 = vcmask 785408  }
 0x31b   : > { %v1130_v8 = vld [vmem:[%s5592_s7 + $0x10] sm:$0xff]  ;;  %s5609_s5 = scalar_lea.vmem [#allocation13], %s3897_s30  ;;  %s6284_s9 = sld [smem:[#allocation43_spill]] }
 0x31c   : > { %1144 = vadd.xlane.f32.xlu1 %v1130_v8  ;;  %v4443_v11 = vld [vmem:[%s5609_s5 + $0xac] ss:$12 sps:$4 sm:$0xff]   ;;  %v4445_v12 = vld [vmem:[%s5609_s5 + $0xa8] ss:$12 sps:$4 sm:$0xff]   ;;  %v4448_v30 = vld [vmem:[%s5609_s5 + $0xb0] ss:$12 sps:$4 sm:$0xff]  }
 0x31d   : > { %1389 = vmatprep.subr.bf16.mxu0 %v4443_v11  ;;  %v4446_v29 = vld [vmem:[%s5609_s5 + $0x94] ss:$12 sps:$4 sm:$0xff]   ;;  %v4449_v31 = vld [vmem:[%s5609_s5 + $0x90] ss:$12 sps:$4 sm:$0xff]   ;;  %4019 = vmatprep.subr.bf16.mxu1 %v4448_v30  ;;  %v4452_v33 = vld [vmem:[%s5609_s5 + $0x98] ss:$12 sps:$4 sm:$0xff]  }
 0x31e   : > { %v1129_v9 = vld [vmem:[%s5592_s7 + $0x8] sm:$0xff]  ;;  %1390 = vmatpush1.bf16.msra.mxu0 %v4445_v12  ;;  %4020 = vmatpush3.bf16.msra.mxu1 %v4448_v30  ;;  %v4450_v32 = vld [vmem:[%s5609_s5 + $0x7c] ss:$12 sps:$4 sm:$0xff]   ;;  %v4453_v34 = vld [vmem:[%s5609_s5 + $0x78] ss:$12 sps:$4 sm:$0xff]   ;;  %s5212_s15 = smov 96  }
 0x31f   : > { %v1128_v7 = vld [vmem:[%s5592_s7] sm:$0xff]  ;;  %1391 = vmatprep.subr.bf16.mxu0 %v4446_v29  ;;  %4021 = vmatprep.subr.bf16.mxu1 %v4452_v33  ;;  %v4454_v35 = vld [vmem:[%s5609_s5 + $0x64] ss:$12 sps:$4 sm:$0xff]   ;;  %v4462_v41 = vld [vmem:[%s5609_s5 + $0x34] ss:$12 sps:$4 sm:$0xff]   ;;  %s1136_s14 = scalar_lea.vmem %s6283_s10, %s5169_s27  ;;  %s5213_s13 = smov 64  }
 0x320   : > { %1140 = vadd.xlane.f32.xlu0 %v1128_v7  ;;  %1146 = vadd.xlane.f32.xlu1 %v1131_v10  ;;  %v4456_v36 = vld [vmem:[%s5609_s5 + $0x80] ss:$12 sps:$4 sm:$0xff]   ;;  %v4460_v39 = vld [vmem:[%s5609_s5 + $0x68] ss:$12 sps:$4 sm:$0xff]   ;;  %v4464_v42 = vld [vmem:[%s5609_s5 + $0x50] ss:$12 sps:$4 sm:$0xff]  }
 0x321   : > { %v4457_v37 = vld [vmem:[%s5609_s5 + $0x60] ss:$12 sps:$4 sm:$0xff]   ;;  %v4461_v40 = vld [vmem:[%s5609_s5 + $0x48] ss:$12 sps:$4 sm:$0xff]   ;;  %v4465_v43 = vld [vmem:[%s5609_s5 + $0x30] ss:$12 sps:$4 sm:$0xff]   ;;  %s1243_s8 = scalar_lea.vmem %s6284_s9, %s1242_s18 }
 0x322   : > { %1392 = vmatpush1.bf16.msra.mxu0 %v4449_v31  ;;  %4022 = vmatpush3.bf16.msra.mxu1 %v4452_v33  ;;  %v4458_v38 = vld [vmem:[%s5609_s5 + $0x4c] ss:$12 sps:$4 sm:$0xff]   ;;  %v4466_v44 = vld [vmem:[%s5609_s5 + $0x1c] ss:$12 sps:$4 sm:$0xff]   ;;  %v4470_v48 = vld [vmem:[%s5609_s5 + $0x4] ss:$12 sps:$4 sm:$0xff]  }
 0x323   : > { %1393 = vmatprep.subr.bf16.mxu0 %v4450_v32  ;;  %4023 = vmatprep.subr.bf16.mxu1 %v4456_v36  ;;  %v4468_v45 = vld [vmem:[%s5609_s5 + $0x38] ss:$12 sps:$4 sm:$0xff]   ;;  %v4472_v49 = vld [vmem:[%s5609_s5 + $0x20] ss:$12 sps:$4 sm:$0xff]   ;;  %v4474_v51 = vld [vmem:[%s5609_s5 + $0x8] ss:$12 sps:$4 sm:$0xff]  }
 0x324   : > { %1142 = vadd.xlane.f32.xlu0 %v1129_v9  ;;  %v4469_v47 = vld [vmem:[%s5609_s5 + $0x18] ss:$12 sps:$4 sm:$0xff]   ;;  %v4473_v50 = vld [vmem:[%s5609_s5] ss:$12 sps:$4 sm:$0xff]   ;;  %s5214_s23 = smov 32   ;;  %s3898_s30 = sshll.u32 %s5169_s27, 6 }
 0x325   : > { %v3740_v2 = vld [vmem:[%s1136_s14] ss:$0 sm:$0xff]  ;;  %s2264_s5 = scalar_lea.vmem [#allocation14], %s3898_s30  ;;  %s6285_s10 = sld [smem:[#allocation45_spill]] }
 0x326   : > { %1394 = vmatpush1.bf16.msra.mxu0 %v4453_v34  ;;  %4024 = vmatpush3.bf16.msra.mxu1 %v4456_v36  ;;  %s6287_s11 = sld [smem:[#allocation49_spill]]  ;;  %p3881_p6 = scmp.ne.s32.totalorder %s5169_s27, 1 }
 0x327   : > { %1395 = vmatprep.subr.bf16.mxu0 %v4454_v35  ;;  %4025 = vmatprep.subr.bf16.mxu1 %v4460_v39  ;;  %s6289_s6 = sld [smem:[#allocation52_spill]] (!%p3881_p6) }
 0x32a   : > { %1396 = vmatpush1.bf16.msra.mxu0 %v4457_v37  ;;  %4026 = vmatpush3.bf16.msra.mxu1 %v4460_v39 }
 0x32b   : > { %1397 = vmatprep.subr.bf16.mxu0 %v4458_v38  ;;  %4027 = vmatprep.subr.bf16.mxu1 %v4464_v42  ;;  %s2281_s14 = scalar_lea.vmem %s6285_s10, %s5169_s27 }
 0x32e   : > { %1398 = vmatpush1.bf16.msra.mxu0 %v4461_v40  ;;  %4028 = vmatpush3.bf16.msra.mxu1 %v4464_v42 }
 0x32f   : > { %1399 = vmatprep.subr.bf16.mxu0 %v4462_v41  ;;  %4029 = vmatprep.subr.bf16.mxu1 %v4468_v45 }
 0x332   : > { %1400 = vmatpush1.bf16.msra.mxu0 %v4465_v43  ;;  %4030 = vmatpush3.bf16.msra.mxu1 %v4468_v45 }
 0x333   : > { %1401 = vmatprep.subr.bf16.mxu0 %v4466_v44  ;;  %4031 = vmatprep.subr.bf16.mxu1 %v4472_v49 }
 0x336   : > { %1402 = vmatpush1.bf16.msra.mxu0 %v4469_v47  ;;  %4032 = vmatpush3.bf16.msra.mxu1 %v4472_v49 }
 0x337   : > { %1403 = vmatprep.subr.bf16.mxu0 %v4470_v48  ;;  %4033 = vmatprep.subr.bf16.mxu1 %v4474_v51 }
 0x33a   : > { %1404 = vmatpush1.bf16.msra.mxu0 %v4473_v50  ;;  %4034 = vmatpush3.bf16.msra.mxu1 %v4474_v51 }
 0x3a5   : > { %v1145_v14 = vpop.xlane.xlu1 %1144 }
 0x3a6   : > { %v1151_v16 = vmul.f32 0.0078125, %v1145_v14 }
 0x3a8   : > { %v5615_v18 = vsub.f32 %v1130_v8, %v1151_v16 }
 0x3a9   : > { %v1141_v13 = vpop.xlane.xlu0 %1140  ;;  %v1147_v20 = vpop.xlane.xlu1 %1146 }
 0x3aa   : > { %v1149_v15 = vmul.f32 0.0078125, %v1141_v13  ;;  %v1152_v23 = vmul.f32 0.0078125, %v1147_v20  ;;  %v1159_v26 = vmul.f32 %v5615_v18, %v5615_v18 }
 0x3ac   : > { %v5613_v17 = vsub.f32 %v1128_v7, %v1149_v15  ;;  %v5621_v25 = vsub.f32 %v1131_v10, %v1152_v23  ;;  %v3741_v7 = vld [vmem:[%s1138_s3] ss:$0 sm:$0xff]  ;;  %s3899_s3 = sshll.u32 %s5169_s27, 8 }
 0x3ad   : > { %v1143_v19 = vpop.xlane.xlu0 %1142  ;;  %v1244_v23 = vld [vmem:[%s1243_s8] sm:$0x7]  ;;  %s5909_s18 = scalar_lea.vmem [#allocation17], %s3899_s3  ;;  %s5915_s21 = scalar_lea.vmem [#allocation19], %s3899_s3 }
 0x3ae   : > { %v1150_v21 = vmul.f32 0.0078125, %v1143_v19  ;;  %v1157_v22 = vmul.f32 %v5613_v17, %v5613_v17  ;;  %v1160_v28 = vmul.f32 %v5621_v25, %v5621_v25  ;;  %s6286_s8 = sld [smem:[#allocation46_spill]] }
 0x3af   : > { %s6288_s3 = sld [smem:[#allocation51_spill]] }
 0x3b0   : > { %v5619_v24 = vsub.f32 %v1129_v9, %v1150_v21  ;;  %1161 = vadd.xlane.f32.xlu0 %v1157_v22 }
 0x3b2   : > { %v1158_v27 = vmul.f32 %v5619_v24, %v5619_v24 }
 0x3b4   : > { %1165 = vadd.xlane.f32.xlu0 %v1159_v26  ;;  %1163 = vadd.xlane.f32.xlu1 %v1158_v27 }
 0x3b8   : > { %1167 = vadd.xlane.f32.xlu1 %v1160_v28 }
 0x439   : > { %v1162_v52 = vpop.xlane.xlu0 %1161 }
 0x43a   : > { %v1169_v53 = vmul.f32 0.0078125, %v1162_v52 }
 0x43c   : > { %v1173_v54 = vadd.f32 1e-05, %v1169_v53 }
 0x43d   : > { %v1164_v55 = vpop.xlane.xlu1 %1163  ;;  %v1166_v56 = vpop.xlane.xlu0 %1165 }
 0x43e   : > { %4563 = vrsqrt.f32 %v1173_v54  ;;  %v1170_v57 = vmul.f32 0.0078125, %v1164_v55  ;;  %v1171_v58 = vmul.f32 0.0078125, %v1166_v56 }
 0x440   : > { %v1174_v59 = vadd.f32 1e-05, %v1170_v57  ;;  %v1175_v60 = vadd.f32 1e-05, %v1171_v58 }
 0x441   : > { %v1168_v61 = vpop.xlane.xlu1 %1167 }
 0x442   : > { %4565 = vrsqrt.f32 %v1174_v59  ;;  %v1172_v62 = vmul.f32 0.0078125, %v1168_v61 }
 0x443   : > { %4567 = vrsqrt.f32 %v1175_v60 }
 0x444   : > { %v1176_v63 = vadd.f32 1e-05, %v1172_v62 }
 0x446   : > { %4569 = vrsqrt.f32 %v1176_v63 }
 0x44b   : > { %v4564_v0 = vpop.eup %4563 }
 0x44c   : > { %v1181_v1 = vmul.f32 %v4564_v0, %v5613_v17 }
 0x44e   : > { %v1191_v6 = vmul.f32 %v3740_v2, %v1181_v1 }
 0x44f   : > { %v4566_v3 = vpop.eup %4565 }
 0x450   : > { %v4568_v4 = vpop.eup %4567  ;;  %v1182_v5 = vmul.f32 %v4566_v3, %v5619_v24  ;;  %v1201_v11 = vadd.f32 %v3741_v7, %v1191_v6 }
 0x451   : > { %v1183_v8 = vmul.f32 %v4568_v4, %v5615_v18  ;;  %v1132_v18 = vlaneseq  ;;  %v5211_v4 = vmov -1e+30  }
 0x452   : > { %v1192_v9 = vmul.f32 %v3740_v2, %v1182_v5 }
 0x453   : > { %v4570_v10 = vpop.eup %4569  ;;  %v1193_v14 = vmul.f32 %v3740_v2, %v1183_v8  ;;  %v5663_v21 = vshrl.u32 %v1132_v18, 7 }
 0x454   : > { %v1202_v12 = vadd.f32 %v3741_v7, %v1192_v9  ;;  %v1184_v13 = vmul.f32 %v4570_v10, %v5621_v25 }
 0x455   : > { %v1203_v17 = vadd.f32 %v3741_v7, %v1193_v14  ;;  %v1248_v22 = vsub.s32 0, %v5663_v21  ;;  %v1256_v26 = vsub.s32 2, %v5663_v21  ;;  %v1252_v39 = vsub.s32 1, %v5663_v21 }
 0x456   : > { %v1205_v15 = vpack.c.bf16 %v1202_v12, %v1201_v11  ;;  %v1194_v16 = vmul.f32 %v3740_v2, %v1184_v13  ;;  %v1133_v2 = vand.u32 127, %v1132_v18 }
 0x457   : > { %v1249_v24 = vrot.slane %v1244_v23, %v1248_v22  ;;  %v1257_v32 = vrot.slane %v1244_v23, %v1256_v26  ;;  %v1253_v50 = vrot.slane %v1244_v23, %v1252_v39 }
 0x458   : > { %1422 = vmatmul.mubr.bf16.vlgmr.msra.gmra.mxu0 %v1205_v15  ;;  %4035 = vmatprep.mubr.bf16.mxu1 %v1205_v15  ;;  %v1204_v19 = vadd.f32 %v3741_v7, %v1194_v16  ;;  %vm1134_vm3 = vcmp.lt.s32.totalorder %v1133_v2, 17 }
 0x459   : > { %1431 = vmatprep.mubr.bf16.mxu0 %v5210_v46  ;;  %v5705_v5 = vsel %vm1134_vm3, 0.0, %v5211_v4 }
 0x45a   : > { %v1206_v20 = vpack.c.bf16 %v1204_v19, %v1203_v17 }
 0x45c   : > { %4036 = vmatmul.mubr.bf16.vlgmr.msra.gmra.mxu1 %v1206_v20 }
 0x460   : > { %1432 = vmatmul.mubr.bf16.gmra.mxu0 %v1206_v20 }
 0x518   : > { %v1423_v25 = vpop.f32.mrf.mxu0 }
 0x519   : > { %v1424_v28 = vadd.f32 %v1423_v25, %v1249_v24 }
 0x51a   : > { %v1425_v27 = vpop.f32.mrf.mxu0 }
 0x51b   : > { %v1491_v35 = vmul.f32 0.17677669, %v1424_v28  ;;  %v1426_v56 = vadd.f32 %v1425_v27, %v1253_v50 }
 0x51c   : > { %v1427_v29 = vpop.f32.mrf.mxu0  ;;  %v4037_v30 = vpop.f32.mrf.mxu1 }
 0x51d   : > { %v1428_v31 = vadd.f32 %v1427_v29, %v1249_v24  ;;  %v1485_v41 = vadd.f32 %v4037_v30, %v1257_v32 }
 0x51e   : > { %v1429_v33 = vpop.f32.mrf.mxu0  ;;  %v1476_v34 = vpop.f32.mrf.mxu1 }
 0x51f   : > { %v1492_v36 = vmul.f32 0.17677669, %v1428_v31  ;;  %v1477_v45 = vadd.f32 %v1476_v34, %v1257_v32  ;;  %v1430_v53 = vadd.f32 %v1429_v33, %v1253_v50 }
 0x520   : > { %v1433_v37 = vpop.f32.mrf.mxu0  ;;  %v4038_v38 = vpop.f32.mrf.mxu1 }
 0x521   : > { %v5675_v40 = vpack.c.bf16 %v1492_v36, %v1491_v35  ;;  %v1488_v42 = vadd.f32 %v4038_v38, %v1257_v32  ;;  %v5691_v58 = vpack.c.bf16 %v1430_v53, %v1426_v56  ;;  %v1434_v61 = vadd.f32 %v1433_v37, %v1249_v24 }
 0x522   : > { %v1435_v43 = vpop.f32.mrf.mxu0  ;;  %v1479_v44 = vpop.f32.mrf.mxu1 }
 0x523   : > { %v5677_v47 = vpack.c.bf16 %v1488_v42, %v1485_v41  ;;  %v1480_v48 = vadd.f32 %v1479_v44, %v1257_v32  ;;  %4043 = vmatprep.mubr.msk.bf16.mxu0 %vm1501_vm2, %v5675_v40  ;;  %v1436_v54 = vadd.f32 %v1435_v43, %v1253_v50  ;;  %v1509_v62 = vsel %vm1501_vm2, %v5691_v58, 0 }
 0x524   : > { %v1437_v49 = vpop.f32.mrf.mxu0  ;;  %v1493_v0 = vmul.f32 0.17677669, %v1434_v61 }
 0x525   : > { %v5683_v51 = vpack.c.bf16 %v1480_v48, %v1477_v45  ;;  %4047 = vmatprep.subr.bf16.mxu1 %v5677_v47  ;;  %v1438_v60 = vadd.f32 %v1437_v49, %v1249_v24 }
 0x526   : > { %v1439_v52 = vpop.f32.mrf.mxu0  ;;  %4048 = vmatpush3.bf16.msra.mxu1 %v5677_v47 }
 0x527   : > { %v1440_v55 = vadd.f32 %v1439_v52, %v1253_v50  ;;  %4049 = vmatprep.subr.bf16.mxu1 %v5683_v51  ;;  %v1494_v63 = vmul.f32 0.17677669, %v1438_v60 }
 0x529   : > { %v5688_v57 = vpack.c.bf16 %v1440_v55, %v1436_v54  ;;  %v5701_v1 = vpack.c.bf16 %v1494_v63, %v1493_v0 }
 0x52a   : > { %4050 = vmatpush3.bf16.msra.mxu1 %v5683_v51 }
 0x52b   : > { %4167 = vmatprep.subr.msk.bf16.mxu0 %vm1501_vm2, %v5688_v57  ;;  %v1512_v59 = vsel %vm1501_vm2, %v5688_v57, 0 }
 0x52c   : > { %4040 = vmatpush3.bf16.xpose.msra.mxu0 %v1512_v59 }
 0x52d   : > { %4168 = vmatprep.subr.msk.bf16.mxu0 %vm1501_vm2, %v5691_v58 }
 0x534   : > { %4042 = vmatpush3.bf16.xpose.msra.mxu0 %v1509_v62 }
 0x53b   : > { %4044 = vmatmul.mubr.msk.bf16.vlgmr.msra.gmra.mxu0 %vm1501_vm2, %v5701_v1 }
 0x5fb   : > { %v4045_v3 = vpop.f32.mrf.mxu0 }
 0x5fc   : > { %v1557_v9 = vadd.f32 %v4045_v3, %v5705_v5 }
 0x5fd   : > { %v1548_v6 = vpop.f32.mrf.mxu0 }
 0x5fe   : > { %v1549_v7 = vadd.f32 %v1548_v6, %v5705_v5  ;;  %v1569_v15 = vsel %vm1501_vm2, %v1557_v9, -inf }
 0x5ff   : > { %v4046_v8 = vpop.f32.mrf.mxu0 }
 0x600   : > { %v1563_v10 = vsel %vm1501_vm2, %v1549_v7, -inf  ;;  %v1560_v13 = vadd.f32 %v4046_v8, %v5705_v5 }
 0x601   : > { %v1551_v11 = vpop.f32.mrf.mxu0  ;;  %1564 = vmax.xlane.f32.xlu0 %v1563_v10 }
 0x602   : > { %v1552_v12 = vadd.f32 %v1551_v11, %v5705_v5  ;;  %v1572_v16 = vsel %vm1501_vm2, %v1560_v13, -inf }
 0x604   : > { %v1566_v14 = vsel %vm1501_vm2, %v1552_v12, -inf }
 0x605   : > { %1567 = vmax.xlane.f32.xlu1 %v1566_v14  ;;  %1570 = vmax.xlane.f32.xlu0 %v1569_v15 }
 0x609   : > { %1573 = vmax.xlane.f32.xlu1 %v1572_v16 }
 0x68a   : > { %v1565_v17 = vpop.xlane.xlu0 %1564 }
 0x68b   : > { %v1575_v19 = vsub.f32 %v1549_v7, %v1565_v17 }
 0x68d   : > { %v1579_v28 = vmul.f32 1.442695, %v1575_v19 }
 0x68e   : > { %v1568_v20 = vpop.xlane.xlu1 %1567  ;;  %v1571_v18 = vpop.xlane.xlu0 %1570 }
 0x68f   : > { %v1576_v23 = vsub.f32 %v1552_v12, %v1568_v20  ;;  %v1577_v24 = vsub.f32 %v1557_v9, %v1571_v18 }
 0x691   : > { %v1581_v25 = vmul.f32 1.442695, %v1576_v23  ;;  %v1583_v27 = vmul.f32 1.442695, %v1577_v24 }
 0x692   : > { %v1574_v29 = vpop.xlane.xlu1 %1573 }
 0x693   : > { %4571 = vpow2.f32 %v1581_v25  ;;  %v1578_v30 = vsub.f32 %v1560_v13, %v1574_v29 }
 0x694   : > { %4573 = vpow2.f32 %v1583_v27 }
 0x695   : > { %v1585_v31 = vmul.f32 1.442695, %v1578_v30  ;;  %4575 = vpow2.f32 %v1579_v28 }
 0x697   : > { %4577 = vpow2.f32 %v1585_v31 }
 0x6a0   : > { %v4572_v32 = vpop.eup %4571 }
 0x6a1   : > { %v4574_v33 = vpop.eup %4573  ;;  %v1590_v34 = vsel %vm1501_vm2, %v4572_v32, 0.0 }
 0x6a2   : > { %1591 = vadd.xlane.f32.xlu1 %v1590_v34  ;;  %v1593_v35 = vsel %vm1501_vm2, %v4574_v33, 0.0  ;;  %v4576_v36 = vpop.eup %4575 }
 0x6a3   : > { %1594 = vadd.xlane.f32.xlu0 %v1593_v35  ;;  %v1587_v41 = vsel %vm1501_vm2, %v4576_v36, 0.0 }
 0x6a4   : > { %v4578_v37 = vpop.eup %4577 }
 0x6a5   : > { %v1596_v38 = vsel %vm1501_vm2, %v4578_v37, 0.0 }
 0x6a6   : > { %1597 = vadd.xlane.f32.xlu1 %v1596_v38 }
 0x6a7   : > { %1588 = vadd.xlane.f32.xlu0 %v1587_v41 }
 0x6b7   : > { %1672 = vrot.lane.b32.xlu1 %v5691_v58, %s5212_s15 }
 0x6bb   : > { %1666 = vrot.lane.b32.xlu1 %v5675_v40, %s5212_s15 }
 0x6bd   : > { %1674 = vrot.lane.b32.xlu0 %v5688_v57, %s5212_s15 }
 0x6bf   : > { %1852 = vrot.lane.b32.xlu1 %v5688_v57, %s5213_s13 }
 0x6c1   : > { %1668 = vrot.lane.b32.xlu0 %v5701_v1, %s5212_s15 }
 0x6c3   : > { %1850 = vrot.lane.b32.xlu1 %v5691_v58, %s5213_s13 }
 0x6c5   : > { %1846 = vrot.lane.b32.xlu0 %v5675_v40, %s5213_s13 }
 0x6c7   : > { %1848 = vrot.lane.b32.xlu1 %v5701_v1, %s5213_s13 }
 0x72b   : > { %v1592_v42 = vpop.xlane.xlu1 %1591 }
 0x72c   : > { %v1595_v43 = vpop.xlane.xlu0 %1594 }
 0x72d   : > { %4579 = vrcp.f32 %v1595_v43 }
 0x72e   : > { %4581 = vrcp.f32 %v1592_v42 }
 0x72f   : > { %v1598_v44 = vpop.xlane.xlu1 %1597 }
 0x730   : > { %4583 = vrcp.f32 %v1598_v44  ;;  %v1589_v45 = vpop.xlane.xlu0 %1588 }
 0x731   : > { %4585 = vrcp.f32 %v1589_v45 }
 0x733   : > { %v1673_v54 = vpop.permute.xlu1 %1672 }
 0x734   : > { %v1675_v48 = vpop.permute.xlu0 %1674  ;;  %v1683_v2 = vsel %vm1501_vm2, %v1673_v54, 0 }
 0x735   : > { %4169 = vmatprep.subr.msk.bf16.mxu1 %vm1501_vm2, %v1675_v48  ;;  %v1686_v63 = vsel %vm1501_vm2, %v1675_v48, 0 }
 0x737   : > { %v1667_v0 = vpop.permute.xlu1 %1666 }
 0x738   : > { %v1669_v4 = vpop.permute.xlu0 %1668 }
 0x73a   : > { %v4580_v49 = vpop.eup %4579 }
 0x73b   : > { %v4582_v50 = vpop.eup %4581  ;;  %v1605_v55 = vmul.f32 %v4580_v49, %v4574_v33  ;;  %v1853_v3 = vpop.permute.xlu1 %1852 }
 0x73c   : > { %v1604_v60 = vmul.f32 %v4582_v50, %v4572_v32  ;;  %v1864_v6 = vsel %vm1501_vm2, %v1853_v3, 0  ;;  %v1847_v7 = vpop.permute.xlu0 %1846 }
 0x73d   : > { %v4584_v52 = vpop.eup %4583 }
 0x73e   : > { %v4586_v53 = vpop.eup %4585  ;;  %v1606_v56 = vmul.f32 %v4584_v52, %v4578_v37 }
 0x73f   : > { %v1603_v59 = vmul.f32 %v4586_v53, %v4576_v36  ;;  %v1851_v8 = vpop.permute.xlu1 %1850 }
 0x740   : > { %v1608_v61 = vpack.c.bf16 %v1606_v56, %v1605_v55  ;;  %v1861_v9 = vsel %vm1501_vm2, %v1851_v8, 0 }
 0x741   : > { %v1607_v62 = vpack.c.bf16 %v1604_v60, %v1603_v59 }
 0x743   : > { %4051 = vmatprep.mubr.msk.bf16.mxu1 %vm1501_vm2, %v1607_v62  ;;  %v1849_v10 = vpop.permute.xlu1 %1848 }
 0x744   : > { %4052 = vmatmul.mubr.msk.bf16.vlgmr.msra.gmra.mxu1 %vm1501_vm2, %v1608_v61 }
 0x745   : > { %4056 = vmatpush3.bf16.xpose.msra.mxu1 %v1686_v63  ;;  %4059 = vmatprep.mubr.msk.bf16.mxu1 %vm1501_vm2, %v1667_v0 }
 0x746   : > { %4170 = vmatprep.subr.msk.bf16.mxu1 %vm1501_vm2, %v1673_v54 }
 0x74d   : > { %4058 = vmatpush3.bf16.xpose.msra.mxu1 %v1683_v2 }
 0x74e   : > { %4171 = vmatprep.subr.msk.bf16.mxu1 %vm1501_vm2, %v1853_v3 }
 0x754   : > { %4060 = vmatmul.mubr.msk.bf16.vlgmr.msra.gmra.mxu1 %vm1501_vm2, %v1669_v4 }
 0x755   : > { %4072 = vmatpush3.bf16.xpose.msra.mxu1 %v1864_v6  ;;  %4075 = vmatprep.mubr.msk.bf16.mxu1 %vm1501_vm2, %v1847_v7 }
 0x756   : > { %4172 = vmatprep.subr.msk.bf16.mxu1 %vm1501_vm2, %v1851_v8 }
 0x75d   : > { %4074 = vmatpush3.bf16.xpose.msra.mxu1 %v1861_v9 }
 0x764   : > { %4076 = vmatmul.mubr.msk.bf16.vlgmr.msra.gmra.mxu1 %vm1501_vm2, %v1849_v10 }
 0x804   : > { %v5749_v11 = vpop.f32.mrf.mxu1 }
 0x806   : > { %v5751_v12 = vpop.f32.mrf.mxu1 }
 0x808   : > { %v5753_v13 = vpop.f32.mrf.mxu1 }
 0x80a   : > { %v5755_v14 = vpop.f32.mrf.mxu1 }
 0x814   : > { %v4061_v15 = vpop.f32.mrf.mxu1 }
 0x815   : > { %v5783_v62 = vadd.f32 %v4061_v15, %v5705_v5 }
 0x816   : > { %v1722_v16 = vpop.f32.mrf.mxu1 }
 0x817   : > { %v1723_v61 = vadd.f32 %v1722_v16, %v5705_v5 }
 0x818   : > { %v4062_v17 = vpop.f32.mrf.mxu1 }
 0x819   : > { %v1737_v63 = vsel %vm1501_vm2, %v1723_v61, -inf  ;;  %v5790_v0 = vadd.f32 %v4062_v17, %v5705_v5 }
 0x81a   : > { %v1725_v19 = vpop.f32.mrf.mxu1 }
 0x824   : > { %v4077_v20 = vpop.f32.mrf.mxu1 }
 0x825   : > { %v1909_v25 = vadd.f32 %v4077_v20, %v5705_v5 }
 0x826   : > { %v1900_v18 = vpop.f32.mrf.mxu1 }
 0x827   : > { %v1901_v23 = vadd.f32 %v1900_v18, %v5705_v5  ;;  %v1921_v32 = vsel %vm1501_vm2, %v1909_v25, -inf }
 0x828   : > { %v4078_v24 = vpop.f32.mrf.mxu1 }
 0x829   : > { %v1915_v27 = vsel %vm1501_vm2, %v1901_v23, -inf  ;;  %v1912_v30 = vadd.f32 %v4078_v24, %v5705_v5 }
 0x82a   : > { %v1903_v28 = vpop.f32.mrf.mxu1  ;;  %1916 = vmax.xlane.f32.xlu0 %v1915_v27 }
 0x82b   : > { %v1904_v29 = vadd.f32 %v1903_v28, %v5705_v5  ;;  %v1924_v33 = vsel %vm1501_vm2, %v1912_v30, -inf }
 0x82d   : > { %v1918_v31 = vsel %vm1501_vm2, %v1904_v29, -inf }
 0x82e   : > { %1919 = vmax.xlane.f32.xlu1 %v1918_v31  ;;  %1922 = vmax.xlane.f32.xlu0 %v1921_v32 }
 0x832   : > { %1925 = vmax.xlane.f32.xlu0 %v1924_v33 }
 0x83f   : > { %1961 = vrot.lane.b32.xlu1 %v5683_v51, %s5213_s13 }
 0x8b3   : > { %v1917_v34 = vpop.xlane.xlu0 %1916 }
 0x8b4   : > { %v1927_v35 = vsub.f32 %v1901_v23, %v1917_v34 }
 0x8b6   : > { %v1931_v43 = vmul.f32 1.442695, %v1927_v35 }
 0x8b7   : > { %v1920_v36 = vpop.xlane.xlu1 %1919  ;;  %v1923_v37 = vpop.xlane.xlu0 %1922 }
 0x8b8   : > { %v1929_v38 = vsub.f32 %v1909_v25, %v1923_v37  ;;  %v1928_v41 = vsub.f32 %v1904_v29, %v1920_v36 }
 0x8ba   : > { %v1935_v42 = vmul.f32 1.442695, %v1929_v38  ;;  %v1933_v48 = vmul.f32 1.442695, %v1928_v41 }
 0x8bb   : > { %v1926_v44 = vpop.xlane.xlu0 %1925  ;;  %v1962_v2 = vpop.permute.xlu1 %1961 }
 0x8bc   : > { %v1930_v45 = vsub.f32 %v1912_v30, %v1926_v44  ;;  %4587 = vpow2.f32 %v1935_v42 }
 0x8bd   : > { %4589 = vpow2.f32 %v1931_v43 }
 0x8be   : > { %v1937_v49 = vmul.f32 1.442695, %v1930_v45 }
 0x8c0   : > { %4591 = vpow2.f32 %v1937_v49 }
 0x8c1   : > { %4593 = vpow2.f32 %v1933_v48 }
 0x8c9   : > { %v4588_v50 = vpop.eup %4587 }
 0x8ca   : > { %v1945_v52 = vsel %vm1501_vm2, %v4588_v50, 0.0  ;;  %v4590_v53 = vpop.eup %4589 }
 0x8cb   : > { %1946 = vadd.xlane.f32.xlu0 %v1945_v52  ;;  %v1939_v59 = vsel %vm1501_vm2, %v4590_v53, 0.0 }
 0x8cd   : > { %v4592_v54 = vpop.eup %4591 }
 0x8ce   : > { %v1948_v55 = vsel %vm1501_vm2, %v4592_v54, 0.0  ;;  %v4594_v56 = vpop.eup %4593 }
 0x8cf   : > { %1949 = vadd.xlane.f32.xlu1 %v1948_v55  ;;  %1940 = vadd.xlane.f32.xlu0 %v1939_v59  ;;  %v1942_v60 = vsel %vm1501_vm2, %v4594_v56, 0.0 }
 0x8d3   : > { %1943 = vadd.xlane.f32.xlu1 %v1942_v60 }
 0x8e4   : > { %2028 = vrot.lane.b32.xlu1 %v5688_v57, %s5214_s23  ;;  %v5787_v57 = vadd.f32 %v1725_v19, %v5705_v5 }
 0x8e5   : > { %1963 = vrot.lane.b32.xlu0 %v5677_v47, %s5213_s13 }
 0x8e8   : > { %2026 = vrot.lane.b32.xlu1 %v5691_v58, %s5214_s23  ;;  %v1740_v58 = vsel %vm1501_vm2, %v5787_v57, -inf }
 0x8e9   : > { %2022 = vrot.lane.b32.xlu0 %v5675_v40, %s5214_s23  ;;  %v1743_v40 = vsel %vm1501_vm2, %v5783_v62, -inf }
 0x8ec   : > { %2024 = vrot.lane.b32.xlu1 %v5701_v1, %s5214_s23  ;;  %v1746_v1 = vsel %vm1501_vm2, %v5790_v0, -inf }
 0x908   : > { %1738 = vmax.xlane.f32.xlu0 %v1737_v63 }
 0x90c   : > { %1744 = vmax.xlane.f32.xlu0 %v1743_v40 }
 0x910   : > { %1741 = vmax.xlane.f32.xlu1 %v1740_v58  ;;  %1747 = vmax.xlane.f32.xlu0 %v1746_v1 }
 0x954   : > { %v1947_v3 = vpop.xlane.xlu0 %1946 }
 0x958   : > { %v1950_v4 = vpop.xlane.xlu1 %1949  ;;  %v1941_v6 = vpop.xlane.xlu0 %1940 }
 0x959   : > { %4595 = vrcp.f32 %v1950_v4 }
 0x95a   : > { %4597 = vrcp.f32 %v1941_v6 }
 0x95b   : > { %4599 = vrcp.f32 %v1947_v3 }
 0x95c   : > { %v1944_v7 = vpop.xlane.xlu1 %1943  ;;  %v1964_v8 = vpop.permute.xlu0 %1963 }
 0x95d   : > { %4601 = vrcp.f32 %v1944_v7  ;;  %4079 = vmatprep.subr.bf16.mxu1 %v1964_v8 }
 0x95e   : > { %4080 = vmatpush3.bf16.msra.mxu1 %v1964_v8 }
 0x95f   : > { %4081 = vmatprep.subr.bf16.mxu1 %v1962_v2 }
 0x960   : > { %v2029_v9 = vpop.permute.xlu1 %2028  ;;  %v2023_v28 = vpop.permute.xlu0 %2022 }
 0x961   : > { %v2040_v27 = vsel %vm1501_vm2, %v2029_v9, 0 }
 0x962   : > { %4082 = vmatpush3.bf16.msra.mxu1 %v1962_v2 }
 0x963   : > { %4173 = vmatprep.subr.msk.bf16.mxu1 %vm1501_vm2, %v2029_v9 }
 0x964   : > { %v2027_v29 = vpop.permute.xlu1 %2026 }
 0x965   : > { %v2037_v30 = vsel %vm1501_vm2, %v2027_v29, 0 }
 0x966   : > { %v4596_v10 = vpop.eup %4595 }
 0x967   : > { %v4598_v15 = vpop.eup %4597  ;;  %v1958_v19 = vmul.f32 %v4596_v10, %v4592_v54 }
 0x968   : > { %v4600_v16 = vpop.eup %4599  ;;  %v1955_v20 = vmul.f32 %v4598_v15, %v4590_v53  ;;  %v2025_v31 = vpop.permute.xlu1 %2024 }
 0x969   : > { %v1957_v23 = vmul.f32 %v4600_v16, %v4588_v50 }
 0x96a   : > { %v4602_v17 = vpop.eup %4601 }
 0x96b   : > { %v1956_v18 = vmul.f32 %v4602_v17, %v4594_v56  ;;  %v1960_v25 = vpack.c.bf16 %v1958_v19, %v1957_v23 }
 0x96d   : > { %v1959_v24 = vpack.c.bf16 %v1956_v18, %v1955_v20 }
 0x96f   : > { %4083 = vmatprep.mubr.msk.bf16.mxu1 %vm1501_vm2, %v1959_v24 }
 0x970   : > { %4084 = vmatmul.mubr.msk.bf16.vlgmr.msra.gmra.mxu1 %vm1501_vm2, %v1960_v25 }
 0x971   : > { %4088 = vmatpush3.bf16.xpose.msra.mxu1 %v2040_v27  ;;  %4091 = vmatprep.mubr.msk.bf16.mxu1 %vm1501_vm2, %v2023_v28 }
 0x972   : > { %4174 = vmatprep.subr.msk.bf16.mxu1 %vm1501_vm2, %v2027_v29 }
 0x979   : > { %4090 = vmatpush3.bf16.xpose.msra.mxu1 %v2037_v30 }
 0x980   : > { %4092 = vmatmul.mubr.msk.bf16.vlgmr.msra.gmra.mxu1 %vm1501_vm2, %v2025_v31 }
 0x981   : > { %2711 = vmatprep.mubr.bf16.mxu1 %v5210_v46 }
 0x991   : > { %v1739_v32 = vpop.xlane.xlu0 %1738 }
 0x992   : > { %v1749_v37 = vsub.f32 %v1723_v61, %v1739_v32 }
 0x994   : > { %v1753_v45 = vmul.f32 1.442695, %v1749_v37 }
 0x995   : > { %v1745_v35 = vpop.xlane.xlu0 %1744 }
 0x996   : > { %v1751_v44 = vsub.f32 %v5783_v62, %v1745_v35  ;;  %4603 = vpow2.f32 %v1753_v45 }
 0x998   : > { %v1757_v50 = vmul.f32 1.442695, %v1751_v44 }
 0x999   : > { %v1742_v41 = vpop.xlane.xlu1 %1741  ;;  %v1748_v49 = vpop.xlane.xlu0 %1747 }
 0x99a   : > { %v1750_v48 = vsub.f32 %v5787_v57, %v1742_v41  ;;  %v1752_v53 = vsub.f32 %v5790_v0, %v1748_v49  ;;  %4605 = vpow2.f32 %v1757_v50 }
 0x99c   : > { %v1755_v52 = vmul.f32 1.442695, %v1750_v48  ;;  %v1759_v55 = vmul.f32 1.442695, %v1752_v53 }
 0x99e   : > { %4607 = vpow2.f32 %v1755_v52 }
 0x99f   : > { %4609 = vpow2.f32 %v1759_v55 }
 0x9a3   : > { %v4604_v1 = vpop.eup %4603 }
 0x9a4   : > { %v1761_v4 = vsel %vm1501_vm2, %v4604_v1, 0.0 }
 0x9a7   : > { %v5829_v2 = vpop.eup %4605 }
 0x9ab   : > { %v4608_v6 = vpop.eup %4607 }
 0x9ac   : > { %v1764_v7 = vsel %vm1501_vm2, %v4608_v6, 0.0  ;;  %v5836_v8 = vpop.eup %4609 }
 0x9ad   : > { %v1770_v9 = vsel %vm1501_vm2, %v5836_v8, 0.0 }
 0xa30   : > { %v5807_v33 = vpop.f32.mrf.mxu1 }
 0xa32   : > { %v5809_v34 = vpop.f32.mrf.mxu1 }
 0xa34   : > { %v5811_v36 = vpop.f32.mrf.mxu1 }
 0xa35   : > { %v4428_v38 = vpack.i.bf16 %v5811_v36, %v5807_v33 }
 0xa36   : > { %v5815_v42 = vpop.f32.mrf.mxu1 }
 0xa37   : > { %v4423_v43 = vpack.i.bf16 %v5815_v42, %v5809_v34 }
 0xa40   : > { %v4093_v54 = vpop.f32.mrf.mxu1 }
 0xa41   : > { %v2085_v61 = vadd.f32 %v4093_v54, %v5705_v5 }
 0xa42   : > { %v2076_v56 = vpop.f32.mrf.mxu1 }
 0xa43   : > { %v2077_v59 = vadd.f32 %v2076_v56, %v5705_v5  ;;  %v2097_v58 = vsel %vm1501_vm2, %v2085_v61, -inf }
 0xa44   : > { %v4094_v60 = vpop.f32.mrf.mxu1 }
 0xa45   : > { %v2091_v62 = vsel %vm1501_vm2, %v2077_v59, -inf  ;;  %v2088_v40 = vadd.f32 %v4094_v60, %v5705_v5 }
 0xa46   : > { %v2079_v63 = vpop.f32.mrf.mxu1  ;;  %2092 = vmax.xlane.f32.xlu0 %v2091_v62 }
 0xa47   : > { %v2080_v57 = vadd.f32 %v2079_v63, %v5705_v5  ;;  %v2100_v3 = vsel %vm1501_vm2, %v2088_v40, -inf  ;;  %v1767_v5 = vsel %vm1501_vm2, %v5829_v2, 0.0 }
 0xa49   : > { %v2094_v0 = vsel %vm1501_vm2, %v2080_v57, -inf }
 0xa4a   : > { %2095 = vmax.xlane.f32.xlu1 %v2094_v0  ;;  %2098 = vmax.xlane.f32.xlu0 %v2097_v58 }
 0xa4e   : > { %2101 = vmax.xlane.f32.xlu1 %v2100_v3  ;;  %1762 = vadd.xlane.f32.xlu0 %v1761_v4 }
 0xa52   : > { %1765 = vadd.xlane.f32.xlu1 %v1764_v7  ;;  %1768 = vadd.xlane.f32.xlu0 %v1767_v5 }
 0xa56   : > { %1771 = vadd.xlane.f32.xlu1 %v1770_v9 }
 0xa67   : > { %1785 = vrot.lane.b32.xlu1 %v5683_v51, %s5212_s15 }
 0xa6b   : > { %2139 = vrot.lane.b32.xlu1 %v5677_v47, %s5214_s23 }
 0xacf   : > { %v2093_v10 = vpop.xlane.xlu0 %2092 }
 0xad0   : > { %v2103_v15 = vsub.f32 %v2077_v59, %v2093_v10 }
 0xad2   : > { %v2107_v20 = vmul.f32 1.442695, %v2103_v15 }
 0xad3   : > { %v2096_v16 = vpop.xlane.xlu1 %2095  ;;  %v2099_v17 = vpop.xlane.xlu0 %2098 }
 0xad4   : > { %v2105_v19 = vsub.f32 %v2085_v61, %v2099_v17  ;;  %v2104_v18 = vsub.f32 %v2080_v57, %v2096_v16  ;;  %v4475_v17 = vld [vmem:[%s2264_s5 + $0x38] sm:$0xff]  }
 0xad6   : > { %v2111_v23 = vmul.f32 1.442695, %v2105_v19  ;;  %v2109_v28 = vmul.f32 1.442695, %v2104_v18  ;;  %v4476_v19 = vld [vmem:[%s2264_s5 + $0x30] sm:$0xff]   ;;  %v4478_v18 = vld [vmem:[%s2264_s5 + $0x20] sm:$0xff]  }
 0xad7   : > { %v2102_v24 = vpop.xlane.xlu1 %2101  ;;  %v1763_v27 = vpop.xlane.xlu0 %1762 }
 0xad8   : > { %v2106_v25 = vsub.f32 %v2088_v40, %v2102_v24  ;;  %4611 = vpow2.f32 %v2111_v23  ;;  %v4479_v23 = vld [vmem:[%s2264_s5 + $0x18] sm:$0xff]  }
 0xad9   : > { %4613 = vpow2.f32 %v2107_v20  ;;  %v4477_v20 = vld [vmem:[%s2264_s5 + $0x28] sm:$0xff]  }
 0xada   : > { %v2113_v29 = vmul.f32 1.442695, %v2106_v25  ;;  %4615 = vrcp.f32 %v1763_v27  ;;  %v4480_v25 = vld [vmem:[%s2264_s5 + $0x10] sm:$0xff]  }
 0xadb   : > { %v1766_v30 = vpop.xlane.xlu1 %1765  ;;  %v1769_v59 = vpop.xlane.xlu0 %1768 }
 0xadc   : > { %4617 = vpow2.f32 %v2113_v29  ;;  %v4481_v29 = vld [vmem:[%s2264_s5 + $0x8] sm:$0xff]  }
 0xadd   : > { %4619 = vrcp.f32 %v1766_v30 }
 0xade   : > { %4621 = vpow2.f32 %v2109_v28 }
 0xadf   : > { %v1772_v55 = vpop.xlane.xlu1 %1771 }
 0xae0   : > { %4623 = vrcp.f32 %v1772_v55 }
 0xae1   : > { %4625 = vrcp.f32 %v1769_v59 }
 0xae3   : > { %v1786_v56 = vpop.permute.xlu1 %1785 }
 0xae5   : > { %v4612_v31 = vpop.eup %4611 }
 0xae6   : > { %v4614_v32 = vpop.eup %4613  ;;  %v2121_v35 = vsel %vm1501_vm2, %v4612_v31, 0.0 }
 0xae7   : > { %v4616_v37 = vpop.eup %4615  ;;  %2122 = vadd.xlane.f32.xlu0 %v2121_v35  ;;  %v2115_v49 = vsel %vm1501_vm2, %v4614_v32, 0.0  ;;  %v2140_v60 = vpop.permute.xlu1 %2139  ;;  %v4482_v35 = vld [vmem:[%s2264_s5] sm:$0xff]  }
 0xae8   : > { %v1777_v50 = vmul.f32 %v4616_v37, %v4604_v1 }
 0xae9   : > { %v4618_v41 = vpop.eup %4617 }
 0xaea   : > { %v4620_v44 = vpop.eup %4619  ;;  %v2124_v45 = vsel %vm1501_vm2, %v4618_v41, 0.0 }
 0xaeb   : > { %v4622_v48 = vpop.eup %4621  ;;  %2125 = vadd.xlane.f32.xlu1 %v2124_v45  ;;  %v1778_v52 = vmul.f32 %v4620_v44, %v4608_v6  ;;  %2116 = vadd.xlane.f32.xlu0 %v2115_v49 }
 0xaec   : > { %v2118_v54 = vsel %vm1501_vm2, %v4622_v48, 0.0 }
 0xaed   : > { %v1781_v53 = vpack.c.bf16 %v1778_v52, %v1777_v50  ;;  %v4624_v40 = vpop.eup %4623 }
 0xaef   : > { %4067 = vmatprep.mubr.msk.bf16.mxu0 %vm1501_vm2, %v1781_v53  ;;  %2119 = vadd.xlane.f32.xlu1 %v2118_v54 }
 0xb00   : > { %2137 = vrot.lane.b32.xlu1 %v5683_v51, %s5214_s23  ;;  %v4626_v51 = vpop.eup %4625 }
 0xb01   : > { %1787 = vrot.lane.b32.xlu0 %v5677_v47, %s5212_s15  ;;  %v1780_v47 = vmul.f32 %v4624_v40, %v5836_v8  ;;  %v1779_v58 = vmul.f32 %v4626_v51, %v5829_v2 }
 0xb03   : > { %v1782_v1 = vpack.c.bf16 %v1780_v47, %v1779_v58 }
 0xb70   : > { %v2123_v61 = vpop.xlane.xlu0 %2122 }
 0xb74   : > { %v2126_v62 = vpop.xlane.xlu1 %2125  ;;  %v2117_v63 = vpop.xlane.xlu0 %2116 }
 0xb75   : > { %4627 = vrcp.f32 %v2126_v62 }
 0xb76   : > { %4629 = vrcp.f32 %v2117_v63 }
 0xb77   : > { %4631 = vrcp.f32 %v2123_v61 }
 0xb78   : > { %v2120_v57 = vpop.xlane.xlu1 %2119  ;;  %v1788_v0 = vpop.permute.xlu0 %1787 }
 0xb79   : > { %4633 = vrcp.f32 %v2120_v57  ;;  %4063 = vmatprep.subr.bf16.mxu0 %v1788_v0 }
 0xb7a   : > { %4064 = vmatpush3.bf16.msra.mxu0 %v1788_v0 }
 0xb7b   : > { %4065 = vmatprep.subr.bf16.mxu0 %v1786_v56 }
 0xb7c   : > { %v2138_v4 = vpop.permute.xlu1 %2137 }
 0xb7e   : > { %4066 = vmatpush3.bf16.msra.mxu0 %v1786_v56 }
 0xb7f   : > { %4095 = vmatprep.subr.bf16.mxu0 %v2140_v60 }
 0xb81   : > { %4068 = vmatmul.mubr.msk.bf16.vlgmr.msra.gmra.mxu0 %vm1501_vm2, %v1782_v1 }
 0xb82   : > { %v4628_v3 = vpop.eup %4627  ;;  %4096 = vmatpush3.bf16.msra.mxu0 %v2140_v60 }
 0xb83   : > { %v4630_v6 = vpop.eup %4629  ;;  %4097 = vmatprep.subr.bf16.mxu0 %v2138_v4  ;;  %v2134_v9 = vmul.f32 %v4628_v3, %v4618_v41 }
 0xb84   : > { %v4632_v7 = vpop.eup %4631  ;;  %v2131_v10 = vmul.f32 %v4630_v6, %v4614_v32 }
 0xb85   : > { %v2133_v8 = vmul.f32 %v4632_v7, %v4612_v31 }
 0xb86   : > { %v4634_v5 = vpop.eup %4633  ;;  %4098 = vmatpush3.bf16.msra.mxu0 %v2138_v4 }
 0xb87   : > { %v2132_v15 = vmul.f32 %v4634_v5, %v4622_v48  ;;  %v2136_v2 = vpack.c.bf16 %v2134_v9, %v2133_v8  ;;  %4103 = vmatprep.subr.bf16.mxu0 %v4475_v17  ;;  %v3785_v9 = vld [vmem:[%s2281_s14] ss:$0 sm:$0xff] }
 0xb89   : > { %v2135_v16 = vpack.c.bf16 %v2132_v15, %v2131_v10 }
 0xb8b   : > { %4099 = vmatprep.mubr.msk.bf16.mxu0 %vm1501_vm2, %v2135_v16 }
 0xb8c   : > { %4100 = vmatmul.mubr.msk.bf16.vlgmr.msra.gmra.mxu0 %vm1501_vm2, %v2136_v2  ;;  %v4707_v2 = vld [vmem:[%s5592_s7] sm:$0xff] }
 0xb8d   : > { %4104 = vmatpush3.bf16.msra.mxu0 %v4475_v17 }
 0xb8e   : > { %4105 = vmatprep.subr.bf16.mxu0 %v4476_v19 }
 0xb91   : > { %4106 = vmatpush3.bf16.msra.mxu0 %v4476_v19 }
 0xb92   : > { %4107 = vmatprep.subr.bf16.mxu0 %v4477_v20 }
 0xb95   : > { %4108 = vmatpush3.bf16.msra.mxu0 %v4477_v20 }
 0xb96   : > { %4109 = vmatprep.subr.bf16.mxu0 %v4478_v18 }
 0xb99   : > { %4110 = vmatpush3.bf16.msra.mxu0 %v4478_v18  ;;  %v4708_v18 = vld [vmem:[%s5592_s7 + $0x10] sm:$0xff] }
 0xb9a   : > { %4111 = vmatprep.subr.bf16.mxu0 %v4479_v23 }
 0xb9d   : > { %4112 = vmatpush3.bf16.msra.mxu0 %v4479_v23 }
 0xb9e   : > { %4113 = vmatprep.subr.bf16.mxu0 %v4480_v25 }
 0xba1   : > { %4114 = vmatpush3.bf16.msra.mxu0 %v4480_v25  ;;  %v4709_v25 = vld [vmem:[%s5592_s7 + $0x8] sm:$0xff] }
 0xba2   : > { %4115 = vmatprep.subr.bf16.mxu0 %v4481_v29 }
 0xba5   : > { %4116 = vmatpush3.bf16.msra.mxu0 %v4481_v29 }
 0xba6   : > { %4117 = vmatprep.subr.bf16.mxu0 %v4482_v35 }
 0xba9   : > { %4118 = vmatpush3.bf16.msra.mxu0 %v4482_v35  ;;  %v4488_v35 = vld [vmem:[%s5909_s18 + $0xec] ss:$16 sps:$4 sm:$0xff]  }
 0xbaa   : > { %2732 = vmatprep.subr.bf16.mxu0 %v4488_v35 }
 0xc41   : > { %v4069_v24 = vpop.f32.mrf.mxu0 }
 0xc43   : > { %v1831_v27 = vpop.f32.mrf.mxu0 }
 0xc45   : > { %v4070_v28 = vpop.f32.mrf.mxu0 }
 0xc46   : > { %v4418_v30 = vpack.i.bf16 %v4070_v28, %v4069_v24  ;;  %v4710_v28 = vld [vmem:[%s5592_s7 + $0x18] sm:$0xff] }
 0xc47   : > { %v1834_v31 = vpop.f32.mrf.mxu0 }
 0xc48   : > { %v4413_v32 = vpack.i.bf16 %v1834_v31, %v1831_v27  ;;  %4419 = vrot.lane.b32.xlu1 %v4418_v30, %s5214_s23  ;;  %v4483_v30 = vld [vmem:[%s5909_s18 + $0xe0] ss:$16 sps:$4 sm:$0xff]   ;;  %v4485_v31 = vld [vmem:[%s5909_s18 + $0xe4] ss:$16 sps:$4 sm:$0xff]  }
 0xc49   : > { %2679 = vmatprep.subr.bf16.mxu1 %v4485_v31 }
 0xc4a   : > { %4414 = vrot.lane.b32.xlu0 %v4413_v32, %s5214_s23  ;;  %v4486_v32 = vld [vmem:[%s5909_s18 + $0xe8] ss:$16 sps:$4 sm:$0xff]   ;;  %2680 = vmatpush1.bf16.msra.mxu1 %v4483_v30  ;;  %s3798_s23 = sshll.u32 %s5169_s27, 2 }
 0xc4b   : > { %s2496_s22 = scalar_lea.vmem %s6287_s11, %s3798_s23 }
 0xc4c   : > { %v4101_v37 = vpop.f32.mrf.mxu0  ;;  %4429 = vrot.lane.b32.xlu1 %v4428_v38, %s5213_s13 }
 0xc4e   : > { %v2183_v41 = vpop.f32.mrf.mxu0  ;;  %4424 = vrot.lane.b32.xlu0 %v4423_v43, %s5213_s13  ;;  %s2392_s13 = scalar_lea.vmem [#allocation16], %s5169_s27 }
 0xc50   : > { %v4102_v44 = vpop.f32.mrf.mxu0 }
 0xc51   : > { %v4438_v45 = vpack.i.bf16 %v4102_v44, %v4101_v37 }
 0xc52   : > { %v2186_v48 = vpop.f32.mrf.mxu0 }
 0xc53   : > { %v4433_v49 = vpack.i.bf16 %v2186_v48, %v2183_v41  ;;  %4439 = vrot.lane.b32.xlu1 %v4438_v45, %s5212_s15 }
 0xc55   : > { %4434 = vrot.lane.b32.xlu0 %v4433_v49, %s5212_s15  ;;  %s2390_s15 = scalar_lea.vmem %s6286_s8, %s5169_s27 }
 0xcba   : > { %v4420_v50 = vpop.permute.xlu1 %4419 }
 0xcbb   : > { %v4422_v36 = vunpack.i.h.bf16 %v4420_v50  ;;  %v4421_v38 = vunpack.i.l.bf16 %v4420_v50 }
 0xcbc   : > { %v4415_v52 = vpop.permute.xlu0 %4414 }
 0xcbd   : > { %v4417_v54 = vunpack.i.h.bf16 %v4415_v52  ;;  %v4416_v55 = vunpack.i.l.bf16 %v4415_v52  ;;  %v2249_v62 = vsel %vm1501_vm2, %v5753_v13, %v4422_v36  ;;  %v2248_v63 = vsel %vm1501_vm2, %v5749_v11, %v4421_v38 }
 0xcbe   : > { %v4430_v53 = vpop.permute.xlu1 %4429 }
 0xcbf   : > { %v4432_v56 = vunpack.i.h.bf16 %v4430_v53  ;;  %v4431_v59 = vunpack.i.l.bf16 %v4430_v53  ;;  %v2247_v57 = vsel %vm1501_vm2, %v5755_v14, %v4417_v54  ;;  %v2246_v40 = vsel %vm1501_vm2, %v5751_v12, %v4416_v55 }
 0xcc0   : > { %v4425_v33 = vpop.permute.xlu0 %4424 }
 0xcc1   : > { %v4427_v34 = vunpack.i.h.bf16 %v4425_v33  ;;  %v4426_v42 = vunpack.i.l.bf16 %v4425_v33  ;;  %v2253_v51 = vsel %vm2250_vm4, %v2248_v63, %v4431_v59  ;;  %v2254_v47 = vsel %vm2250_vm4, %v2249_v62, %v4432_v56  ;;  %v4500_v62 = vld [vmem:[%s5909_s18 + $0xac] ss:$16 sps:$4 sm:$0xff]   ;;  %v4495_v63 = vld [vmem:[%s5909_s18 + $0xa0] ss:$16 sps:$4 sm:$0xff]  }
 0xcc3   : > { %v2251_v3 = vsel %vm2250_vm4, %v2246_v40, %v4426_v42  ;;  %v2252_v13 = vsel %vm2250_vm4, %v2247_v57, %v4427_v34  ;;  %v4491_v34 = vld [vmem:[%s5909_s18 + $0xc4] ss:$16 sps:$4 sm:$0xff]   ;;  %v4494_v42 = vld [vmem:[%s5909_s18 + $0xcc] ss:$16 sps:$4 sm:$0xff]   ;;  %v4498_v57 = vld [vmem:[%s5909_s18 + $0xa8] ss:$16 sps:$4 sm:$0xff]  }
 0xcc4   : > { %2681 = vmatprep.subr.bf16.mxu1 %v4491_v34  ;;  %v4503_v40 = vld [vmem:[%s5909_s18 + $0x84] ss:$16 sps:$4 sm:$0xff]  }
 0xcc5   : > { %v4440_v43 = vpop.permute.xlu1 %4439 }
 0xcc6   : > { %v4442_v60 = vunpack.i.h.bf16 %v4440_v43  ;;  %v4441_v61 = vunpack.i.l.bf16 %v4440_v43  ;;  %v4489_v43 = vld [vmem:[%s5909_s18 + $0xc0] ss:$16 sps:$4 sm:$0xff]  }
 0xcc7   : > { %v4435_v0 = vpop.permute.xlu0 %4434  ;;  %2682 = vmatpush1.bf16.msra.mxu1 %v4489_v43 }
 0xcc8   : > { %v4437_v58 = vunpack.i.h.bf16 %v4435_v0  ;;  %v4436_v1 = vunpack.i.l.bf16 %v4435_v0  ;;  %v2259_v11 = vsel %vm2255_vm5, %v2254_v47, %v4442_v60  ;;  %v2258_v14 = vsel %vm2255_vm5, %v2253_v51, %v4441_v61  ;;  %v4492_v60 = vld [vmem:[%s5909_s18 + $0xc8] ss:$16 sps:$4 sm:$0xff]   ;;  %v4497_v61 = vld [vmem:[%s5909_s18 + $0xa4] ss:$16 sps:$4 sm:$0xff]   ;;  %v4506_v0 = vld [vmem:[%s5909_s18 + $0x8c] ss:$16 sps:$4 sm:$0xff]  }
 0xcc9   : > { %v2261_v7 = vpack.c.bf16 %v2259_v11, %v2258_v14  ;;  %2683 = vmatprep.subr.bf16.mxu1 %v4497_v61  ;;  %v4501_v51 = vld [vmem:[%s5909_s18 + $0x80] ss:$16 sps:$4 sm:$0xff]   ;;  %v4504_v47 = vld [vmem:[%s5909_s18 + $0x88] ss:$16 sps:$4 sm:$0xff]   ;;  %v4515_v11 = vld [vmem:[%s5909_s18 + $0x44] ss:$16 sps:$4 sm:$0xff]  }
 0xcca   : > { %v2256_v4 = vsel %vm2255_vm5, %v2251_v3, %v4436_v1  ;;  %v2257_v12 = vsel %vm2255_vm5, %v2252_v13, %v4437_v58  ;;  %v4509_v58 = vld [vmem:[%s5909_s18 + $0x64] ss:$16 sps:$4 sm:$0xff]   ;;  %v4507_v1 = vld [vmem:[%s5909_s18 + $0x60] ss:$16 sps:$4 sm:$0xff]   ;;  %v4510_v3 = vld [vmem:[%s5909_s18 + $0x68] ss:$16 sps:$4 sm:$0xff]  }
 0xccb   : > { %v2260_v6 = vpack.c.bf16 %v2257_v12, %v2256_v4  ;;  %2684 = vmatpush1.bf16.msra.mxu1 %v4495_v63  ;;  %v4512_v13 = vld [vmem:[%s5909_s18 + $0x6c] ss:$16 sps:$4 sm:$0xff]   ;;  %v4513_v4 = vld [vmem:[%s5909_s18 + $0x40] ss:$16 sps:$4 sm:$0xff]   ;;  %v4516_v12 = vld [vmem:[%s5909_s18 + $0x48] ss:$16 sps:$4 sm:$0xff]  }
 0xccc   : > { %2685 = vmatprep.subr.bf16.mxu1 %v4503_v40  ;;  %v4518_v14 = vld [vmem:[%s5909_s18 + $0x4c] ss:$16 sps:$4 sm:$0xff]  }
 0xccd   : > { %4119 = vmatprep.mubr.bf16.mxu0 %v2260_v6  ;;  %v4521_v6 = vld [vmem:[%s5909_s18 + $0x24] ss:$16 sps:$4 sm:$0xff]   ;;  %v4532_v63 = vld [vmem:[%s5915_s21 + $0xf8] sm:$0xff]  }
 0xcce   : > { %4120 = vmatmul.mubr.bf16.vlgmr.msra.gmra.mxu0 %v2261_v7  ;;  %v4524_v7 = vld [vmem:[%s5909_s18 + $0x2c] ss:$16 sps:$4 sm:$0xff]  }
 0xccf   : > { %2764 = vmatprep.mubr.bf16.mxu0 %v5210_v46  ;;  %2733 = vmatpush1.bf16.msra.mxu0 %v4486_v32  ;;  %v4534_v40 = vld [vmem:[%s5915_s21 + $0xb8] sm:$0xff]  }
 0xcd0   : > { %2734 = vmatprep.subr.bf16.mxu0 %v4494_v42  ;;  %2686 = vmatpush1.bf16.msra.mxu1 %v4501_v51  ;;  %v4537_v51 = vld [vmem:[%s5915_s21 + $0x30] sm:$0xff]  }
 0xcd1   : > { %2687 = vmatprep.subr.bf16.mxu1 %v4509_v58  ;;  %v4539_v58 = vld [vmem:[%s5915_s21 + $0x68] sm:$0xff]  }
 0xcd3   : > { %2735 = vmatpush1.bf16.msra.mxu0 %v4492_v60 }
 0xcd4   : > { %2736 = vmatprep.subr.bf16.mxu0 %v4500_v62  ;;  %2688 = vmatpush1.bf16.msra.mxu1 %v4507_v1  ;;  %v4540_v1 = vld [vmem:[%s5915_s21 + $0xe8] sm:$0xff]  }
 0xcd5   : > { %2689 = vmatprep.subr.bf16.mxu1 %v4515_v11  ;;  %v4543_v11 = vld [vmem:[%s5915_s21 + $0x60] sm:$0xff]  }
 0xcd7   : > { %2737 = vmatpush1.bf16.msra.mxu0 %v4498_v57  ;;  %v4533_v57 = vld [vmem:[%s5915_s21 + $0x38] sm:$0xff]  }
 0xcd8   : > { %2738 = vmatprep.subr.bf16.mxu0 %v4506_v0  ;;  %2690 = vmatpush1.bf16.msra.mxu1 %v4513_v4  ;;  %v4536_v0 = vld [vmem:[%s5915_s21 + $0xf0] sm:$0xff]   ;;  %v4545_v4 = vld [vmem:[%s5915_s21 + $0x20] sm:$0xff]  }
 0xcd9   : > { %2691 = vmatprep.subr.bf16.mxu1 %v4521_v6  ;;  %v4547_v6 = vld [vmem:[%s5915_s21 + $0x58] sm:$0xff]  }
 0xcdb   : > { %2739 = vmatpush1.bf16.msra.mxu0 %v4504_v47  ;;  %v4538_v47 = vld [vmem:[%s5915_s21 + $0xb0] sm:$0xff]  }
 0xcdc   : > { %2740 = vmatprep.subr.bf16.mxu0 %v4512_v13  ;;  %v4542_v13 = vld [vmem:[%s5915_s21 + $0xa8] sm:$0xff]  }
 0xcdf   : > { %2741 = vmatpush1.bf16.msra.mxu0 %v4510_v3  ;;  %v4541_v3 = vld [vmem:[%s5915_s21 + $0x28] sm:$0xff]  }
 0xce0   : > { %2742 = vmatprep.subr.bf16.mxu0 %v4518_v14  ;;  %v4544_v14 = vld [vmem:[%s5915_s21 + $0xe0] sm:$0xff]  }
 0xce3   : > { %2743 = vmatpush1.bf16.msra.mxu0 %v4516_v12  ;;  %v4546_v12 = vld [vmem:[%s5915_s21 + $0xa0] sm:$0xff]  }
 0xce4   : > { %2744 = vmatprep.subr.bf16.mxu0 %v4524_v7  ;;  %v4548_v7 = vld [vmem:[%s5915_s21 + $0xd8] sm:$0xff]  }
 0xd8e   : > { %v4121_v5 = vpop.f32.mrf.mxu0 }
 0xd8f   : > { %v2380_v16 = vadd.f32 %v4121_v5, %v3785_v9  ;;  %v4519_v5 = vld [vmem:[%s5909_s18 + $0x20] ss:$16 sps:$4 sm:$0xff]  }
 0xd90   : > { %v2371_v10 = vpop.f32.mrf.mxu0  ;;  %2692 = vmatpush1.bf16.msra.mxu1 %v4519_v5  ;;  %v4549_v5 = vld [vmem:[%s5915_s21 + $0x18] sm:$0xff]  }
 0xd91   : > { %v2372_v15 = vadd.f32 %v3785_v9, %v2371_v10  ;;  %v5897_v23 = vadd.f32 %v4708_v18, %v2380_v16  ;;  %v4527_v10 = vld [vmem:[%s5909_s18 + $0x4] ss:$16 sps:$4 sm:$0xff]   ;;  %v4528_v16 = vld [vmem:[%s5909_s18 + $0x8] ss:$16 sps:$4 sm:$0xff]  }
 0xd92   : > { %v4122_v8 = vpop.f32.mrf.mxu0  ;;  %2693 = vmatprep.subr.bf16.mxu1 %v4527_v10  ;;  %v4551_v10 = vld [vmem:[%s5915_s21 + $0x50] sm:$0xff]  }
 0xd93   : > { %v5893_v17 = vadd.f32 %v4707_v2, %v2372_v15  ;;  %v2383_v24 = vadd.f32 %v4122_v8, %v3785_v9  ;;  %v4530_v15 = vld [vmem:[%s5909_s18 + $0xc] ss:$16 sps:$4 sm:$0xff]   ;;  %v4525_v8 = vld [vmem:[%s5909_s18] ss:$16 sps:$4 sm:$0xff]  }
 0xd94   : > { %v2374_v19 = vpop.f32.mrf.mxu0  ;;  %2694 = vmatpush1.bf16.msra.mxu1 %v4525_v8  ;;  %v4553_v8 = vld [vmem:[%s5915_s21 + $0x10] sm:$0xff]  }
 0xd95   : > { %v2375_v20 = vadd.f32 %v3785_v9, %v2374_v19  ;;  %2394 = vadd.xlane.f32.xlu0 %v5893_v17  ;;  %v5905_v29 = vadd.f32 %v4710_v28, %v2383_v24  ;;  %v4522_v9 = vld [vmem:[%s5909_s18 + $0x28] ss:$16 sps:$4 sm:$0xff]   ;;  %s2987_s18 = scalar_lea.vmem %s6288_s3, %s5169_s27 }
 0xd96   : > { %2745 = vmatpush1.bf16.msra.mxu0 %v4522_v9  ;;  %v4550_v9 = vld [vmem:[%s5915_s21 + $0x98] sm:$0xff]  }
 0xd97   : > { %v5900_v27 = vadd.f32 %v4709_v25, %v2375_v20  ;;  %2746 = vmatprep.subr.bf16.mxu0 %v4530_v15  ;;  %v4552_v15 = vld [vmem:[%s5915_s21 + $0xd0] sm:$0xff]  }
 0xd99   : > { %2396 = vadd.xlane.f32.xlu1 %v5900_v27  ;;  %2398 = vadd.xlane.f32.xlu0 %v5897_v23 }
 0xd9a   : > { %2747 = vmatpush1.bf16.msra.mxu0 %v4528_v16  ;;  %v4554_v16 = vld [vmem:[%s5915_s21 + $0x90] sm:$0xff]  }
 0xd9b   : > { %3982 = vmatprep.subr.bf16.mxu0 %v4532_v63 }
 0xd9d   : > { %2400 = vadd.xlane.f32.xlu0 %v5905_v29 }
 0xe1e   : > { %v2395_v37 = vpop.xlane.xlu0 %2394 }
 0xe1f   : > { %v2402_v41 = vmul.f32 0.0078125, %v2395_v37 }
 0xe21   : > { %v5918_v44 = vsub.f32 %v5893_v17, %v2402_v41 }
 0xe22   : > { %v2397_v45 = vpop.xlane.xlu1 %2396  ;;  %v2399_v48 = vpop.xlane.xlu0 %2398 }
 0xe23   : > { %v2403_v49 = vmul.f32 0.0078125, %v2397_v45  ;;  %v2404_v50 = vmul.f32 0.0078125, %v2399_v48  ;;  %v2410_v52 = vmul.f32 %v5918_v44, %v5918_v44  ;;  %v3794_v48 = vld [vmem:[%s2390_s15] ss:$0 sm:$0xff]  ;;  %s6290_s15 = sld [smem:[#allocation53_spill]] (!%p3881_p6) }
 0xe25   : > { %v5923_v53 = vsub.f32 %v5900_v27, %v2403_v49  ;;  %v5926_v33 = vsub.f32 %v5897_v23, %v2404_v50  ;;  %2414 = vadd.xlane.f32.xlu0 %v2410_v52 }
 0xe26   : > { %v2401_v36 = vpop.xlane.xlu0 %2400 }
 0xe27   : > { %v2405_v38 = vmul.f32 0.0078125, %v2401_v36  ;;  %v2411_v54 = vmul.f32 %v5923_v53, %v5923_v53  ;;  %v2412_v55 = vmul.f32 %v5926_v33, %v5926_v33 }
 0xe29   : > { %v5933_v56 = vsub.f32 %v5905_v29, %v2405_v38  ;;  %2416 = vadd.xlane.f32.xlu1 %v2411_v54  ;;  %2418 = vadd.xlane.f32.xlu0 %v2412_v55  ;;  %v3795_v38 = vld [vmem:[%s2392_s13] ss:$0 sm:$0xff] }
 0xe2b   : > { %v2413_v59 = vmul.f32 %v5933_v56, %v5933_v56 }
 0xe2d   : > { %2420 = vadd.xlane.f32.xlu1 %v2413_v59 }
 0xeae   : > { %v2415_v2 = vpop.xlane.xlu0 %2414 }
 0xeaf   : > { %v2422_v19 = vmul.f32 0.0078125, %v2415_v2  ;;  %v4555_v2 = vld [vmem:[%s5915_s21 + $0x48] sm:$0xff]  }
 0xeb1   : > { %v2426_v20 = vadd.f32 1e-05, %v2422_v19  ;;  %v4556_v19 = vld [vmem:[%s5915_s21 + $0xc8] sm:$0xff]  }
 0xeb2   : > { %v2417_v18 = vpop.xlane.xlu1 %2416  ;;  %v2419_v24 = vpop.xlane.xlu0 %2418 }
 0xeb3   : > { %4635 = vrsqrt.f32 %v2426_v20  ;;  %v2423_v25 = vmul.f32 0.0078125, %v2417_v18  ;;  %v2424_v28 = vmul.f32 0.0078125, %v2419_v24  ;;  %v4557_v20 = vld [vmem:[%s5915_s21 + $0x8] sm:$0xff]   ;;  %v4559_v24 = vld [vmem:[%s5915_s21 + $0x40] sm:$0xff]  }
 0xeb4   : > { %v4558_v18 = vld [vmem:[%s5915_s21 + $0x88] sm:$0xff]  }
 0xeb5   : > { %v2427_v30 = vadd.f32 1e-05, %v2423_v25  ;;  %v2428_v31 = vadd.f32 1e-05, %v2424_v28  ;;  %v4560_v25 = vld [vmem:[%s5915_s21 + $0xc0] sm:$0xff]  }
 0xeb6   : > { %v2421_v32 = vpop.xlane.xlu1 %2420  ;;  %v4561_v28 = vld [vmem:[%s5915_s21] sm:$0xff]  }
 0xeb7   : > { %4637 = vrsqrt.f32 %v2427_v30  ;;  %v2425_v35 = vmul.f32 0.0078125, %v2421_v32  ;;  %v4562_v30 = vld [vmem:[%s5915_s21 + $0x80] sm:$0xff]   ;;  %v2513_v32 = vsub.s32 3, %v5663_v21 }
 0xeb8   : > { %4639 = vrsqrt.f32 %v2428_v31  ;;  %v2497_v31 = vld [vmem:[%s2496_s22] sm:$0xf] }
 0xeb9   : > { %v2429_v37 = vadd.f32 1e-05, %v2425_v35  ;;  %v2502_v35 = vrot.slane %v2497_v31, %v1248_v22 }
 0xebb   : > { %4641 = vrsqrt.f32 %v2429_v37  ;;  %v2510_v37 = vrot.slane %v2497_v31, %v1256_v26 }
 0xec0   : > { %v4636_v41 = vpop.eup %4635 }
 0xec1   : > { %v2434_v45 = vmul.f32 %v4636_v41, %v5918_v44  ;;  %v6019_v41 = vrot.slane %v2497_v31, %v1252_v39 }
 0xec3   : > { %v2444_v52 = vmul.f32 %v3794_v48, %v2434_v45  ;;  %v6021_v45 = vrot.slane %v2497_v31, %v2513_v32 }
 0xec4   : > { %v4638_v49 = vpop.eup %4637 }
 0xec5   : > { %v2435_v50 = vmul.f32 %v4638_v49, %v5923_v53  ;;  %v4640_v36 = vpop.eup %4639  ;;  %v2454_v59 = vadd.f32 %v3795_v38, %v2444_v52 }
 0xec6   : > { %v2436_v42 = vmul.f32 %v4640_v36, %v5926_v33 }
 0xec7   : > { %v2445_v54 = vmul.f32 %v3794_v48, %v2435_v50 }
 0xec8   : > { %v4642_v55 = vpop.eup %4641  ;;  %v2446_v53 = vmul.f32 %v3794_v48, %v2436_v42 }
 0xec9   : > { %v2455_v34 = vadd.f32 %v3795_v38, %v2445_v54  ;;  %v2437_v43 = vmul.f32 %v4642_v55, %v5933_v56  ;;  %v4531_v56 = vld [vmem:[%s5915_s21 + $0x78] sm:$0xff]  }
 0xeca   : > { %v2456_v62 = vadd.f32 %v3795_v38, %v2446_v53  ;;  %3954 = vmatprep.subr.bf16.mxu1 %v4531_v56 }
 0xecb   : > { %v2458_v44 = vpack.c.bf16 %v2455_v34, %v2454_v59  ;;  %v2447_v60 = vmul.f32 %v3794_v48, %v2437_v43 }
 0xecd   : > { %2712 = vmatmul.mubr.bf16.vlgmr.msra.gmra.mxu1 %v2458_v44  ;;  %2765 = vmatmul.mubr.bf16.vlgmr.msra.gmra.mxu0 %v2458_v44  ;;  %v2457_v61 = vadd.f32 %v3795_v38, %v2447_v60 }
 0xece   : > { %2721 = vmatprep.mubr.bf16.mxu1 %v5210_v46  ;;  %2774 = vmatprep.mubr.bf16.mxu0 %v5210_v46  ;;  %v4535_v46 = vld [vmem:[%s5915_s21 + $0x70] sm:$0xff]  }
 0xecf   : > { %v2459_v33 = vpack.c.bf16 %v2457_v61, %v2456_v62  ;;  %3955 = vmatpush3.bf16.msra.mxu1 %v4533_v57  ;;  %3983 = vmatpush3.bf16.msra.mxu0 %v4534_v40 }
 0xed0   : > { %3956 = vmatprep.subr.bf16.mxu1 %v4535_v46  ;;  %3984 = vmatprep.subr.bf16.mxu0 %v4536_v0 }
 0xed3   : > { %3957 = vmatpush3.bf16.msra.mxu1 %v4537_v51  ;;  %3985 = vmatpush3.bf16.msra.mxu0 %v4538_v47 }
 0xed4   : > { %3958 = vmatprep.subr.bf16.mxu1 %v4539_v58  ;;  %3986 = vmatprep.subr.bf16.mxu0 %v4540_v1 }
 0xed5   : > { %2722 = vmatmul.mubr.bf16.gmra.mxu1 %v2459_v33  ;;  %2775 = vmatmul.mubr.bf16.gmra.mxu0 %v2459_v33 }
 0xed7   : > { %3959 = vmatpush3.bf16.msra.mxu1 %v4541_v3  ;;  %3987 = vmatpush3.bf16.msra.mxu0 %v4542_v13 }
 0xed8   : > { %3960 = vmatprep.subr.bf16.mxu1 %v4543_v11  ;;  %3988 = vmatprep.subr.bf16.mxu0 %v4544_v14 }
 0xedb   : > { %3961 = vmatpush3.bf16.msra.mxu1 %v4545_v4  ;;  %3989 = vmatpush3.bf16.msra.mxu0 %v4546_v12 }
 0xedc   : > { %3962 = vmatprep.subr.bf16.mxu1 %v4547_v6  ;;  %3990 = vmatprep.subr.bf16.mxu0 %v4548_v7 }
 0xedf   : > { %3963 = vmatpush3.bf16.msra.mxu1 %v4549_v5  ;;  %3991 = vmatpush3.bf16.msra.mxu0 %v4550_v9 }
 0xee0   : > { %3964 = vmatprep.subr.bf16.mxu1 %v4551_v10  ;;  %3992 = vmatprep.subr.bf16.mxu0 %v4552_v15 }
 0xee3   : > { %3965 = vmatpush3.bf16.msra.mxu1 %v4553_v8  ;;  %3993 = vmatpush3.bf16.msra.mxu0 %v4554_v16 }
 0xee4   : > { %3966 = vmatprep.subr.bf16.mxu1 %v4555_v2  ;;  %3994 = vmatprep.subr.bf16.mxu0 %v4556_v19 }
 0xee7   : > { %3967 = vmatpush3.bf16.msra.mxu1 %v4557_v20  ;;  %3995 = vmatpush3.bf16.msra.mxu0 %v4558_v18 }
 0xee8   : > { %3968 = vmatprep.subr.bf16.mxu1 %v4559_v24  ;;  %3996 = vmatprep.subr.bf16.mxu0 %v4560_v25 }
 0xeeb   : > { %3969 = vmatpush3.bf16.msra.mxu1 %v4561_v28  ;;  %3997 = vmatpush3.bf16.msra.mxu0 %v4562_v30 }
 0xf8d   : > { %v2713_v48 = vpop.f32.mrf.mxu1  ;;  %v2766_v49 = vpop.f32.mrf.mxu0 }
 0xf8e   : > { %v6023_v50 = vadd.f32 %v2713_v48, %v2502_v35  ;;  %v6025_v52 = vadd.f32 %v2766_v49, %v2510_v37 }
 0xf8f   : > { %v2715_v36 = vpop.f32.mrf.mxu1  ;;  %v2768_v38 = vpop.f32.mrf.mxu0 }
 0xf90   : > { %v3831_v54 = vmul.f32 -1.702, %v6023_v50  ;;  %v3833_v22 = vmul.f32 -1.702, %v6025_v52  ;;  %v6030_v26 = vadd.f32 %v2715_v36, %v6019_v41  ;;  %v6033_v21 = vadd.f32 %v2768_v38, %v6021_v45 }
 0xf91   : > { %v2717_v39 = vpop.f32.mrf.mxu1  ;;  %v2770_v55 = vpop.f32.mrf.mxu0 }
 0xf92   : > { %v2817_v59 = vmul.f32 1.442695, %v3831_v54  ;;  %v2821_v34 = vmul.f32 1.442695, %v3833_v22  ;;  %v3832_v42 = vmul.f32 -1.702, %v6030_v26  ;;  %v6036_v43 = vadd.f32 %v2717_v39, %v2502_v35 }
 0xf93   : > { %v3834_v44 = vmul.f32 -1.702, %v6033_v21  ;;  %v6039_v60 = vadd.f32 %v2770_v55, %v2510_v37  ;;  %v2719_v53 = vpop.f32.mrf.mxu1  ;;  %v2772_v61 = vpop.f32.mrf.mxu0 }
 0xf94   : > { %4643 = vpow2.f32 %v2817_v59  ;;  %v2819_v62 = vmul.f32 1.442695, %v3832_v42  ;;  %v3835_v33 = vmul.f32 -1.702, %v6036_v43  ;;  %v6043_v56 = vadd.f32 %v2719_v53, %v6019_v41 }
 0xf95   : > { %4645 = vpow2.f32 %v2821_v34  ;;  %v2823_v63 = vmul.f32 1.442695, %v3834_v44  ;;  %v3837_v57 = vmul.f32 -1.702, %v6039_v60  ;;  %v6047_v40 = vadd.f32 %v2772_v61, %v6021_v45  ;;  %v2723_v46 = vpop.f32.mrf.mxu1  ;;  %v2776_v0 = vpop.f32.mrf.mxu0 }
 0xf96   : > { %4647 = vpow2.f32 %v2819_v62  ;;  %v2825_v51 = vmul.f32 1.442695, %v3835_v33  ;;  %v3836_v47 = vmul.f32 -1.702, %v6043_v56  ;;  %v6050_v58 = vadd.f32 %v2723_v46, %v2502_v35 }
 0xf97   : > { %4649 = vpow2.f32 %v2823_v63  ;;  %v2829_v1 = vmul.f32 1.442695, %v3837_v57  ;;  %v3838_v3 = vmul.f32 -1.702, %v6047_v40  ;;  %v6053_v13 = vadd.f32 %v2776_v0, %v2510_v37  ;;  %v2725_v11 = vpop.f32.mrf.mxu1  ;;  %v2778_v14 = vpop.f32.mrf.mxu0 }
 0xf98   : > { %4651 = vpow2.f32 %v2825_v51  ;;  %v2827_v4 = vmul.f32 1.442695, %v3836_v47  ;;  %v3839_v12 = vmul.f32 -1.702, %v6050_v58  ;;  %v6057_v6 = vadd.f32 %v2725_v11, %v6019_v41 }
 0xf99   : > { %4653 = vpow2.f32 %v2829_v1  ;;  %v2831_v7 = vmul.f32 1.442695, %v3838_v3  ;;  %v3841_v5 = vmul.f32 -1.702, %v6053_v13  ;;  %v6061_v9 = vadd.f32 %v2778_v14, %v6021_v45  ;;  %v2727_v10 = vpop.f32.mrf.mxu1  ;;  %v2780_v15 = vpop.f32.mrf.mxu0 }
 0xf9a   : > { %4655 = vpow2.f32 %v2827_v4  ;;  %v2833_v8 = vmul.f32 1.442695, %v3839_v12  ;;  %v3840_v16 = vmul.f32 -1.702, %v6057_v6  ;;  %v6064_v2 = vadd.f32 %v2727_v10, %v2502_v35 }
 0xf9b   : > { %4657 = vpow2.f32 %v2831_v7  ;;  %v2837_v19 = vmul.f32 1.442695, %v3841_v5  ;;  %v3842_v20 = vmul.f32 -1.702, %v6061_v9  ;;  %v6067_v18 = vadd.f32 %v2780_v15, %v2510_v37  ;;  %v2729_v24 = vpop.f32.mrf.mxu1  ;;  %v2782_v25 = vpop.f32.mrf.mxu0 }
 0xf9c   : > { %4659 = vpow2.f32 %v2833_v8  ;;  %v2835_v28 = vmul.f32 1.442695, %v3840_v16  ;;  %v3843_v30 = vmul.f32 -1.702, %v6064_v2  ;;  %v6071_v31 = vadd.f32 %v2729_v24, %v6019_v41 }
 0xf9d   : > { %4661 = vpow2.f32 %v2837_v19  ;;  %v2839_v32 = vmul.f32 1.442695, %v3842_v20  ;;  %v3845_v35 = vmul.f32 -1.702, %v6067_v18  ;;  %v6075_v48 = vadd.f32 %v2782_v25, %v6021_v45 }
 0xf9e   : > { %4663 = vpow2.f32 %v2835_v28  ;;  %v2841_v49 = vmul.f32 1.442695, %v3843_v30  ;;  %v3844_v37 = vmul.f32 -1.702, %v6071_v31 }
 0xf9f   : > { %4665 = vpow2.f32 %v2839_v32  ;;  %v2845_v36 = vmul.f32 1.442695, %v3845_v35  ;;  %v3846_v38 = vmul.f32 -1.702, %v6075_v48 }
 0xfa0   : > { %4667 = vpow2.f32 %v2841_v49  ;;  %v2843_v54 = vmul.f32 1.442695, %v3844_v37 }
 0xfa1   : > { %v4644_v22 = vpop.eup %4643  ;;  %4669 = vpow2.f32 %v2845_v36  ;;  %v2847_v41 = vmul.f32 1.442695, %v3846_v38 }
 0xfa2   : > { %v4646_v39 = vpop.eup %4645  ;;  %v2849_v55 = vadd.f32 1.0, %v4644_v22  ;;  %4671 = vpow2.f32 %v2843_v54 }
 0xfa3   : > { %v4648_v59 = vpop.eup %4647  ;;  %v2851_v34 = vadd.f32 1.0, %v4646_v39  ;;  %4673 = vpow2.f32 %v2847_v41 }
 0xfa4   : > { %v4650_v45 = vpop.eup %4649  ;;  %4675 = vrcp.f32 %v2849_v55  ;;  %v2850_v42 = vadd.f32 1.0, %v4648_v59 }
 0xfa5   : > { %v4652_v44 = vpop.eup %4651  ;;  %4677 = vrcp.f32 %v2851_v34  ;;  %v2852_v53 = vadd.f32 1.0, %v4650_v45 }
 0xfa6   : > { %v4654_v61 = vpop.eup %4653  ;;  %4679 = vrcp.f32 %v2850_v42  ;;  %v2853_v62 = vadd.f32 1.0, %v4652_v44 }
 0xfa7   : > { %v4656_v33 = vpop.eup %4655  ;;  %4681 = vrcp.f32 %v2852_v53  ;;  %v2855_v63 = vadd.f32 1.0, %v4654_v61 }
 0xfa8   : > { %v4658_v57 = vpop.eup %4657  ;;  %4683 = vrcp.f32 %v2853_v62  ;;  %v2854_v46 = vadd.f32 1.0, %v4656_v33 }
 0xfa9   : > { %v4660_v0 = vpop.eup %4659  ;;  %4685 = vrcp.f32 %v2855_v63  ;;  %v2856_v51 = vadd.f32 1.0, %v4658_v57 }
 0xfaa   : > { %v4662_v47 = vpop.eup %4661  ;;  %4687 = vrcp.f32 %v2854_v46  ;;  %v2857_v1 = vadd.f32 1.0, %v4660_v0 }
 0xfab   : > { %v4664_v3 = vpop.eup %4663  ;;  %4689 = vrcp.f32 %v2856_v51  ;;  %v2859_v11 = vadd.f32 1.0, %v4662_v47 }
 0xfac   : > { %v4666_v14 = vpop.eup %4665  ;;  %4691 = vrcp.f32 %v2857_v1  ;;  %v2858_v4 = vadd.f32 1.0, %v4664_v3 }
 0xfad   : > { %v4668_v12 = vpop.eup %4667  ;;  %4693 = vrcp.f32 %v2859_v11  ;;  %v2860_v7 = vadd.f32 1.0, %v4666_v14 }
 0xfae   : > { %v4670_v5 = vpop.eup %4669  ;;  %4695 = vrcp.f32 %v2858_v4  ;;  %v2861_v10 = vadd.f32 1.0, %v4668_v12 }
 0xfaf   : > { %v4672_v15 = vpop.eup %4671  ;;  %4697 = vrcp.f32 %v2860_v7  ;;  %v2863_v8 = vadd.f32 1.0, %v4670_v5 }
 0xfb0   : > { %v4674_v16 = vpop.eup %4673  ;;  %4699 = vrcp.f32 %v2861_v10  ;;  %v2862_v19 = vadd.f32 1.0, %v4672_v15 }
 0xfb1   : > { %v4676_v20 = vpop.eup %4675  ;;  %4701 = vrcp.f32 %v2863_v8  ;;  %v2864_v24 = vadd.f32 1.0, %v4674_v16 }
 0xfb2   : > { %v4678_v25 = vpop.eup %4677  ;;  %4703 = vrcp.f32 %v2862_v19  ;;  %v2897_v39 = vmul.f32 %v4676_v20, %v6023_v50 }
 0xfb3   : > { %v4680_v28 = vpop.eup %4679  ;;  %4705 = vrcp.f32 %v2864_v24  ;;  %v2899_v45 = vmul.f32 %v4678_v25, %v6025_v52 }
 0xfb4   : > { %v4682_v30 = vpop.eup %4681  ;;  %v2898_v38 = vmul.f32 %v4680_v28, %v6030_v26 }
 0xfb5   : > { %v4684_v32 = vpop.eup %4683  ;;  %v2900_v55 = vmul.f32 %v4682_v30, %v6033_v21 }
 0xfb6   : > { %v4686_v35 = vpop.eup %4685  ;;  %v2901_v37 = vmul.f32 %v4684_v32, %v6036_v43 }
 0xfb7   : > { %v4688_v49 = vpop.eup %4687  ;;  %v2903_v54 = vmul.f32 %v4686_v35, %v6039_v60 }
 0xfb8   : > { %v4690_v36 = vpop.eup %4689  ;;  %v2902_v22 = vmul.f32 %v4688_v49, %v6043_v56  ;;  %v2913_v43 = vpack.c.bf16 %v2901_v37, %v2897_v39 }
 0xfb9   : > { %v4692_v41 = vpop.eup %4691  ;;  %v2904_v59 = vmul.f32 %v4690_v36, %v6047_v40  ;;  %v2915_v26 = vpack.c.bf16 %v2903_v54, %v2899_v45 }
 0xfba   : > { %v4694_v34 = vpop.eup %4693  ;;  %v2914_v42 = vpack.c.bf16 %v2902_v22, %v2898_v38  ;;  %v2905_v63 = vmul.f32 %v4692_v41, %v6050_v58 }
 0xfbb   : > { %v4696_v44 = vpop.eup %4695  ;;  %v2916_v53 = vpack.c.bf16 %v2904_v59, %v2900_v55  ;;  %v2907_v0 = vmul.f32 %v4694_v34, %v6053_v13 }
 0xfbc   : > { %v4698_v61 = vpop.eup %4697  ;;  %3219 = vmatprep.mubr.bf16.mxu1 %v2914_v42  ;;  %v2906_v40 = vmul.f32 %v4696_v44, %v6057_v6 }
 0xfbd   : > { %v4700_v60 = vpop.eup %4699  ;;  %3268 = vmatprep.mubr.bf16.mxu0 %v2916_v53  ;;  %3220 = vmatmul.mubr.bf16.vlgmr.msra.gmra.mxu1 %v2913_v43  ;;  %v2908_v57 = vmul.f32 %v4698_v61, %v6061_v9 }
 0xfbe   : > { %v4702_v56 = vpop.eup %4701  ;;  %3269 = vmatmul.mubr.bf16.vlgmr.msra.gmra.mxu0 %v2915_v26  ;;  %v2909_v21 = vmul.f32 %v4700_v60, %v6064_v2 }
 0xfbf   : > { %v4704_v50 = vpop.eup %4703  ;;  %v2911_v52 = vmul.f32 %v4702_v56, %v6067_v18  ;;  %v3848_v18 = vld [vmem:[%s2987_s18] ss:$0 sm:$0xff] }
 0xfc0   : > { %v4706_v62 = vpop.eup %4705  ;;  %v2910_v33 = vmul.f32 %v4704_v50, %v6071_v31  ;;  %v2917_v1 = vpack.c.bf16 %v2909_v21, %v2905_v63 }
 0xfc1   : > { %v2912_v46 = vmul.f32 %v4706_v62, %v6075_v48  ;;  %v2919_v2 = vpack.c.bf16 %v2911_v52, %v2907_v0 }
 0xfc2   : > { %v2918_v51 = vpack.c.bf16 %v2910_v33, %v2906_v40 }
 0xfc3   : > { %v2920_v47 = vpack.c.bf16 %v2912_v46, %v2908_v57 }
 0xfc4   : > { %3227 = vmatprep.mubr.bf16.mxu1 %v2918_v51 }
 0xfc5   : > { %3276 = vmatprep.mubr.bf16.mxu0 %v2920_v47  ;;  %3228 = vmatmul.mubr.bf16.gmra.mxu1 %v2917_v1 }
 0xfc6   : > { %3277 = vmatmul.mubr.bf16.gmra.mxu0 %v2919_v2 }
0x107d   : > { %v3970_v6 = vpop.f32.mrf.mxu1 }
0x107e   : > { %v3998_v58 = vpop.f32.mrf.mxu0 }
0x107f   : > { %v3971_v9 = vpop.f32.mrf.mxu1 }
0x1080   : > { %v3972_v31 = vadd.f32 %v3971_v9, %v3970_v6  ;;  %v3999_v48 = vpop.f32.mrf.mxu0 }
0x1081   : > { %v3973_v13 = vpop.f32.mrf.mxu1  ;;  %v4000_v11 = vadd.f32 %v3999_v48, %v3998_v58 }
0x1082   : > { %v3222_v3 = vadd.f32 %v3972_v31, %v3848_v18  ;;  %v4001_v14 = vpop.f32.mrf.mxu0 }
0x1083   : > { %v3974_v4 = vpop.f32.mrf.mxu1 }
0x1084   : > { %v3271_v12 = vadd.f32 %v4000_v11, %v3222_v3  ;;  %v3975_v7 = vadd.f32 %v3974_v4, %v3973_v13  ;;  %v4002_v5 = vpop.f32.mrf.mxu0 }
0x1085   : > { %v3976_v10 = vpop.f32.mrf.mxu1  ;;  %v4003_v16 = vadd.f32 %v4002_v5, %v4001_v14 }
0x1086   : > { %v3285_v15 = vadd.f32 %v3271_v12, %v5893_v17  ;;  %v3225_v8 = vadd.f32 %v3975_v7, %v3848_v18  ;;  %v4004_v19 = vpop.f32.mrf.mxu0 }
0x1087   : > { %v3977_v20 = vpop.f32.mrf.mxu1 }
0x1088   : > { %3289 = vst [vmem:[%s5592_s7] sm:$0xff] %v3285_v15  ;;  %v3274_v24 = vadd.f32 %v4003_v16, %v3225_v8  ;;  %v3978_v25 = vadd.f32 %v3977_v20, %v3976_v10  ;;  %v4005_v28 = vpop.f32.mrf.mxu0 }
0x1089   : > { %v3979_v30 = vpop.f32.mrf.mxu1  ;;  %v4006_v49 = vadd.f32 %v4005_v28, %v4004_v19 }
0x108a   : > { %v3286_v32 = vadd.f32 %v3274_v24, %v5900_v27  ;;  %v3230_v35 = vadd.f32 %v3978_v25, %v3848_v18  ;;  %v4007_v37 = vpop.f32.mrf.mxu0 }
0x108b   : > { %v3980_v36 = vpop.f32.mrf.mxu1 }
0x108c   : > { %3290 = vst [vmem:[%s5592_s7 + $0x8] sm:$0xff] %v3286_v32  ;;  %v3279_v38 = vadd.f32 %v4006_v49, %v3230_v35  ;;  %v3981_v17 = vadd.f32 %v3980_v36, %v3979_v30  ;;  %v4008_v54 = vpop.f32.mrf.mxu0 }
0x108d   : > { %v4009_v39 = vadd.f32 %v4008_v54, %v4007_v37 }
0x108e   : > { %v3287_v22 = vadd.f32 %v3279_v38, %v5897_v23  ;;  %v3233_v41 = vadd.f32 %v3981_v17, %v3848_v18 }
0x1090   : > { %3291 = vst [vmem:[%s5592_s7 + $0x10] sm:$0xff] %v3287_v22  ;;  %v3282_v55 = vadd.f32 %v4009_v39, %v3233_v41  ;;  %3296 = sbr.rel (%p3881_p6) target bundleno = 4755 (0x1293), region = 156 }
0x1092   : > { %v3288_v59 = vadd.f32 %v3282_v55, %v5905_v29 }
0x1094   : > { %3292 = vst [vmem:[%s5592_s7 + $0x18] sm:$0xff] %v3288_v59 }
0x1095   : > { %vm3299_vm6 = vcmask 1040384   ;;  %v4711_v34 = vld [vmem:[#allocation20 + $0x38] sm:$0xff]   ;;  %v5215_v45 = vmov 0.0   ;;  %v4712_v42 = vld [vmem:[#allocation20 + $0x30] sm:$0xff]   ;;  %v4713_v61 = vld [vmem:[#allocation20 + $0x28] sm:$0xff]   ;;  %vm5216_vm7 = vmmov 0  }
0x1096   : > { %v3300_v27 = vsel %vm3299_vm6, %v3285_v15, 0.0  ;;  %4123 = vmatprep.subr.bf16.mxu0 %v5215_v45  ;;  %v4714_v26 = vld [vmem:[#allocation20 + $0x20] sm:$0xff]   ;;  %4139 = vmatprep.mubr.msk.bf16.mxu0 %vm5216_vm7, %v5215_v45  ;;  %v4715_v60 = vld [vmem:[#allocation20 + $0x18] sm:$0xff]   ;;  %v4716_v56 = vld [vmem:[#allocation20 + $0x10] sm:$0xff]  }
0x1097   : > { %3301 = vadd.xlane.f32.xlu0 %v3300_v27  ;;  %4124 = vmatpush3.bf16.msra.mxu0 %v4711_v34  ;;  %v4717_v50 = vld [vmem:[#allocation20 + $0x8] sm:$0xff]   ;;  %v4718_v21 = vld [vmem:[#allocation20] sm:$0xff]   ;;  %v3297_v63 = vld [vmem:[%s6289_s6] sm:$0x1] }
0x1098   : > { %4125 = vmatprep.subr.bf16.mxu0 %v5215_v45  ;;  %v3298_v46 = vld [vmem:[%s6290_s15] sm:$0x1] }
0x109b   : > { %4126 = vmatpush3.bf16.msra.mxu0 %v4712_v42 }
0x109c   : > { %4127 = vmatprep.subr.bf16.mxu0 %v5215_v45 }
0x109f   : > { %4128 = vmatpush3.bf16.msra.mxu0 %v4713_v61 }
0x10a0   : > { %4129 = vmatprep.subr.bf16.mxu0 %v5215_v45 }
0x10a3   : > { %4130 = vmatpush3.bf16.msra.mxu0 %v4714_v26 }
0x10a4   : > { %4131 = vmatprep.subr.bf16.mxu0 %v5215_v45 }
0x10a7   : > { %4132 = vmatpush3.bf16.msra.mxu0 %v4715_v60 }
0x10a8   : > { %4133 = vmatprep.subr.bf16.mxu0 %v5215_v45 }
0x10ab   : > { %4134 = vmatpush3.bf16.msra.mxu0 %v4716_v56 }
0x10ac   : > { %4135 = vmatprep.subr.bf16.mxu0 %v5215_v45 }
0x10af   : > { %4136 = vmatpush3.bf16.msra.mxu0 %v4717_v50 }
0x10b0   : > { %4137 = vmatprep.subr.bf16.mxu0 %v5215_v45 }
0x10b3   : > { %4138 = vmatpush3.bf16.msra.mxu0 %v4718_v21 }
0x1120   : > { %v3302_v23 = vpop.xlane.xlu0 %3301 }
0x1121   : > { %v3303_v44 = vmul.f32 0.0078125, %v3302_v23 }
0x1123   : > { %v3304_v43 = vsub.f32 %v3285_v15, %v3303_v44 }
0x1125   : > { %v3305_v53 = vmul.f32 %v3304_v43, %v3304_v43 }
0x1127   : > { %v3306_v29 = vsel %vm3299_vm6, %v3305_v53, 0.0 }
0x1128   : > { %3307 = vadd.xlane.f32.xlu0 %v3306_v29 }
0x11b1   : > { %v3308_v62 = vpop.xlane.xlu0 %3307 }
0x11b2   : > { %v3309_v40 = vmul.f32 0.0078125, %v3308_v62 }
0x11b4   : > { %v3310_v52 = vadd.f32 1e-05, %v3309_v40 }
0x11b6   : > { %4719 = vrsqrt.f32 %v3310_v52 }
0x11c3   : > { %v4720_v33 = vpop.eup %4719 }
0x11c4   : > { %v3312_v57 = vmul.f32 %v4720_v33, %v3304_v43 }
0x11c6   : > { %v3313_v0 = vmul.f32 %v3312_v57, %v3297_v63 }
0x11c8   : > { %v3314_v51 = vadd.f32 %v3313_v0, %v3298_v46 }
0x11ca   : > { %v3315_v47 = vpack.c.bf16 %v3314_v51, %v3314_v51 }
0x11cc   : > { %4140 = vmatmul.mubr.bf16.vlgmr.msra.gmra.mxu0 %v3315_v47 }
0x128c   : > { %v3414_v1 = vpop.f32.mrf.mxu0 }
0x128d   : > { %3420 = vst [vmem:[%s852_s12] sm:$0x1] %v3414_v1 }
0x128e   : > { %v4141_v2 = vpop.f32.mrf.mxu0 }
0x1290   : > { %v3417_v6 = vpop.f32.mrf.mxu0 }
0x1292   : > { %v4142_v58 = vpop.f32.mrf.mxu0 }
0x1293 PF: > { %s6291_s13 = sld [smem:[#allocation34_spill]]  ;;  %s3439_s10 = sshll.u32 %s5592_s7, 4  ;;  %s6123_s10 = int_to_ptr.vmem [resolvable:$true] %s3439_s10 }
0x1294   : > { %s6292_s11 = sld [smem:[#allocation54_spill]]  ;;  %s3422_s14 = scalar_lea.sflag [#allocation4], %s5558_s16 }
0x1295   : > { %s5035_s3 = scalar_lea.vmem %s6123_s10, 512  ;;  %s5217_s18 = smov [#allocation22]  }
0x1296   : > { %p5036_p12 = scmp.ne.s32.totalorder %s6123_s10, %s5035_s3  ;;  %s5039_s27 = sshll.u32 %s5217_s18, 4  ;;  %s5040_s27 = int_to_ptr.vmem [resolvable:$false] %s5039_s27 }
0x1297   : > { %s5041_s21 = scalar_lea.vmem %s5040_s27, 1024  ;;  %p5042_p2 = scmp.lt.s32.totalorder %s6123_s10, %s5040_s27 }
0x1298   : > { %p5037_p13 = pnand %p5036_p12, %p5523_p7  ;;  %p5043_p3 = scmp.lt.s32.totalorder %s5041_s21, %s5035_s3 }
0x1299   : > { %s3901_s23 = sshll.u32 %s6291_s13, 9 }
0x129a   : > { %s6120_s22 = scalar_lea.hbm %s6292_s11, %s3901_s23  ;;  %p5038_p0 = pneg %p5037_p13 }
0x129b   : > { %p5044_p1 = por %p5043_p3, %p5042_p2 }
0x129d   : > { %p5045_p8 = pnand %p5044_p1, %p5038_p0 }
0x129f   : > { %5048 = shalt.err (!%p5045_p8)
}
0x12a0   : > { %s5049_s7 = scalar_lea.hbm %s6120_s22, 512  ;;  %s5053_s8 = scalar_lea.hbm %s6292_s11, 1024 }
0x12a1   : > { %p5050_p5 = scmp.ne.s32.totalorder %s6120_s22, %s5049_s7  ;;  %p5054_p4 = scmp.lt.s32.totalorder %s6120_s22, %s6292_s11 }
0x12a2   : > { %p5055_p6 = scmp.lt.s32.totalorder %s5053_s8, %s5049_s7 }
0x12a3   : > { %p5051_p9 = pnand %p5050_p5, %p5523_p7 }
0x12a4   : > { %p5056_p12 = por %p5055_p6, %p5054_p4 }
0x12a5   : > { %p5052_p10 = pneg %p5051_p9 }
0x12a7   : > { %p5057_p13 = pnand %p5056_p12, %p5052_p10 }
0x12a9   : > { %5060 = shalt.err (!%p5057_p13)
}
0x12aa   : > { %s5218_s30 = smov 128   ;;  %s5219_s5 = smov 8  }
0x12ab   : > { %4221 = dma.vmem_to_hbm [thread:$0]  (%p5523_p7), %s6123_s10, 512, %s6120_s22, %s3422_s14, %s5218_s30, %s5218_s30, %s5219_s5  }
0x12ac   : > { %s3893_s3 = sshll.u32 %s6291_s13, 4  ;;  %s3455_s18 = sshll.u32 %s852_s12, 4  ;;  %s3456_s18 = int_to_ptr.vmem [resolvable:$true] %s3455_s18 }
0x12ad   : > { %s6293_s7 = sld [smem:[#allocation55_spill]]  ;;  %s3427_s9 = scalar_lea.sflag [#allocation24], %s5558_s16 }
0x12ae   : > { %s5061_s8 = scalar_lea.vmem %s3456_s18, 16  ;;  %s5220_s15 = smov [#allocation23]  }
0x12af   : > { %p5062_p0 = scmp.ne.s32.totalorder %s3456_s18, %s5061_s8  ;;  %s5065_s23 = sshll.u32 %s5220_s15, 4  ;;  %s5066_s23 = int_to_ptr.vmem [resolvable:$false] %s5065_s23 }
0x12b0   : > { %s5067_s11 = scalar_lea.vmem %s5066_s23, 32  ;;  %p5068_p1 = scmp.lt.s32.totalorder %s3456_s18, %s5066_s23 }
0x12b1   : > { %p5063_p2 = pnand %p5062_p0, %p5523_p7  ;;  %p5069_p8 = scmp.lt.s32.totalorder %s5067_s11, %s5061_s8 }
0x12b3   : > { %s3453_s6 = scalar_lea.hbm %s6293_s7, %s3893_s3  ;;  %p5064_p3 = pneg %p5063_p2 }
0x12b4   : > { %p5070_p5 = por %p5069_p8, %p5068_p1 }
0x12b6   : > { %p5071_p9 = pnand %p5070_p5, %p5064_p3 }
0x12b8   : > { %5074 = shalt.err (!%p5071_p9)
}
0x12b9   : > { %s5075_s12 = scalar_lea.hbm %s3453_s6, 16  ;;  %s5079_s22 = scalar_lea.hbm %s6293_s7, 32 }
0x12ba   : > { %p5076_p10 = scmp.ne.s32.totalorder %s3453_s6, %s5075_s12  ;;  %p5080_p12 = scmp.lt.s32.totalorder %s3453_s6, %s6293_s7 }
0x12bb   : > { %p5081_p13 = scmp.lt.s32.totalorder %s5079_s22, %s5075_s12 }
0x12bc   : > { %p5077_p4 = pnand %p5076_p10, %p5523_p7 }
0x12bd   : > { %p5082_p0 = por %p5081_p13, %p5080_p12 }
0x12be   : > { %p5078_p6 = pneg %p5077_p4 }
0x12c0   : > { %p5083_p2 = pnand %p5082_p0, %p5078_p6 }
0x12c2   : > { %5086 = shalt.err (!%p5083_p2)
}
0x12c3   : > { %4222 = dma.vmem_to_hbm [thread:$0]  (%p5523_p7), %s3456_s18, 16, %s3453_s6, %s3427_s9  }
0x12c4 PF: > { %p4293_p3 = scmp.ge.s32.totalorder %s5185_s0, 2  ;;  %s3467_s11 = sand.u32 1, %s5157_s2  }
0x12c5   : > { %s3468_s30 = scalar_lea.sflag [#allocation4], %s3467_s11 }
0x12c6   : > { %p4264_p1 = pnand %p4293_p3, %p5530_p11 }
0x12c8   : > { %p4265_p8 = pneg %p4264_p1 }
0x12ca   : > { %5148 = dma.done.wait (%p4265_p8), %s3468_s30, 512  }
0x12cb   : > { %5150 = vsyncadd (%p4265_p8), %s3468_s30, 4294966784  ;;  %s3477_s5 = scalar_lea.sflag [#allocation24], %s3467_s11 }
0x12cc   : > { %5152 = dma.done.wait (%p4265_p8), %s3477_s5, 16  }
0x12cd   : > { %5154 = vsyncadd (%p4265_p8), %s3477_s5, 4294967280  ;;  %s47_s0 = sadd.s32 1, %s5185_s0   ;;  %s6294_s2 = smov %s5161_s25 }
0x12ce   : > { %p44_p5 = scmp.ge.s32.totalorder %s47_s0, 6   ;;  %s6295_s25 = smov %s5165_s26 }
0x12cf   : > { %s6296_s26 = smov %s5537_s24  ;;  %s6297_s27 = smov %s5177_s28 }
0x12d0   : > { %s6298_s3 = smov %s5181_s29  ;;  %s6299_s28 = smov %s6302_s1 }
0x12d1   : > { %s6300_s29 = smov %s6306_s20  ;;  %46 = sbr.rel (!%p44_p5) target bundleno = 37 (0x25), region = 226 }
0x12d6   :  { %3481 = vsyncpa [#allocation3], 1 }
0x12d7   :  { %3483 = vsyncpa [#allocation3 + $0x1], 1 }
0x12d8   :  { %3484 = vsyncpa [#allocation6], 1 }
0x12d9   :  { %3485 = vsyncpa [#allocation9], 1 }
0x12da   :  { %3486 = vsyncpa [#allocation12], 1 }
0x12db   :  { %3487 = vsyncpa [#allocation15], 1 }
0x12dc   :  { %3488 = vsyncpa [#allocation18], 1 }
0x12dd   :  { %3489 = vsyncpa [#allocation21], 1 }
0x12de   :  { %3490 = vsyncpa [#allocation4], 1 }
0x12df   :  { %3492 = vsyncpa [#allocation4 + $0x1], 1 }
0x12e0   :  { %3493 = vsyncpa [#allocation24], 1 }
0x12e1   :  { %3495 = vsyncpa [#allocation24 + $0x1], 1 }

</bundles_post_ra>
